<compile_context>
chip_gen: v5e
topology: v5e:2x2
jax: 0.10.0
libtpu: 0.0.40
codegen_flags: <defaults>
</compile_context>

<pallas_src>
import functools

import jax
import jax.numpy as jnp
from jax.experimental import pallas as pl
from jax.experimental.pallas import tpu as pltpu

TM = 512  # row tile over the flattened N*H*W axis

_COMPILER_PARAMS = pltpu.CompilerParams(
    dimension_semantics=("parallel",),
    vmem_limit_bytes=32 * 1024 * 1024,
)


# ------------------------------------------------------------------ kernels --

def _fused_mm_kernel(x_ref, ps_ref, pb_ref, w_ref, qs_ref, qb_ref, o_ref, *,
                     pre, post):
    """o = [relu((.)*qs+qb)] ( [relu(x*ps+pb)] @ W ), bf16 MXU / f32 accumulation."""
    h = x_ref[...]
    if pre:
        h = jnp.maximum(h * ps_ref[...] + pb_ref[...], 0.0)
    y = jnp.dot(h.astype(jnp.bfloat16), w_ref[...],
                preferred_element_type=jnp.float32)
    if post:
        y = jnp.maximum(y * qs_ref[...] + qb_ref[...], 0.0)
    o_ref[...] = y


def _conv3x3_kernel(x_ref, w_ref, o_ref, *, hh, ww):
    """3x3 'same' conv on one image via 9 shifted-window matmuls.

    x_ref: (1, (H+3)*(W+2), Cin)  zero-padded activation, flattened per image.
    w_ref: (9, Cin, Cout)         bf16 taps in (ki, kj) order.
    o_ref: (1, H*(W+2), Cout)     output canvas (W-pad columns dropped in glue).
    """
    length = hh * (ww + 2)
    cout = o_ref.shape[-1]
    acc = jnp.zeros((length, cout), jnp.float32)
    for t in range(9):
        ki, kj = divmod(t, 3)
        off = ki * (ww + 2) + kj
        win = x_ref[0, off:off + length, :].astype(jnp.bfloat16)
        acc = acc + jnp.dot(win, w_ref[t], preferred_element_type=jnp.float32)
    o_ref[0] = acc


def _pool4_kernel(a_ref, b_ref, c_ref, d_ref, o_ref, *, op):
    if op == "max":
        o_ref[...] = jnp.maximum(jnp.maximum(a_ref[...], b_ref[...]),
                                 jnp.maximum(c_ref[...], d_ref[...]))
    else:
        o_ref[...] = (a_ref[...] + b_ref[...] + c_ref[...] + d_ref[...]) * 0.25


def _trans_fused_kernel(a_ref, b_ref, c_ref, d_ref, s_ref, t_ref, w_ref, o_ref):
    """TransitionBlock in one shot: BN+ReLU -> 2x2 avg pool -> 1x1 conv.

    Valid because avg-pool and 1x1 conv are both linear and therefore commute;
    pooling first cuts matmul FLOPs by 4x.
    """
    s = s_ref[...]
    t = t_ref[...]
    y = (jnp.maximum(a_ref[...] * s + t, 0.0)
         + jnp.maximum(b_ref[...] * s + t, 0.0)
         + jnp.maximum(c_ref[...] * s + t, 0.0)
         + jnp.maximum(d_ref[...] * s + t, 0.0)) * 0.25
    o_ref[...] = jnp.dot(y.astype(jnp.bfloat16), w_ref[...],
                         preferred_element_type=jnp.float32)


# --------------------------------------------------------------- call glue --

def _row_tile(m):
    tm = min(TM, m)
    if tm % 8 != 0:            # block 2nd-minor dim must be /8 or equal full dim
        tm = m
    return tm


def fused_matmul(x, w, pre_scale=None, pre_shift=None,
                 post_scale=None, post_shift=None):
    """(M, K) @ (K, N) with optional fused BN+ReLU prologue / epilogue."""
    m, k = x.shape
    n = w.shape[1]
    pre = pre_scale is not None
    post = post_scale is not None
    ps = (pre_scale if pre else jnp.ones((k,), jnp.float32)).reshape(1, k)
    pb = (pre_shift if pre else jnp.zeros((k,), jnp.float32)).reshape(1, k)
    qs = (post_scale if post else jnp.ones((n,), jnp.float32)).reshape(1, n)
    qb = (post_shift if post else jnp.zeros((n,), jnp.float32)).reshape(1, n)
    tm = _row_tile(m)
    return pl.pallas_call(
        functools.partial(_fused_mm_kernel, pre=pre, post=post),
        out_shape=jax.ShapeDtypeStruct((m, n), jnp.float32),
        grid=(pl.cdiv(m, tm),),
        in_specs=[pl.BlockSpec((tm, k), lambda i: (i, 0)),
                  pl.BlockSpec((1, k), lambda i: (0, 0)),
                  pl.BlockSpec((1, k), lambda i: (0, 0)),
                  pl.BlockSpec((k, n), lambda i: (0, 0)),
                  pl.BlockSpec((1, n), lambda i: (0, 0)),
                  pl.BlockSpec((1, n), lambda i: (0, 0))],
        out_specs=pl.BlockSpec((tm, n), lambda i: (i, 0)),
        compiler_params=_COMPILER_PARAMS,
    )(x, ps, pb, w, qs, qb)


def conv3x3_same(a, w_taps):
    """3x3 conv, stride 1, pad 1, on already-activated NHWC input.

    a:      (N, H, W, Cin) f32
    w_taps: (9, Cin, Cout) bf16
    """
    n, h, w, cin = a.shape
    cout = w_taps.shape[2]
    # One small zero-pad copy (H: +1/+2, W: +1/+1) instead of a 9x im2col blow-up.
    ap = jnp.pad(a, ((0, 0), (1, 2), (1, 1), (0, 0)))
    af = ap.reshape(n, (h + 3) * (w + 2), cin)      # contiguous -> free reshape
    length = h * (w + 2)
    oc = pl.pallas_call(
        functools.partial(_conv3x3_kernel, hh=h, ww=w),
        out_shape=jax.ShapeDtypeStruct((n, length, cout), jnp.float32),
        grid=(n,),
        in_specs=[pl.BlockSpec((1, (h + 3) * (w + 2), cin), lambda i: (i, 0, 0)),
                  pl.BlockSpec((9, cin, cout), lambda i: (0, 0, 0))],
        out_specs=pl.BlockSpec((1, length, cout), lambda i: (i, 0, 0)),
        compiler_params=_COMPILER_PARAMS,
    )(af, w_taps)
    # Drop the two junk pad columns per row of the output canvas.
    return oc.reshape(n, h, w + 2, cout)[:, :, :w, :]


def _pool_views(x):
    """Four shifted views of x for 2x2 / stride-2 pooling, flattened to rows."""
    n, h, w, c = x.shape
    ho, wo = h // 2, w // 2
    views = [x[:, i::2, j::2, :][:, :ho, :wo, :].reshape(n * ho * wo, c)
             for i in (0, 1) for j in (0, 1)]
    return views, ho, wo


def pool2x2(x, kind):
    """2x2 max/avg pooling (stride 2, floor) from its four shifted views."""
    n, h, w, c = x.shape
    views, ho, wo = _pool_views(x)
    m = n * ho * wo
    tm = _row_tile(m)
    out = pl.pallas_call(
        functools.partial(_pool4_kernel, op=kind),
        out_shape=jax.ShapeDtypeStruct((m, c), jnp.float32),
        grid=(pl.cdiv(m, tm),),
        in_specs=[pl.BlockSpec((tm, c), lambda i: (i, 0))] * 4,
        out_specs=pl.BlockSpec((tm, c), lambda i: (i, 0)),
        compiler_params=_COMPILER_PARAMS,
    )(*views)
    return out.reshape(n, ho, wo, c)


def transition_block(x, w_mat, norm):
    """avgpool2x2(conv1x1(relu(bn(x)))) fused as one kernel (pool first)."""
    n, h, w, cin = x.shape
    cout = w_mat.shape[1]
    views, ho, wo = _pool_views(x)
    m = n * ho * wo
    tm = _row_tile(m)
    s = norm[0].reshape(1, cin)
    t = norm[1].reshape(1, cin)
    out = pl.pallas_call(
        _trans_fused_kernel,
        out_shape=jax.ShapeDtypeStruct((m, cout), jnp.float32),
        grid=(pl.cdiv(m, tm),),
        in_specs=[pl.BlockSpec((tm, cin), lambda i: (i, 0))] * 4
        + [pl.BlockSpec((1, cin), lambda i: (0, 0))] * 2
        + [pl.BlockSpec((cin, cout), lambda i: (0, 0))],
        out_specs=pl.BlockSpec((tm, cout), lambda i: (i, 0)),
        compiler_params=_COMPILER_PARAMS,
    )(*views, s, t, w_mat)
    return out.reshape(n, ho, wo, cout)


# ---------------------------------------------------------- conv / helpers --

def _im2col(x, kh, kw, stride, pad):
    # x: (N, H, W, C) -> (N, Ho, Wo, kh*kw*C); column order = (ki, kj, c).
    n, h, w, c = x.shape
    xpad = jnp.pad(x, ((0, 0), (pad, pad), (pad, pad), (0, 0)))
    ho = (h + 2 * pad - kh) // stride + 1
    wo = (w + 2 * pad - kw) // stride + 1
    cols = []
    for i in range(kh):
        for j in range(kw):
            cols.append(xpad[:, i:i + stride * ho:stride,
                             j:j + stride * wo:stride, :])
    return jnp.concatenate(cols, axis=-1), ho, wo


def conv1x1(x, w_mat, pre=None, post=None):
    n, h, w, cin = x.shape
    cout = w_mat.shape[1]
    out = fused_matmul(
        x.reshape(n * h * w, cin), w_mat,
        pre_scale=None if pre is None else pre[0],
        pre_shift=None if pre is None else pre[1],
        post_scale=None if post is None else post[0],
        post_shift=None if post is None else post[1])
    return out.reshape(n, h, w, cout)


# ------------------------------------------------------------------- model --

def bottleneck_block(x, p):
    n, h, w, cin = x.shape
    inter = p["conv1_w"].shape[1]
    # relu(bn2(conv1(relu(bn1(x)))))  -- one fused row-tiled matmul kernel
    h1 = fused_matmul(x.reshape(n * h * w, cin), p["conv1_w"],
                      pre_scale=p["norm1"][0], pre_shift=p["norm1"][1],
                      post_scale=p["norm2"][0], post_shift=p["norm2"][1])
    h1 = h1.reshape(n, h, w, inter)
    out = conv3x3_same(h1, p["conv2_w"])     # tap-accumulating Pallas kernel
    # dropout: identity (eval mode)
    return jnp.concatenate([x, out], axis=-1)


def deep_cnn300_forward(params, x_nchw):
    x = jnp.transpose(x_nchw, (0, 2, 3, 1)).astype(jnp.float32)   # NCHW -> NHWC

    # conv0 7x7 s2 p3, with norm0+relu fused into the matmul epilogue
    n = x.shape[0]
    cols, ho, wo = _im2col(x, 7, 7, 2, 3)
    k = cols.shape[-1]
    cout0 = params["conv0_w"].shape[1]
    out = fused_matmul(cols.reshape(n * ho * wo, k), params["conv0_w"],
                       post_scale=params["norm0"][0],
                       post_shift=params["norm0"][1]).reshape(n, ho, wo, cout0)
    out = pool2x2(out, "max")                                      # maxpool 2x2

    for p in params["block1"]:                                     # block1
        out = bottleneck_block(out, p)
    out = transition_block(out, params["trans1_w"], params["trans1_norm"])

    for p in params["block2"]:                                     # block2
        out = bottleneck_block(out, p)
    # trans2: bn + relu + 1x1 conv (no pooling) fused into one matmul kernel
    out = conv1x1(out, params["trans2_w"], pre=params["trans2_norm"])
    return jnp.transpose(out, (0, 3, 1, 2))                        # NHWC -> NCHW


# ------------------------------------------------------------------ params --

def _bn_params(key, c, eps=1e-5):
    k1, k2, k3, k4 = jax.random.split(key, 4)
    gamma = jax.random.uniform(k1, (c,), minval=0.5, maxval=1.5)
    beta = jax.random.normal(k2, (c,)) * 0.1
    mean = jax.random.normal(k3, (c,)) * 0.1
    var = jax.random.uniform(k4, (c,), minval=0.5, maxval=1.5)
    scale = gamma / jnp.sqrt(var + eps)
    shift = beta - mean * scale
    return scale.astype(jnp.float32), shift.astype(jnp.float32)


def init_params(key, input_channel, num_in_features, depth, growth_rate):
    keys = iter(jax.random.split(key, 16 + 10 * depth))

    def conv_w(cout, cin, kh, kw):
        fan_in = cin * kh * kw
        return (jax.random.normal(next(keys), (cout, cin, kh, kw), jnp.float32)
                / jnp.sqrt(jnp.float32(fan_in)))

    def mat_1x1(w):          # (cout, cin, 1, 1) -> (cin, cout) bf16
        return w[:, :, 0, 0].T.astype(jnp.bfloat16)

    def mat_kxk(w):          # (cout, cin, kh, kw) -> (kh*kw*cin, cout) bf16
        cout, cin, kh, kw = w.shape
        return jnp.transpose(w, (2, 3, 1, 0)).reshape(kh * kw * cin,
                                                      cout).astype(jnp.bfloat16)

    def taps_3x3(w):         # (cout, cin, 3, 3) -> (9, cin, cout) bf16
        cout, cin, _, _ = w.shape
        return jnp.transpose(w, (2, 3, 1, 0)).reshape(9, cin,
                                                      cout).astype(jnp.bfloat16)

    def bottleneck_params(cin):
        inter = 3 * growth_rate
        return {"norm1": _bn_params(next(keys), cin),
                "conv1_w": mat_1x1(conv_w(inter, cin, 1, 1)),
                "norm2": _bn_params(next(keys), inter),
                "conv2_w": taps_3x3(conv_w(growth_rate, inter, 3, 3))}

    p = {}
    p["conv0_w"] = mat_kxk(conv_w(num_in_features, input_channel, 7, 7))
    p["norm0"] = _bn_params(next(keys), num_in_features)

    nf = num_in_features
    p["block1"] = [bottleneck_params(nf + i * growth_rate) for i in range(depth)]
    nf = nf + depth * growth_rate
    p["trans1_norm"] = _bn_params(next(keys), nf)
    p["trans1_w"] = mat_1x1(conv_w(nf // 2, nf, 1, 1))
    nf = nf // 2
    p["block2"] = [bottleneck_params(nf + i * growth_rate) for i in range(depth)]
    nf = nf + depth * growth_rate
    p["trans2_norm"] = _bn_params(next(keys), nf)
    p["trans2_w"] = mat_1x1(conv_w(nf // 2, nf, 1, 1))
    return p


# -------------------------------------------------------------------- main --

if __name__ == "__main__":
    key = jax.random.PRNGKey(0)
    kx, kp = jax.random.split(key)

    # Small config consistent with DeepCNN300(input_channel, num_in_features, ...)
    input_channel, num_in_features = 3, 16
    depth, growth_rate = 2, 8
    N, H, W = 2, 32, 32

    x = jax.random.normal(kx, (N, input_channel, H, W), jnp.float32)
    params = init_params(kp, input_channel, num_in_features, depth, growth_rate)

    fwd = jax.jit(deep_cnn300_forward)
    out = fwd(params, x)
    out = jax.block_until_ready(out)

    nf = num_in_features + depth * growth_rate        # after block1
    nf = nf // 2 + depth * growth_rate                # after trans1 + block2
    expected = (N, nf // 2, H // 8, W // 8)           # conv0 /2, maxpool /2, trans1 pool /2
    assert out.shape == expected, (out.shape, expected)
    assert jnp.all(jnp.isfinite(out))
    print("KERNEL_OK")
</pallas_src>

<mosaic_0001>
module attributes {stable_mosaic.version = 11 : i64} {
  func.func @_fused_mm_kernel(%arg0: i32, %arg1: memref<512x147xf32, #tpu.memory_space<vmem>>, %arg2: memref<1x147xf32, #tpu.memory_space<vmem>>, %arg3: memref<1x147xf32, #tpu.memory_space<vmem>>, %arg4: memref<147x16xbf16, #tpu.memory_space<vmem>>, %arg5: memref<1x16xf32, #tpu.memory_space<vmem>>, %arg6: memref<1x16xf32, #tpu.memory_space<vmem>>, %arg7: memref<512x16xf32, #tpu.memory_space<vmem>>) attributes {dimension_semantics = [#tpu.dimension_semantics<parallel>], iteration_bounds = array<i64: 1>, scalar_prefetch = 0 : i64, scratch_operands = 0 : i64, tpu.core_type = #tpu.core_type<tc>, window_params = [{transform_indices = @transform_0, window_bounds = array<i64: 512, 147>}, {pipeline_mode = #tpu.pipeline_mode<synchronous>, transform_indices = @transform_1, window_bounds = array<i64: 1, 147>}, {pipeline_mode = #tpu.pipeline_mode<synchronous>, transform_indices = @transform_2, window_bounds = array<i64: 1, 147>}, {pipeline_mode = #tpu.pipeline_mode<synchronous>, transform_indices = @transform_3, window_bounds = array<i64: 147, 16>}, {pipeline_mode = #tpu.pipeline_mode<synchronous>, transform_indices = @transform_4, window_bounds = array<i64: 1, 16>}, {pipeline_mode = #tpu.pipeline_mode<synchronous>, transform_indices = @transform_5, window_bounds = array<i64: 1, 16>}, {transform_indices = @transform_6, window_bounds = array<i64: 512, 16>}]} {
    %c0 = arith.constant 0 : index
    %c0_0 = arith.constant 0 : index
    %0 = vector.load %arg1[%c0, %c0_0] : memref<512x147xf32, #tpu.memory_space<vmem>>, vector<512x147xf32>
    %1 = arith.truncf %0 : vector<512x147xf32> to vector<512x147xbf16>
    %c0_1 = arith.constant 0 : index
    %c0_2 = arith.constant 0 : index
    %2 = vector.load %arg4[%c0_1, %c0_2] : memref<147x16xbf16, #tpu.memory_space<vmem>>, vector<147x16xbf16>
    %cst = arith.constant dense<0.000000e+00> : vector<512x16xf32>
    %3 = tpu.matmul %1, %2, %cst {dimension_numbers = #tpu.dot_dimension_numbers<[1], [0], [0], [1], [0, 0, 1, 1], [], []>} : vector<512x147xbf16>, vector<147x16xbf16>, vector<512x16xf32> -> vector<512x16xf32>
    %c0_3 = arith.constant 0 : index
    %c0_4 = arith.constant 0 : index
    %4 = vector.load %arg5[%c0_3, %c0_4] : memref<1x16xf32, #tpu.memory_space<vmem>>, vector<1x16xf32>
    %5 = vector.broadcast %4 : vector<1x16xf32> to vector<512x16xf32>
    %6 = arith.mulf %3, %5 : vector<512x16xf32>
    %c0_5 = arith.constant 0 : index
    %c0_6 = arith.constant 0 : index
    %7 = vector.load %arg6[%c0_5, %c0_6] : memref<1x16xf32, #tpu.memory_space<vmem>>, vector<1x16xf32>
    %8 = vector.broadcast %7 : vector<1x16xf32> to vector<512x16xf32>
    %9 = arith.addf %6, %8 : vector<512x16xf32>
    %cst_7 = arith.constant 0.000000e+00 : f32
    %10 = vector.broadcast %cst_7 : f32 to vector<512x16xf32>
    %11 = arith.maximumf %9, %10 : vector<512x16xf32>
    %c0_8 = arith.constant 0 : index
    %c0_9 = arith.constant 0 : index
    %12 = vector.load %arg7[%c0_8, %c0_9] : memref<512x16xf32, #tpu.memory_space<vmem>>, vector<512x16xf32>
    tpu.vector_store %arg7[%c0_8, %c0_9], %11 {strides = array<i32>} : memref<512x16xf32, #tpu.memory_space<vmem>>, vector<512x16xf32>,
    return
  }
  func.func @transform_0(%arg0: i32) -> (i32, i32) {
    %c0_i32 = arith.constant 0 : i32
    %c0_i32_0 = arith.constant 0 : i32
    return %arg0, %c0_i32 : i32, i32
  }
  func.func @transform_1(%arg0: i32) -> (i32, i32) {
    %c0_i32 = arith.constant 0 : i32
    %c0_i32_0 = arith.constant 0 : i32
    %c0_i32_1 = arith.constant 0 : i32
    return %c0_i32, %c0_i32_0 : i32, i32
  }
  func.func @transform_2(%arg0: i32) -> (i32, i32) {
    %c0_i32 = arith.constant 0 : i32
    %c0_i32_0 = arith.constant 0 : i32
    %c0_i32_1 = arith.constant 0 : i32
    return %c0_i32, %c0_i32_0 : i32, i32
  }
  func.func @transform_3(%arg0: i32) -> (i32, i32) {
    %c0_i32 = arith.constant 0 : i32
    %c0_i32_0 = arith.constant 0 : i32
    %c0_i32_1 = arith.constant 0 : i32
    return %c0_i32, %c0_i32_0 : i32, i32
  }
  func.func @transform_4(%arg0: i32) -> (i32, i32) {
    %c0_i32 = arith.constant 0 : i32
    %c0_i32_0 = arith.constant 0 : i32
    %c0_i32_1 = arith.constant 0 : i32
    return %c0_i32, %c0_i32_0 : i32, i32
  }
  func.func @transform_5(%arg0: i32) -> (i32, i32) {
    %c0_i32 = arith.constant 0 : i32
    %c0_i32_0 = arith.constant 0 : i32
    %c0_i32_1 = arith.constant 0 : i32
    return %c0_i32, %c0_i32_0 : i32, i32
  }
  func.func @transform_6(%arg0: i32) -> (i32, i32) {
    %c0_i32 = arith.constant 0 : i32
    %c0_i32_0 = arith.constant 0 : i32
    return %arg0, %c0_i32 : i32, i32
  }
}

module attributes {stable_mosaic.version = 11 : i64} {
  func.func @_fused_mm_kernel(%arg0: i32, %arg1: memref<128x16xf32, #tpu.memory_space<vmem>>, %arg2: memref<1x16xf32, #tpu.memory_space<vmem>>, %arg3: memref<1x16xf32, #tpu.memory_space<vmem>>, %arg4: memref<16x24xbf16, #tpu.memory_space<vmem>>, %arg5: memref<1x24xf32, #tpu.memory_space<vmem>>, %arg6: memref<1x24xf32, #tpu.memory_space<vmem>>, %arg7: memref<128x24xf32, #tpu.memory_space<vmem>>) attributes {dimension_semantics = [#tpu.dimension_semantics<parallel>], iteration_bounds = array<i64: 1>, scalar_prefetch = 0 : i64, scratch_operands = 0 : i64, tpu.core_type = #tpu.core_type<tc>, window_params = [{transform_indices = @transform_0, window_bounds = array<i64: 128, 16>}, {pipeline_mode = #tpu.pipeline_mode<synchronous>, transform_indices = @transform_1, window_bounds = array<i64: 1, 16>}, {pipeline_mode = #tpu.pipeline_mode<synchronous>, transform_indices = @transform_2, window_bounds = array<i64: 1, 16>}, {pipeline_mode = #tpu.pipeline_mode<synchronous>, transform_indices = @transform_3, window_bounds = array<i64: 16, 24>}, {pipeline_mode = #tpu.pipeline_mode<synchronous>, transform_indices = @transform_4, window_bounds = array<i64: 1, 24>}, {pipeline_mode = #tpu.pipeline_mode<synchronous>, transform_indices = @transform_5, window_bounds = array<i64: 1, 24>}, {transform_indices = @transform_6, window_bounds = array<i64: 128, 24>}]} {
    %c0 = arith.constant 0 : index
    %c0_0 = arith.constant 0 : index
    %0 = vector.load %arg1[%c0, %c0_0] : memref<128x16xf32, #tpu.memory_space<vmem>>, vector<128x16xf32>
    %c0_1 = arith.constant 0 : index
    %c0_2 = arith.constant 0 : index
    %1 = vector.load %arg2[%c0_1, %c0_2] : memref<1x16xf32, #tpu.memory_space<vmem>>, vector<1x16xf32>
    %2 = vector.broadcast %1 : vector<1x16xf32> to vector<128x16xf32>
    %3 = arith.mulf %0, %2 : vector<128x16xf32>
    %c0_3 = arith.constant 0 : index
    %c0_4 = arith.constant 0 : index
    %4 = vector.load %arg3[%c0_3, %c0_4] : memref<1x16xf32, #tpu.memory_space<vmem>>, vector<1x16xf32>
    %5 = vector.broadcast %4 : vector<1x16xf32> to vector<128x16xf32>
    %6 = arith.addf %3, %5 : vector<128x16xf32>
    %cst = arith.constant 0.000000e+00 : f32
    %7 = vector.broadcast %cst : f32 to vector<128x16xf32>
    %8 = arith.maximumf %6, %7 : vector<128x16xf32>
    %9 = arith.truncf %8 : vector<128x16xf32> to vector<128x16xbf16>
    %c0_5 = arith.constant 0 : index
    %c0_6 = arith.constant 0 : index
    %10 = vector.load %arg4[%c0_5, %c0_6] : memref<16x24xbf16, #tpu.memory_space<vmem>>, vector<16x24xbf16>
    %cst_7 = arith.constant dense<0.000000e+00> : vector<128x24xf32>
    %11 = tpu.matmul %9, %10, %cst_7 {dimension_numbers = #tpu.dot_dimension_numbers<[1], [0], [0], [1], [0, 0, 1, 1], [], []>} : vector<128x16xbf16>, vector<16x24xbf16>, vector<128x24xf32> -> vector<128x24xf32>
    %c0_8 = arith.constant 0 : index
    %c0_9 = arith.constant 0 : index
    %12 = vector.load %arg5[%c0_8, %c0_9] : memref<1x24xf32, #tpu.memory_space<vmem>>, vector<1x24xf32>
    %13 = vector.broadcast %12 : vector<1x24xf32> to vector<128x24xf32>
    %14 = arith.mulf %11, %13 : vector<128x24xf32>
    %c0_10 = arith.constant 0 : index
    %c0_11 = arith.constant 0 : index
    %15 = vector.load %arg6[%c0_10, %c0_11] : memref<1x24xf32, #tpu.memory_space<vmem>>, vector<1x24xf32>
    %16 = vector.broadcast %15 : vector<1x24xf32> to vector<128x24xf32>
    %17 = arith.addf %14, %16 : vector<128x24xf32>
    %cst_12 = arith.constant 0.000000e+00 : f32
    %18 = vector.broadcast %cst_12 : f32 to vector<128x24xf32>
    %19 = arith.maximumf %17, %18 : vector<128x24xf32>
    %c0_13 = arith.constant 0 : index
    %c0_14 = arith.constant 0 : index
    %20 = vector.load %arg7[%c0_13, %c0_14] : memref<128x24xf32, #tpu.memory_space<vmem>>, vector<128x24xf32>
    tpu.vector_store %arg7[%c0_13, %c0_14], %19 {strides = array<i32>} : memref<128x24xf32, #tpu.memory_space<vmem>>, vector<128x24xf32>,
    return
  }
  func.func @transform_0(%arg0: i32) -> (i32, i32) {
    %c0_i32 = arith.constant 0 : i32
    %c0_i32_0 = arith.constant 0 : i32
    return %arg0, %c0_i32 : i32, i32
  }
  func.func @transform_1(%arg0: i32) -> (i32, i32) {
    %c0_i32 = arith.constant 0 : i32
    %c0_i32_0 = arith.constant 0 : i32
    %c0_i32_1 = arith.constant 0 : i32
    return %c0_i32, %c0_i32_0 : i32, i32
  }
  func.func @transform_2(%arg0: i32) -> (i32, i32) {
    %c0_i32 = arith.constant 0 : i32
    %c0_i32_0 = arith.constant 0 : i32
    %c0_i32_1 = arith.constant 0 : i32
    return %c0_i32, %c0_i32_0 : i32, i32
  }
  func.func @transform_3(%arg0: i32) -> (i32, i32) {
    %c0_i32 = arith.constant 0 : i32
    %c0_i32_0 = arith.constant 0 : i32
    %c0_i32_1 = arith.constant 0 : i32
    return %c0_i32, %c0_i32_0 : i32, i32
  }
  func.func @transform_4(%arg0: i32) -> (i32, i32) {
    %c0_i32 = arith.constant 0 : i32
    %c0_i32_0 = arith.constant 0 : i32
    %c0_i32_1 = arith.constant 0 : i32
    return %c0_i32, %c0_i32_0 : i32, i32
  }
  func.func @transform_5(%arg0: i32) -> (i32, i32) {
    %c0_i32 = arith.constant 0 : i32
    %c0_i32_0 = arith.constant 0 : i32
    %c0_i32_1 = arith.constant 0 : i32
    return %c0_i32, %c0_i32_0 : i32, i32
  }
  func.func @transform_6(%arg0: i32) -> (i32, i32) {
    %c0_i32 = arith.constant 0 : i32
    %c0_i32_0 = arith.constant 0 : i32
    return %arg0, %c0_i32 : i32, i32
  }
}

module attributes {stable_mosaic.version = 11 : i64} {
  func.func @_pool4_kernel(%arg0: i32, %arg1: memref<128x16xf32, #tpu.memory_space<vmem>>, %arg2: memref<128x16xf32, #tpu.memory_space<vmem>>, %arg3: memref<128x16xf32, #tpu.memory_space<vmem>>, %arg4: memref<128x16xf32, #tpu.memory_space<vmem>>, %arg5: memref<128x16xf32, #tpu.memory_space<vmem>>) attributes {dimension_semantics = [#tpu.dimension_semantics<parallel>], iteration_bounds = array<i64: 1>, scalar_prefetch = 0 : i64, scratch_operands = 0 : i64, tpu.core_type = #tpu.core_type<tc>, window_params = [{transform_indices = @transform_0, window_bounds = array<i64: 128, 16>}, {transform_indices = @transform_1, window_bounds = array<i64: 128, 16>}, {transform_indices = @transform_2, window_bounds = array<i64: 128, 16>}, {transform_indices = @transform_3, window_bounds = array<i64: 128, 16>}, {transform_indices = @transform_4, window_bounds = array<i64: 128, 16>}]} {
    %c0 = arith.constant 0 : index
    %c0_0 = arith.constant 0 : index
    %0 = vector.load %arg1[%c0, %c0_0] : memref<128x16xf32, #tpu.memory_space<vmem>>, vector<128x16xf32>
    %c0_1 = arith.constant 0 : index
    %c0_2 = arith.constant 0 : index
    %1 = vector.load %arg2[%c0_1, %c0_2] : memref<128x16xf32, #tpu.memory_space<vmem>>, vector<128x16xf32>
    %2 = arith.maximumf %0, %1 : vector<128x16xf32>
    %c0_3 = arith.constant 0 : index
    %c0_4 = arith.constant 0 : index
    %3 = vector.load %arg3[%c0_3, %c0_4] : memref<128x16xf32, #tpu.memory_space<vmem>>, vector<128x16xf32>
    %c0_5 = arith.constant 0 : index
    %c0_6 = arith.constant 0 : index
    %4 = vector.load %arg4[%c0_5, %c0_6] : memref<128x16xf32, #tpu.memory_space<vmem>>, vector<128x16xf32>
    %5 = arith.maximumf %3, %4 : vector<128x16xf32>
    %6 = arith.maximumf %2, %5 : vector<128x16xf32>
    %c0_7 = arith.constant 0 : index
    %c0_8 = arith.constant 0 : index
    %7 = vector.load %arg5[%c0_7, %c0_8] : memref<128x16xf32, #tpu.memory_space<vmem>>, vector<128x16xf32>
    tpu.vector_store %arg5[%c0_7, %c0_8], %6 {strides = array<i32>} : memref<128x16xf32, #tpu.memory_space<vmem>>, vector<128x16xf32>,
    return
  }
  func.func @transform_0(%arg0: i32) -> (i32, i32) {
    %c0_i32 = arith.constant 0 : i32
    %c0_i32_0 = arith.constant 0 : i32
    return %arg0, %c0_i32 : i32, i32
  }
  func.func @transform_1(%arg0: i32) -> (i32, i32) {
    %c0_i32 = arith.constant 0 : i32
    %c0_i32_0 = arith.constant 0 : i32
    return %arg0, %c0_i32 : i32, i32
  }
  func.func @transform_2(%arg0: i32) -> (i32, i32) {
    %c0_i32 = arith.constant 0 : i32
    %c0_i32_0 = arith.constant 0 : i32
    return %arg0, %c0_i32 : i32, i32
  }
  func.func @transform_3(%arg0: i32) -> (i32, i32) {
    %c0_i32 = arith.constant 0 : i32
    %c0_i32_0 = arith.constant 0 : i32
    return %arg0, %c0_i32 : i32, i32
  }
  func.func @transform_4(%arg0: i32) -> (i32, i32) {
    %c0_i32 = arith.constant 0 : i32
    %c0_i32_0 = arith.constant 0 : i32
    return %arg0, %c0_i32 : i32, i32
  }
}

module attributes {stable_mosaic.version = 11 : i64} {
  func.func @_conv3x3_kernel(%arg0: i32, %arg1: memref<1x110x24xf32, #tpu.memory_space<vmem>>, %arg2: memref<9x24x8xbf16, #tpu.memory_space<vmem>>, %arg3: memref<1x80x8xf32, #tpu.memory_space<vmem>>) attributes {dimension_semantics = [#tpu.dimension_semantics<parallel>], iteration_bounds = array<i64: 2>, scalar_prefetch = 0 : i64, scratch_operands = 0 : i64, tpu.core_type = #tpu.core_type<tc>, window_params = [{transform_indices = @transform_0, window_bounds = array<i64: 1, 110, 24>}, {pipeline_mode = #tpu.pipeline_mode<synchronous>, transform_indices = @transform_1, window_bounds = array<i64: 9, 24, 8>}, {transform_indices = @transform_2, window_bounds = array<i64: 1, 80, 8>}]} {
    %cst = arith.constant 0.000000e+00 : f32
    %0 = vector.broadcast %cst : f32 to vector<80x8xf32>
    %c0 = arith.constant 0 : index
    %c0_0 = arith.constant 0 : index
    %c0_1 = arith.constant 0 : index
    %1 = vector.load %arg1[%c0, %c0_0, %c0_1] : memref<1x110x24xf32, #tpu.memory_space<vmem>>, vector<1x80x24xf32>
    %2 = vector.shape_cast %1 : vector<1x80x24xf32> to vector<80x24xf32>
    %3 = arith.truncf %2 : vector<80x24xf32> to vector<80x24xbf16>
    %c0_2 = arith.constant 0 : index
    %c0_3 = arith.constant 0 : index
    %c0_4 = arith.constant 0 : index
    %4 = vector.load %arg2[%c0_2, %c0_3, %c0_4] : memref<9x24x8xbf16, #tpu.memory_space<vmem>>, vector<1x24x8xbf16>
    %5 = vector.shape_cast %4 : vector<1x24x8xbf16> to vector<24x8xbf16>
    %cst_5 = arith.constant dense<0.000000e+00> : vector<80x8xf32>
    %6 = tpu.matmul %3, %5, %cst_5 {dimension_numbers = #tpu.dot_dimension_numbers<[1], [0], [0], [1], [0, 0, 1, 1], [], []>} : vector<80x24xbf16>, vector<24x8xbf16>, vector<80x8xf32> -> vector<80x8xf32>
    %7 = arith.addf %0, %6 : vector<80x8xf32>
    %c0_6 = arith.constant 0 : index
    %c1 = arith.constant 1 : index
    %c0_7 = arith.constant 0 : index
    %8 = vector.load %arg1[%c0_6, %c1, %c0_7] : memref<1x110x24xf32, #tpu.memory_space<vmem>>, vector<1x80x24xf32>
    %9 = vector.shape_cast %8 : vector<1x80x24xf32> to vector<80x24xf32>
    %10 = arith.truncf %9 : vector<80x24xf32> to vector<80x24xbf16>
    %c1_8 = arith.constant 1 : index
    %c0_9 = arith.constant 0 : index
    %c0_10 = arith.constant 0 : index
    %11 = vector.load %arg2[%c1_8, %c0_9, %c0_10] : memref<9x24x8xbf16, #tpu.memory_space<vmem>>, vector<1x24x8xbf16>
    %12 = vector.shape_cast %11 : vector<1x24x8xbf16> to vector<24x8xbf16>
    %cst_11 = arith.constant dense<0.000000e+00> : vector<80x8xf32>
    %13 = tpu.matmul %10, %12, %cst_11 {dimension_numbers = #tpu.dot_dimension_numbers<[1], [0], [0], [1], [0, 0, 1, 1], [], []>} : vector<80x24xbf16>, vector<24x8xbf16>, vector<80x8xf32> -> vector<80x8xf32>
    %14 = arith.addf %7, %13 : vector<80x8xf32>
    %c0_12 = arith.constant 0 : index
    %c2 = arith.constant 2 : index
    %c0_13 = arith.constant 0 : index
    %15 = vector.load %arg1[%c0_12, %c2, %c0_13] : memref<1x110x24xf32, #tpu.memory_space<vmem>>, vector<1x80x24xf32>
    %16 = vector.shape_cast %15 : vector<1x80x24xf32> to vector<80x24xf32>
    %17 = arith.truncf %16 : vector<80x24xf32> to vector<80x24xbf16>
    %c2_14 = arith.constant 2 : index
    %c0_15 = arith.constant 0 : index
    %c0_16 = arith.constant 0 : index
    %18 = vector.load %arg2[%c2_14, %c0_15, %c0_16] : memref<9x24x8xbf16, #tpu.memory_space<vmem>>, vector<1x24x8xbf16>
    %19 = vector.shape_cast %18 : vector<1x24x8xbf16> to vector<24x8xbf16>
    %cst_17 = arith.constant dense<0.000000e+00> : vector<80x8xf32>
    %20 = tpu.matmul %17, %19, %cst_17 {dimension_numbers = #tpu.dot_dimension_numbers<[1], [0], [0], [1], [0, 0, 1, 1], [], []>} : vector<80x24xbf16>, vector<24x8xbf16>, vector<80x8xf32> -> vector<80x8xf32>
    %21 = arith.addf %14, %20 : vector<80x8xf32>
    %c0_18 = arith.constant 0 : index
    %c10 = arith.constant 10 : index
    %c0_19 = arith.constant 0 : index
    %22 = vector.load %arg1[%c0_18, %c10, %c0_19] : memref<1x110x24xf32, #tpu.memory_space<vmem>>, vector<1x80x24xf32>
    %23 = vector.shape_cast %22 : vector<1x80x24xf32> to vector<80x24xf32>
    %24 = arith.truncf %23 : vector<80x24xf32> to vector<80x24xbf16>
    %c3 = arith.constant 3 : index
    %c0_20 = arith.constant 0 : index
    %c0_21 = arith.constant 0 : index
    %25 = vector.load %arg2[%c3, %c0_20, %c0_21] : memref<9x24x8xbf16, #tpu.memory_space<vmem>>, vector<1x24x8xbf16>
    %26 = vector.shape_cast %25 : vector<1x24x8xbf16> to vector<24x8xbf16>
    %cst_22 = arith.constant dense<0.000000e+00> : vector<80x8xf32>
    %27 = tpu.matmul %24, %26, %cst_22 {dimension_numbers = #tpu.dot_dimension_numbers<[1], [0], [0], [1], [0, 0, 1, 1], [], []>} : vector<80x24xbf16>, vector<24x8xbf16>, vector<80x8xf32> -> vector<80x8xf32>
    %28 = arith.addf %21, %27 : vector<80x8xf32>
    %c0_23 = arith.constant 0 : index
    %c11 = arith.constant 11 : index
    %c0_24 = arith.constant 0 : index
    %29 = vector.load %arg1[%c0_23, %c11, %c0_24] : memref<1x110x24xf32, #tpu.memory_space<vmem>>, vector<1x80x24xf32>
    %30 = vector.shape_cast %29 : vector<1x80x24xf32> to vector<80x24xf32>
    %31 = arith.truncf %30 : vector<80x24xf32> to vector<80x24xbf16>
    %c4 = arith.constant 4 : index
    %c0_25 = arith.constant 0 : index
    %c0_26 = arith.constant 0 : index
    %32 = vector.load %arg2[%c4, %c0_25, %c0_26] : memref<9x24x8xbf16, #tpu.memory_space<vmem>>, vector<1x24x8xbf16>
    %33 = vector.shape_cast %32 : vector<1x24x8xbf16> to vector<24x8xbf16>
    %cst_27 = arith.constant dense<0.000000e+00> : vector<80x8xf32>
    %34 = tpu.matmul %31, %33, %cst_27 {dimension_numbers = #tpu.dot_dimension_numbers<[1], [0], [0], [1], [0, 0, 1, 1], [], []>} : vector<80x24xbf16>, vector<24x8xbf16>, vector<80x8xf32> -> vector<80x8xf32>
    %35 = arith.addf %28, %34 : vector<80x8xf32>
    %c0_28 = arith.constant 0 : index
    %c12 = arith.constant 12 : index
    %c0_29 = arith.constant 0 : index
    %36 = vector.load %arg1[%c0_28, %c12, %c0_29] : memref<1x110x24xf32, #tpu.memory_space<vmem>>, vector<1x80x24xf32>
    %37 = vector.shape_cast %36 : vector<1x80x24xf32> to vector<80x24xf32>
    %38 = arith.truncf %37 : vector<80x24xf32> to vector<80x24xbf16>
    %c5 = arith.constant 5 : index
    %c0_30 = arith.constant 0 : index
    %c0_31 = arith.constant 0 : index
    %39 = vector.load %arg2[%c5, %c0_30, %c0_31] : memref<9x24x8xbf16, #tpu.memory_space<vmem>>, vector<1x24x8xbf16>
    %40 = vector.shape_cast %39 : vector<1x24x8xbf16> to vector<24x8xbf16>
    %cst_32 = arith.constant dense<0.000000e+00> : vector<80x8xf32>
    %41 = tpu.matmul %38, %40, %cst_32 {dimension_numbers = #tpu.dot_dimension_numbers<[1], [0], [0], [1], [0, 0, 1, 1], [], []>} : vector<80x24xbf16>, vector<24x8xbf16>, vector<80x8xf32> -> vector<80x8xf32>
    %42 = arith.addf %35, %41 : vector<80x8xf32>
    %c0_33 = arith.constant 0 : index
    %c20 = arith.constant 20 : index
    %c0_34 = arith.constant 0 : index
    %43 = vector.load %arg1[%c0_33, %c20, %c0_34] : memref<1x110x24xf32, #tpu.memory_space<vmem>>, vector<1x80x24xf32>
    %44 = vector.shape_cast %43 : vector<1x80x24xf32> to vector<80x24xf32>
    %45 = arith.truncf %44 : vector<80x24xf32> to vector<80x24xbf16>
    %c6 = arith.constant 6 : index
    %c0_35 = arith.constant 0 : index
    %c0_36 = arith.constant 0 : index
    %46 = vector.load %arg2[%c6, %c0_35, %c0_36] : memref<9x24x8xbf16, #tpu.memory_space<vmem>>, vector<1x24x8xbf16>
    %47 = vector.shape_cast %46 : vector<1x24x8xbf16> to vector<24x8xbf16>
    %cst_37 = arith.constant dense<0.000000e+00> : vector<80x8xf32>
    %48 = tpu.matmul %45, %47, %cst_37 {dimension_numbers = #tpu.dot_dimension_numbers<[1], [0], [0], [1], [0, 0, 1, 1], [], []>} : vector<80x24xbf16>, vector<24x8xbf16>, vector<80x8xf32> -> vector<80x8xf32>
    %49 = arith.addf %42, %48 : vector<80x8xf32>
    %c0_38 = arith.constant 0 : index
    %c21 = arith.constant 21 : index
    %c0_39 = arith.constant 0 : index
    %50 = vector.load %arg1[%c0_38, %c21, %c0_39] : memref<1x110x24xf32, #tpu.memory_space<vmem>>, vector<1x80x24xf32>
    %51 = vector.shape_cast %50 : vector<1x80x24xf32> to vector<80x24xf32>
    %52 = arith.truncf %51 : vector<80x24xf32> to vector<80x24xbf16>
    %c7 = arith.constant 7 : index
    %c0_40 = arith.constant 0 : index
    %c0_41 = arith.constant 0 : index
    %53 = vector.load %arg2[%c7, %c0_40, %c0_41] : memref<9x24x8xbf16, #tpu.memory_space<vmem>>, vector<1x24x8xbf16>
    %54 = vector.shape_cast %53 : vector<1x24x8xbf16> to vector<24x8xbf16>
    %cst_42 = arith.constant dense<0.000000e+00> : vector<80x8xf32>
    %55 = tpu.matmul %52, %54, %cst_42 {dimension_numbers = #tpu.dot_dimension_numbers<[1], [0], [0], [1], [0, 0, 1, 1], [], []>} : vector<80x24xbf16>, vector<24x8xbf16>, vector<80x8xf32> -> vector<80x8xf32>
    %56 = arith.addf %49, %55 : vector<80x8xf32>
    %c0_43 = arith.constant 0 : index
    %c22 = arith.constant 22 : index
    %c0_44 = arith.constant 0 : index
    %57 = vector.load %arg1[%c0_43, %c22, %c0_44] : memref<1x110x24xf32, #tpu.memory_space<vmem>>, vector<1x80x24xf32>
    %58 = vector.shape_cast %57 : vector<1x80x24xf32> to vector<80x24xf32>
    %59 = arith.truncf %58 : vector<80x24xf32> to vector<80x24xbf16>
    %c8 = arith.constant 8 : index
    %c0_45 = arith.constant 0 : index
    %c0_46 = arith.constant 0 : index
    %60 = vector.load %arg2[%c8, %c0_45, %c0_46] : memref<9x24x8xbf16, #tpu.memory_space<vmem>>, vector<1x24x8xbf16>
    %61 = vector.shape_cast %60 : vector<1x24x8xbf16> to vector<24x8xbf16>
    %cst_47 = arith.constant dense<0.000000e+00> : vector<80x8xf32>
    %62 = tpu.matmul %59, %61, %cst_47 {dimension_numbers = #tpu.dot_dimension_numbers<[1], [0], [0], [1], [0, 0, 1, 1], [], []>} : vector<80x24xbf16>, vector<24x8xbf16>, vector<80x8xf32> -> vector<80x8xf32>
    %63 = arith.addf %56, %62 : vector<80x8xf32>
    %c0_48 = arith.constant 0 : index
    %c0_49 = arith.constant 0 : index
    %c0_50 = arith.constant 0 : index
    %64 = vector.load %arg3[%c0_48, %c0_49, %c0_50] : memref<1x80x8xf32, #tpu.memory_space<vmem>>, vector<1x80x8xf32>
    %65 = vector.shape_cast %64 : vector<1x80x8xf32> to vector<80x8xf32>
    %66 = vector.shape_cast %63 : vector<80x8xf32> to vector<1x80x8xf32>
    tpu.vector_store %arg3[%c0_48, %c0_49, %c0_50], %66 {strides = array<i32>} : memref<1x80x8xf32, #tpu.memory_space<vmem>>, vector<1x80x8xf32>,
    return
  }
  func.func @transform_0(%arg0: i32) -> (i32, i32, i32) {
    %c0_i32 = arith.constant 0 : i32
    %c0_i32_0 = arith.constant 0 : i32
    %c0_i32_1 = arith.constant 0 : i32
    return %arg0, %c0_i32, %c0_i32_0 : i32, i32, i32
  }
  func.func @transform_1(%arg0: i32) -> (i32, i32, i32) {
    %c0_i32 = arith.constant 0 : i32
    %c0_i32_0 = arith.constant 0 : i32
    %c0_i32_1 = arith.constant 0 : i32
    %c0_i32_2 = arith.constant 0 : i32
    return %c0_i32, %c0_i32_0, %c0_i32_1 : i32, i32, i32
  }
  func.func @transform_2(%arg0: i32) -> (i32, i32, i32) {
    %c0_i32 = arith.constant 0 : i32
    %c0_i32_0 = arith.constant 0 : i32
    %c0_i32_1 = arith.constant 0 : i32
    return %arg0, %c0_i32, %c0_i32_0 : i32, i32, i32
  }
}

module attributes {stable_mosaic.version = 11 : i64} {
  func.func @_fused_mm_kernel(%arg0: i32, %arg1: memref<128x24xf32, #tpu.memory_space<vmem>>, %arg2: memref<1x24xf32, #tpu.memory_space<vmem>>, %arg3: memref<1x24xf32, #tpu.memory_space<vmem>>, %arg4: memref<24x24xbf16, #tpu.memory_space<vmem>>, %arg5: memref<1x24xf32, #tpu.memory_space<vmem>>, %arg6: memref<1x24xf32, #tpu.memory_space<vmem>>, %arg7: memref<128x24xf32, #tpu.memory_space<vmem>>) attributes {dimension_semantics = [#tpu.dimension_semantics<parallel>], iteration_bounds = array<i64: 1>, scalar_prefetch = 0 : i64, scratch_operands = 0 : i64, tpu.core_type = #tpu.core_type<tc>, window_params = [{transform_indices = @transform_0, window_bounds = array<i64: 128, 24>}, {pipeline_mode = #tpu.pipeline_mode<synchronous>, transform_indices = @transform_1, window_bounds = array<i64: 1, 24>}, {pipeline_mode = #tpu.pipeline_mode<synchronous>, transform_indices = @transform_2, window_bounds = array<i64: 1, 24>}, {pipeline_mode = #tpu.pipeline_mode<synchronous>, transform_indices = @transform_3, window_bounds = array<i64: 24, 24>}, {pipeline_mode = #tpu.pipeline_mode<synchronous>, transform_indices = @transform_4, window_bounds = array<i64: 1, 24>}, {pipeline_mode = #tpu.pipeline_mode<synchronous>, transform_indices = @transform_5, window_bounds = array<i64: 1, 24>}, {transform_indices = @transform_6, window_bounds = array<i64: 128, 24>}]} {
    %c0 = arith.constant 0 : index
    %c0_0 = arith.constant 0 : index
    %0 = vector.load %arg1[%c0, %c0_0] : memref<128x24xf32, #tpu.memory_space<vmem>>, vector<128x24xf32>
    %c0_1 = arith.constant 0 : index
    %c0_2 = arith.constant 0 : index
    %1 = vector.load %arg2[%c0_1, %c0_2] : memref<1x24xf32, #tpu.memory_space<vmem>>, vector<1x24xf32>
    %2 = vector.broadcast %1 : vector<1x24xf32> to vector<128x24xf32>
    %3 = arith.mulf %0, %2 : vector<128x24xf32>
    %c0_3 = arith.constant 0 : index
    %c0_4 = arith.constant 0 : index
    %4 = vector.load %arg3[%c0_3, %c0_4] : memref<1x24xf32, #tpu.memory_space<vmem>>, vector<1x24xf32>
    %5 = vector.broadcast %4 : vector<1x24xf32> to vector<128x24xf32>
    %6 = arith.addf %3, %5 : vector<128x24xf32>
    %cst = arith.constant 0.000000e+00 : f32
    %7 = vector.broadcast %cst : f32 to vector<128x24xf32>
    %8 = arith.maximumf %6, %7 : vector<128x24xf32>
    %9 = arith.truncf %8 : vector<128x24xf32> to vector<128x24xbf16>
    %c0_5 = arith.constant 0 : index
    %c0_6 = arith.constant 0 : index
    %10 = vector.load %arg4[%c0_5, %c0_6] : memref<24x24xbf16, #tpu.memory_space<vmem>>, vector<24x24xbf16>
    %cst_7 = arith.constant dense<0.000000e+00> : vector<128x24xf32>
    %11 = tpu.matmul %9, %10, %cst_7 {dimension_numbers = #tpu.dot_dimension_numbers<[1], [0], [0], [1], [0, 0, 1, 1], [], []>} : vector<128x24xbf16>, vector<24x24xbf16>, vector<128x24xf32> -> vector<128x24xf32>
    %c0_8 = arith.constant 0 : index
    %c0_9 = arith.constant 0 : index
    %12 = vector.load %arg5[%c0_8, %c0_9] : memref<1x24xf32, #tpu.memory_space<vmem>>, vector<1x24xf32>
    %13 = vector.broadcast %12 : vector<1x24xf32> to vector<128x24xf32>
    %14 = arith.mulf %11, %13 : vector<128x24xf32>
    %c0_10 = arith.constant 0 : index
    %c0_11 = arith.constant 0 : index
    %15 = vector.load %arg6[%c0_10, %c0_11] : memref<1x24xf32, #tpu.memory_space<vmem>>, vector<1x24xf32>
    %16 = vector.broadcast %15 : vector<1x24xf32> to vector<128x24xf32>
    %17 = arith.addf %14, %16 : vector<128x24xf32>
    %cst_12 = arith.constant 0.000000e+00 : f32
    %18 = vector.broadcast %cst_12 : f32 to vector<128x24xf32>
    %19 = arith.maximumf %17, %18 : vector<128x24xf32>
    %c0_13 = arith.constant 0 : index
    %c0_14 = arith.constant 0 : index
    %20 = vector.load %arg7[%c0_13, %c0_14] : memref<128x24xf32, #tpu.memory_space<vmem>>, vector<128x24xf32>
    tpu.vector_store %arg7[%c0_13, %c0_14], %19 {strides = array<i32>} : memref<128x24xf32, #tpu.memory_space<vmem>>, vector<128x24xf32>,
    return
  }
  func.func @transform_0(%arg0: i32) -> (i32, i32) {
    %c0_i32 = arith.constant 0 : i32
    %c0_i32_0 = arith.constant 0 : i32
    return %arg0, %c0_i32 : i32, i32
  }
  func.func @transform_1(%arg0: i32) -> (i32, i32) {
    %c0_i32 = arith.constant 0 : i32
    %c0_i32_0 = arith.constant 0 : i32
    %c0_i32_1 = arith.constant 0 : i32
    return %c0_i32, %c0_i32_0 : i32, i32
  }
  func.func @transform_2(%arg0: i32) -> (i32, i32) {
    %c0_i32 = arith.constant 0 : i32
    %c0_i32_0 = arith.constant 0 : i32
    %c0_i32_1 = arith.constant 0 : i32
    return %c0_i32, %c0_i32_0 : i32, i32
  }
  func.func @transform_3(%arg0: i32) -> (i32, i32) {
    %c0_i32 = arith.constant 0 : i32
    %c0_i32_0 = arith.constant 0 : i32
    %c0_i32_1 = arith.constant 0 : i32
    return %c0_i32, %c0_i32_0 : i32, i32
  }
  func.func @transform_4(%arg0: i32) -> (i32, i32) {
    %c0_i32 = arith.constant 0 : i32
    %c0_i32_0 = arith.constant 0 : i32
    %c0_i32_1 = arith.constant 0 : i32
    return %c0_i32, %c0_i32_0 : i32, i32
  }
  func.func @transform_5(%arg0: i32) -> (i32, i32) {
    %c0_i32 = arith.constant 0 : i32
    %c0_i32_0 = arith.constant 0 : i32
    %c0_i32_1 = arith.constant 0 : i32
    return %c0_i32, %c0_i32_0 : i32, i32
  }
  func.func @transform_6(%arg0: i32) -> (i32, i32) {
    %c0_i32 = arith.constant 0 : i32
    %c0_i32_0 = arith.constant 0 : i32
    return %arg0, %c0_i32 : i32, i32
  }
}

module attributes {stable_mosaic.version = 11 : i64} {
  func.func @_fused_mm_kernel(%arg0: i32, %arg1: memref<32x16xf32, #tpu.memory_space<vmem>>, %arg2: memref<1x16xf32, #tpu.memory_space<vmem>>, %arg3: memref<1x16xf32, #tpu.memory_space<vmem>>, %arg4: memref<16x24xbf16, #tpu.memory_space<vmem>>, %arg5: memref<1x24xf32, #tpu.memory_space<vmem>>, %arg6: memref<1x24xf32, #tpu.memory_space<vmem>>, %arg7: memref<32x24xf32, #tpu.memory_space<vmem>>) attributes {dimension_semantics = [#tpu.dimension_semantics<parallel>], iteration_bounds = array<i64: 1>, scalar_prefetch = 0 : i64, scratch_operands = 0 : i64, tpu.core_type = #tpu.core_type<tc>, window_params = [{transform_indices = @transform_0, window_bounds = array<i64: 32, 16>}, {pipeline_mode = #tpu.pipeline_mode<synchronous>, transform_indices = @transform_1, window_bounds = array<i64: 1, 16>}, {pipeline_mode = #tpu.pipeline_mode<synchronous>, transform_indices = @transform_2, window_bounds = array<i64: 1, 16>}, {pipeline_mode = #tpu.pipeline_mode<synchronous>, transform_indices = @transform_3, window_bounds = array<i64: 16, 24>}, {pipeline_mode = #tpu.pipeline_mode<synchronous>, transform_indices = @transform_4, window_bounds = array<i64: 1, 24>}, {pipeline_mode = #tpu.pipeline_mode<synchronous>, transform_indices = @transform_5, window_bounds = array<i64: 1, 24>}, {transform_indices = @transform_6, window_bounds = array<i64: 32, 24>}]} {
    %c0 = arith.constant 0 : index
    %c0_0 = arith.constant 0 : index
    %0 = vector.load %arg1[%c0, %c0_0] : memref<32x16xf32, #tpu.memory_space<vmem>>, vector<32x16xf32>
    %c0_1 = arith.constant 0 : index
    %c0_2 = arith.constant 0 : index
    %1 = vector.load %arg2[%c0_1, %c0_2] : memref<1x16xf32, #tpu.memory_space<vmem>>, vector<1x16xf32>
    %2 = vector.broadcast %1 : vector<1x16xf32> to vector<32x16xf32>
    %3 = arith.mulf %0, %2 : vector<32x16xf32>
    %c0_3 = arith.constant 0 : index
    %c0_4 = arith.constant 0 : index
    %4 = vector.load %arg3[%c0_3, %c0_4] : memref<1x16xf32, #tpu.memory_space<vmem>>, vector<1x16xf32>
    %5 = vector.broadcast %4 : vector<1x16xf32> to vector<32x16xf32>
    %6 = arith.addf %3, %5 : vector<32x16xf32>
    %cst = arith.constant 0.000000e+00 : f32
    %7 = vector.broadcast %cst : f32 to vector<32x16xf32>
    %8 = arith.maximumf %6, %7 : vector<32x16xf32>
    %9 = arith.truncf %8 : vector<32x16xf32> to vector<32x16xbf16>
    %c0_5 = arith.constant 0 : index
    %c0_6 = arith.constant 0 : index
    %10 = vector.load %arg4[%c0_5, %c0_6] : memref<16x24xbf16, #tpu.memory_space<vmem>>, vector<16x24xbf16>
    %cst_7 = arith.constant dense<0.000000e+00> : vector<32x24xf32>
    %11 = tpu.matmul %9, %10, %cst_7 {dimension_numbers = #tpu.dot_dimension_numbers<[1], [0], [0], [1], [0, 0, 1, 1], [], []>} : vector<32x16xbf16>, vector<16x24xbf16>, vector<32x24xf32> -> vector<32x24xf32>
    %c0_8 = arith.constant 0 : index
    %c0_9 = arith.constant 0 : index
    %12 = vector.load %arg5[%c0_8, %c0_9] : memref<1x24xf32, #tpu.memory_space<vmem>>, vector<1x24xf32>
    %13 = vector.broadcast %12 : vector<1x24xf32> to vector<32x24xf32>
    %14 = arith.mulf %11, %13 : vector<32x24xf32>
    %c0_10 = arith.constant 0 : index
    %c0_11 = arith.constant 0 : index
    %15 = vector.load %arg6[%c0_10, %c0_11] : memref<1x24xf32, #tpu.memory_space<vmem>>, vector<1x24xf32>
    %16 = vector.broadcast %15 : vector<1x24xf32> to vector<32x24xf32>
    %17 = arith.addf %14, %16 : vector<32x24xf32>
    %cst_12 = arith.constant 0.000000e+00 : f32
    %18 = vector.broadcast %cst_12 : f32 to vector<32x24xf32>
    %19 = arith.maximumf %17, %18 : vector<32x24xf32>
    %c0_13 = arith.constant 0 : index
    %c0_14 = arith.constant 0 : index
    %20 = vector.load %arg7[%c0_13, %c0_14] : memref<32x24xf32, #tpu.memory_space<vmem>>, vector<32x24xf32>
    tpu.vector_store %arg7[%c0_13, %c0_14], %19 {strides = array<i32>} : memref<32x24xf32, #tpu.memory_space<vmem>>, vector<32x24xf32>,
    return
  }
  func.func @transform_0(%arg0: i32) -> (i32, i32) {
    %c0_i32 = arith.constant 0 : i32
    %c0_i32_0 = arith.constant 0 : i32
    return %arg0, %c0_i32 : i32, i32
  }
  func.func @transform_1(%arg0: i32) -> (i32, i32) {
    %c0_i32 = arith.constant 0 : i32
    %c0_i32_0 = arith.constant 0 : i32
    %c0_i32_1 = arith.constant 0 : i32
    return %c0_i32, %c0_i32_0 : i32, i32
  }
  func.func @transform_2(%arg0: i32) -> (i32, i32) {
    %c0_i32 = arith.constant 0 : i32
    %c0_i32_0 = arith.constant 0 : i32
    %c0_i32_1 = arith.constant 0 : i32
    return %c0_i32, %c0_i32_0 : i32, i32
  }
  func.func @transform_3(%arg0: i32) -> (i32, i32) {
    %c0_i32 = arith.constant 0 : i32
    %c0_i32_0 = arith.constant 0 : i32
    %c0_i32_1 = arith.constant 0 : i32
    return %c0_i32, %c0_i32_0 : i32, i32
  }
  func.func @transform_4(%arg0: i32) -> (i32, i32) {
    %c0_i32 = arith.constant 0 : i32
    %c0_i32_0 = arith.constant 0 : i32
    %c0_i32_1 = arith.constant 0 : i32
    return %c0_i32, %c0_i32_0 : i32, i32
  }
  func.func @transform_5(%arg0: i32) -> (i32, i32) {
    %c0_i32 = arith.constant 0 : i32
    %c0_i32_0 = arith.constant 0 : i32
    %c0_i32_1 = arith.constant 0 : i32
    return %c0_i32, %c0_i32_0 : i32, i32
  }
  func.func @transform_6(%arg0: i32) -> (i32, i32) {
    %c0_i32 = arith.constant 0 : i32
    %c0_i32_0 = arith.constant 0 : i32
    return %arg0, %c0_i32 : i32, i32
  }
}

module attributes {stable_mosaic.version = 11 : i64} {
  func.func @_trans_fused_kernel(%arg0: i32, %arg1: memref<32x32xf32, #tpu.memory_space<vmem>>, %arg2: memref<32x32xf32, #tpu.memory_space<vmem>>, %arg3: memref<32x32xf32, #tpu.memory_space<vmem>>, %arg4: memref<32x32xf32, #tpu.memory_space<vmem>>, %arg5: memref<1x32xf32, #tpu.memory_space<vmem>>, %arg6: memref<1x32xf32, #tpu.memory_space<vmem>>, %arg7: memref<32x16xbf16, #tpu.memory_space<vmem>>, %arg8: memref<32x16xf32, #tpu.memory_space<vmem>>) attributes {dimension_semantics = [#tpu.dimension_semantics<parallel>], iteration_bounds = array<i64: 1>, scalar_prefetch = 0 : i64, scratch_operands = 0 : i64, tpu.core_type = #tpu.core_type<tc>, window_params = [{transform_indices = @transform_0, window_bounds = array<i64: 32, 32>}, {transform_indices = @transform_1, window_bounds = array<i64: 32, 32>}, {transform_indices = @transform_2, window_bounds = array<i64: 32, 32>}, {transform_indices = @transform_3, window_bounds = array<i64: 32, 32>}, {pipeline_mode = #tpu.pipeline_mode<synchronous>, transform_indices = @transform_4, window_bounds = array<i64: 1, 32>}, {pipeline_mode = #tpu.pipeline_mode<synchronous>, transform_indices = @transform_5, window_bounds = array<i64: 1, 32>}, {pipeline_mode = #tpu.pipeline_mode<synchronous>, transform_indices = @transform_6, window_bounds = array<i64: 32, 16>}, {transform_indices = @transform_7, window_bounds = array<i64: 32, 16>}]} {
    %c0 = arith.constant 0 : index
    %c0_0 = arith.constant 0 : index
    %0 = vector.load %arg5[%c0, %c0_0] : memref<1x32xf32, #tpu.memory_space<vmem>>, vector<1x32xf32>
    %c0_1 = arith.constant 0 : index
    %c0_2 = arith.constant 0 : index
    %1 = vector.load %arg6[%c0_1, %c0_2] : memref<1x32xf32, #tpu.memory_space<vmem>>, vector<1x32xf32>
    %c0_3 = arith.constant 0 : index
    %c0_4 = arith.constant 0 : index
    %2 = vector.load %arg1[%c0_3, %c0_4] : memref<32x32xf32, #tpu.memory_space<vmem>>, vector<32x32xf32>
    %3 = vector.broadcast %0 : vector<1x32xf32> to vector<32x32xf32>
    %4 = arith.mulf %2, %3 : vector<32x32xf32>
    %5 = vector.broadcast %1 : vector<1x32xf32> to vector<32x32xf32>
    %6 = arith.addf %4, %5 : vector<32x32xf32>
    %cst = arith.constant 0.000000e+00 : f32
    %7 = vector.broadcast %cst : f32 to vector<32x32xf32>
    %8 = arith.maximumf %6, %7 : vector<32x32xf32>
    %c0_5 = arith.constant 0 : index
    %c0_6 = arith.constant 0 : index
    %9 = vector.load %arg2[%c0_5, %c0_6] : memref<32x32xf32, #tpu.memory_space<vmem>>, vector<32x32xf32>
    %10 = vector.broadcast %0 : vector<1x32xf32> to vector<32x32xf32>
    %11 = arith.mulf %9, %10 : vector<32x32xf32>
    %12 = vector.broadcast %1 : vector<1x32xf32> to vector<32x32xf32>
    %13 = arith.addf %11, %12 : vector<32x32xf32>
    %cst_7 = arith.constant 0.000000e+00 : f32
    %14 = vector.broadcast %cst_7 : f32 to vector<32x32xf32>
    %15 = arith.maximumf %13, %14 : vector<32x32xf32>
    %16 = arith.addf %8, %15 : vector<32x32xf32>
    %c0_8 = arith.constant 0 : index
    %c0_9 = arith.constant 0 : index
    %17 = vector.load %arg3[%c0_8, %c0_9] : memref<32x32xf32, #tpu.memory_space<vmem>>, vector<32x32xf32>
    %18 = vector.broadcast %0 : vector<1x32xf32> to vector<32x32xf32>
    %19 = arith.mulf %17, %18 : vector<32x32xf32>
    %20 = vector.broadcast %1 : vector<1x32xf32> to vector<32x32xf32>
    %21 = arith.addf %19, %20 : vector<32x32xf32>
    %cst_10 = arith.constant 0.000000e+00 : f32
    %22 = vector.broadcast %cst_10 : f32 to vector<32x32xf32>
    %23 = arith.maximumf %21, %22 : vector<32x32xf32>
    %24 = arith.addf %16, %23 : vector<32x32xf32>
    %c0_11 = arith.constant 0 : index
    %c0_12 = arith.constant 0 : index
    %25 = vector.load %arg4[%c0_11, %c0_12] : memref<32x32xf32, #tpu.memory_space<vmem>>, vector<32x32xf32>
    %26 = vector.broadcast %0 : vector<1x32xf32> to vector<32x32xf32>
    %27 = arith.mulf %25, %26 : vector<32x32xf32>
    %28 = vector.broadcast %1 : vector<1x32xf32> to vector<32x32xf32>
    %29 = arith.addf %27, %28 : vector<32x32xf32>
    %cst_13 = arith.constant 0.000000e+00 : f32
    %30 = vector.broadcast %cst_13 : f32 to vector<32x32xf32>
    %31 = arith.maximumf %29, %30 : vector<32x32xf32>
    %32 = arith.addf %24, %31 : vector<32x32xf32>
    %cst_14 = arith.constant 2.500000e-01 : f32
    %33 = vector.broadcast %cst_14 : f32 to vector<32x32xf32>
    %34 = arith.mulf %32, %33 : vector<32x32xf32>
    %35 = arith.truncf %34 : vector<32x32xf32> to vector<32x32xbf16>
    %c0_15 = arith.constant 0 : index
    %c0_16 = arith.constant 0 : index
    %36 = vector.load %arg7[%c0_15, %c0_16] : memref<32x16xbf16, #tpu.memory_space<vmem>>, vector<32x16xbf16>
    %cst_17 = arith.constant dense<0.000000e+00> : vector<32x16xf32>
    %37 = tpu.matmul %35, %36, %cst_17 {dimension_numbers = #tpu.dot_dimension_numbers<[1], [0], [0], [1], [0, 0, 1, 1], [], []>} : vector<32x32xbf16>, vector<32x16xbf16>, vector<32x16xf32> -> vector<32x16xf32>
    %c0_18 = arith.constant 0 : index
    %c0_19 = arith.constant 0 : index
    %38 = vector.load %arg8[%c0_18, %c0_19] : memref<32x16xf32, #tpu.memory_space<vmem>>, vector<32x16xf32>
    tpu.vector_store %arg8[%c0_18, %c0_19], %37 {strides = array<i32>} : memref<32x16xf32, #tpu.memory_space<vmem>>, vector<32x16xf32>,
    return
  }
  func.func @transform_0(%arg0: i32) -> (i32, i32) {
    %c0_i32 = arith.constant 0 : i32
    %c0_i32_0 = arith.constant 0 : i32
    return %arg0, %c0_i32 : i32, i32
  }
  func.func @transform_1(%arg0: i32) -> (i32, i32) {
    %c0_i32 = arith.constant 0 : i32
    %c0_i32_0 = arith.constant 0 : i32
    return %arg0, %c0_i32 : i32, i32
  }
  func.func @transform_2(%arg0: i32) -> (i32, i32) {
    %c0_i32 = arith.constant 0 : i32
    %c0_i32_0 = arith.constant 0 : i32
    return %arg0, %c0_i32 : i32, i32
  }
  func.func @transform_3(%arg0: i32) -> (i32, i32) {
    %c0_i32 = arith.constant 0 : i32
    %c0_i32_0 = arith.constant 0 : i32
    return %arg0, %c0_i32 : i32, i32
  }
  func.func @transform_4(%arg0: i32) -> (i32, i32) {
    %c0_i32 = arith.constant 0 : i32
    %c0_i32_0 = arith.constant 0 : i32
    %c0_i32_1 = arith.constant 0 : i32
    return %c0_i32, %c0_i32_0 : i32, i32
  }
  func.func @transform_5(%arg0: i32) -> (i32, i32) {
    %c0_i32 = arith.constant 0 : i32
    %c0_i32_0 = arith.constant 0 : i32
    %c0_i32_1 = arith.constant 0 : i32
    return %c0_i32, %c0_i32_0 : i32, i32
  }
  func.func @transform_6(%arg0: i32) -> (i32, i32) {
    %c0_i32 = arith.constant 0 : i32
    %c0_i32_0 = arith.constant 0 : i32
    %c0_i32_1 = arith.constant 0 : i32
    return %c0_i32, %c0_i32_0 : i32, i32
  }
  func.func @transform_7(%arg0: i32) -> (i32, i32) {
    %c0_i32 = arith.constant 0 : i32
    %c0_i32_0 = arith.constant 0 : i32
    return %arg0, %c0_i32 : i32, i32
  }
}

module attributes {stable_mosaic.version = 11 : i64} {
  func.func @_conv3x3_kernel(%arg0: i32, %arg1: memref<1x42x24xf32, #tpu.memory_space<vmem>>, %arg2: memref<9x24x8xbf16, #tpu.memory_space<vmem>>, %arg3: memref<1x24x8xf32, #tpu.memory_space<vmem>>) attributes {dimension_semantics = [#tpu.dimension_semantics<parallel>], iteration_bounds = array<i64: 2>, scalar_prefetch = 0 : i64, scratch_operands = 0 : i64, tpu.core_type = #tpu.core_type<tc>, window_params = [{transform_indices = @transform_0, window_bounds = array<i64: 1, 42, 24>}, {pipeline_mode = #tpu.pipeline_mode<synchronous>, transform_indices = @transform_1, window_bounds = array<i64: 9, 24, 8>}, {transform_indices = @transform_2, window_bounds = array<i64: 1, 24, 8>}]} {
    %cst = arith.constant 0.000000e+00 : f32
    %0 = vector.broadcast %cst : f32 to vector<24x8xf32>
    %c0 = arith.constant 0 : index
    %c0_0 = arith.constant 0 : index
    %c0_1 = arith.constant 0 : index
    %1 = vector.load %arg1[%c0, %c0_0, %c0_1] : memref<1x42x24xf32, #tpu.memory_space<vmem>>, vector<1x24x24xf32>
    %2 = vector.shape_cast %1 : vector<1x24x24xf32> to vector<24x24xf32>
    %3 = arith.truncf %2 : vector<24x24xf32> to vector<24x24xbf16>
    %c0_2 = arith.constant 0 : index
    %c0_3 = arith.constant 0 : index
    %c0_4 = arith.constant 0 : index
    %4 = vector.load %arg2[%c0_2, %c0_3, %c0_4] : memref<9x24x8xbf16, #tpu.memory_space<vmem>>, vector<1x24x8xbf16>
    %5 = vector.shape_cast %4 : vector<1x24x8xbf16> to vector<24x8xbf16>
    %cst_5 = arith.constant dense<0.000000e+00> : vector<24x8xf32>
    %6 = tpu.matmul %3, %5, %cst_5 {dimension_numbers = #tpu.dot_dimension_numbers<[1], [0], [0], [1], [0, 0, 1, 1], [], []>} : vector<24x24xbf16>, vector<24x8xbf16>, vector<24x8xf32> -> vector<24x8xf32>
    %7 = arith.addf %0, %6 : vector<24x8xf32>
    %c0_6 = arith.constant 0 : index
    %c1 = arith.constant 1 : index
    %c0_7 = arith.constant 0 : index
    %8 = vector.load %arg1[%c0_6, %c1, %c0_7] : memref<1x42x24xf32, #tpu.memory_space<vmem>>, vector<1x24x24xf32>
    %9 = vector.shape_cast %8 : vector<1x24x24xf32> to vector<24x24xf32>
    %10 = arith.truncf %9 : vector<24x24xf32> to vector<24x24xbf16>
    %c1_8 = arith.constant 1 : index
    %c0_9 = arith.constant 0 : index
    %c0_10 = arith.constant 0 : index
    %11 = vector.load %arg2[%c1_8, %c0_9, %c0_10] : memref<9x24x8xbf16, #tpu.memory_space<vmem>>, vector<1x24x8xbf16>
    %12 = vector.shape_cast %11 : vector<1x24x8xbf16> to vector<24x8xbf16>
    %cst_11 = arith.constant dense<0.000000e+00> : vector<24x8xf32>
    %13 = tpu.matmul %10, %12, %cst_11 {dimension_numbers = #tpu.dot_dimension_numbers<[1], [0], [0], [1], [0, 0, 1, 1], [], []>} : vector<24x24xbf16>, vector<24x8xbf16>, vector<24x8xf32> -> vector<24x8xf32>
    %14 = arith.addf %7, %13 : vector<24x8xf32>
    %c0_12 = arith.constant 0 : index
    %c2 = arith.constant 2 : index
    %c0_13 = arith.constant 0 : index
    %15 = vector.load %arg1[%c0_12, %c2, %c0_13] : memref<1x42x24xf32, #tpu.memory_space<vmem>>, vector<1x24x24xf32>
    %16 = vector.shape_cast %15 : vector<1x24x24xf32> to vector<24x24xf32>
    %17 = arith.truncf %16 : vector<24x24xf32> to vector<24x24xbf16>
    %c2_14 = arith.constant 2 : index
    %c0_15 = arith.constant 0 : index
    %c0_16 = arith.constant 0 : index
    %18 = vector.load %arg2[%c2_14, %c0_15, %c0_16] : memref<9x24x8xbf16, #tpu.memory_space<vmem>>, vector<1x24x8xbf16>
    %19 = vector.shape_cast %18 : vector<1x24x8xbf16> to vector<24x8xbf16>
    %cst_17 = arith.constant dense<0.000000e+00> : vector<24x8xf32>
    %20 = tpu.matmul %17, %19, %cst_17 {dimension_numbers = #tpu.dot_dimension_numbers<[1], [0], [0], [1], [0, 0, 1, 1], [], []>} : vector<24x24xbf16>, vector<24x8xbf16>, vector<24x8xf32> -> vector<24x8xf32>
    %21 = arith.addf %14, %20 : vector<24x8xf32>
    %c0_18 = arith.constant 0 : index
    %c6 = arith.constant 6 : index
    %c0_19 = arith.constant 0 : index
    %22 = vector.load %arg1[%c0_18, %c6, %c0_19] : memref<1x42x24xf32, #tpu.memory_space<vmem>>, vector<1x24x24xf32>
    %23 = vector.shape_cast %22 : vector<1x24x24xf32> to vector<24x24xf32>
    %24 = arith.truncf %23 : vector<24x24xf32> to vector<24x24xbf16>
    %c3 = arith.constant 3 : index
    %c0_20 = arith.constant 0 : index
    %c0_21 = arith.constant 0 : index
    %25 = vector.load %arg2[%c3, %c0_20, %c0_21] : memref<9x24x8xbf16, #tpu.memory_space<vmem>>, vector<1x24x8xbf16>
    %26 = vector.shape_cast %25 : vector<1x24x8xbf16> to vector<24x8xbf16>
    %cst_22 = arith.constant dense<0.000000e+00> : vector<24x8xf32>
    %27 = tpu.matmul %24, %26, %cst_22 {dimension_numbers = #tpu.dot_dimension_numbers<[1], [0], [0], [1], [0, 0, 1, 1], [], []>} : vector<24x24xbf16>, vector<24x8xbf16>, vector<24x8xf32> -> vector<24x8xf32>
    %28 = arith.addf %21, %27 : vector<24x8xf32>
    %c0_23 = arith.constant 0 : index
    %c7 = arith.constant 7 : index
    %c0_24 = arith.constant 0 : index
    %29 = vector.load %arg1[%c0_23, %c7, %c0_24] : memref<1x42x24xf32, #tpu.memory_space<vmem>>, vector<1x24x24xf32>
    %30 = vector.shape_cast %29 : vector<1x24x24xf32> to vector<24x24xf32>
    %31 = arith.truncf %30 : vector<24x24xf32> to vector<24x24xbf16>
    %c4 = arith.constant 4 : index
    %c0_25 = arith.constant 0 : index
    %c0_26 = arith.constant 0 : index
    %32 = vector.load %arg2[%c4, %c0_25, %c0_26] : memref<9x24x8xbf16, #tpu.memory_space<vmem>>, vector<1x24x8xbf16>
    %33 = vector.shape_cast %32 : vector<1x24x8xbf16> to vector<24x8xbf16>
    %cst_27 = arith.constant dense<0.000000e+00> : vector<24x8xf32>
    %34 = tpu.matmul %31, %33, %cst_27 {dimension_numbers = #tpu.dot_dimension_numbers<[1], [0], [0], [1], [0, 0, 1, 1], [], []>} : vector<24x24xbf16>, vector<24x8xbf16>, vector<24x8xf32> -> vector<24x8xf32>
    %35 = arith.addf %28, %34 : vector<24x8xf32>
    %c0_28 = arith.constant 0 : index
    %c8 = arith.constant 8 : index
    %c0_29 = arith.constant 0 : index
    %36 = vector.load %arg1[%c0_28, %c8, %c0_29] : memref<1x42x24xf32, #tpu.memory_space<vmem>>, vector<1x24x24xf32>
    %37 = vector.shape_cast %36 : vector<1x24x24xf32> to vector<24x24xf32>
    %38 = arith.truncf %37 : vector<24x24xf32> to vector<24x24xbf16>
    %c5 = arith.constant 5 : index
    %c0_30 = arith.constant 0 : index
    %c0_31 = arith.constant 0 : index
    %39 = vector.load %arg2[%c5, %c0_30, %c0_31] : memref<9x24x8xbf16, #tpu.memory_space<vmem>>, vector<1x24x8xbf16>
    %40 = vector.shape_cast %39 : vector<1x24x8xbf16> to vector<24x8xbf16>
    %cst_32 = arith.constant dense<0.000000e+00> : vector<24x8xf32>
    %41 = tpu.matmul %38, %40, %cst_32 {dimension_numbers = #tpu.dot_dimension_numbers<[1], [0], [0], [1], [0, 0, 1, 1], [], []>} : vector<24x24xbf16>, vector<24x8xbf16>, vector<24x8xf32> -> vector<24x8xf32>
    %42 = arith.addf %35, %41 : vector<24x8xf32>
    %c0_33 = arith.constant 0 : index
    %c12 = arith.constant 12 : index
    %c0_34 = arith.constant 0 : index
    %43 = vector.load %arg1[%c0_33, %c12, %c0_34] : memref<1x42x24xf32, #tpu.memory_space<vmem>>, vector<1x24x24xf32>
    %44 = vector.shape_cast %43 : vector<1x24x24xf32> to vector<24x24xf32>
    %45 = arith.truncf %44 : vector<24x24xf32> to vector<24x24xbf16>
    %c6_35 = arith.constant 6 : index
    %c0_36 = arith.constant 0 : index
    %c0_37 = arith.constant 0 : index
    %46 = vector.load %arg2[%c6_35, %c0_36, %c0_37] : memref<9x24x8xbf16, #tpu.memory_space<vmem>>, vector<1x24x8xbf16>
    %47 = vector.shape_cast %46 : vector<1x24x8xbf16> to vector<24x8xbf16>
    %cst_38 = arith.constant dense<0.000000e+00> : vector<24x8xf32>
    %48 = tpu.matmul %45, %47, %cst_38 {dimension_numbers = #tpu.dot_dimension_numbers<[1], [0], [0], [1], [0, 0, 1, 1], [], []>} : vector<24x24xbf16>, vector<24x8xbf16>, vector<24x8xf32> -> vector<24x8xf32>
    %49 = arith.addf %42, %48 : vector<24x8xf32>
    %c0_39 = arith.constant 0 : index
    %c13 = arith.constant 13 : index
    %c0_40 = arith.constant 0 : index
    %50 = vector.load %arg1[%c0_39, %c13, %c0_40] : memref<1x42x24xf32, #tpu.memory_space<vmem>>, vector<1x24x24xf32>
    %51 = vector.shape_cast %50 : vector<1x24x24xf32> to vector<24x24xf32>
    %52 = arith.truncf %51 : vector<24x24xf32> to vector<24x24xbf16>
    %c7_41 = arith.constant 7 : index
    %c0_42 = arith.constant 0 : index
    %c0_43 = arith.constant 0 : index
    %53 = vector.load %arg2[%c7_41, %c0_42, %c0_43] : memref<9x24x8xbf16, #tpu.memory_space<vmem>>, vector<1x24x8xbf16>
    %54 = vector.shape_cast %53 : vector<1x24x8xbf16> to vector<24x8xbf16>
    %cst_44 = arith.constant dense<0.000000e+00> : vector<24x8xf32>
    %55 = tpu.matmul %52, %54, %cst_44 {dimension_numbers = #tpu.dot_dimension_numbers<[1], [0], [0], [1], [0, 0, 1, 1], [], []>} : vector<24x24xbf16>, vector<24x8xbf16>, vector<24x8xf32> -> vector<24x8xf32>
    %56 = arith.addf %49, %55 : vector<24x8xf32>
    %c0_45 = arith.constant 0 : index
    %c14 = arith.constant 14 : index
    %c0_46 = arith.constant 0 : index
    %57 = vector.load %arg1[%c0_45, %c14, %c0_46] : memref<1x42x24xf32, #tpu.memory_space<vmem>>, vector<1x24x24xf32>
    %58 = vector.shape_cast %57 : vector<1x24x24xf32> to vector<24x24xf32>
    %59 = arith.truncf %58 : vector<24x24xf32> to vector<24x24xbf16>
    %c8_47 = arith.constant 8 : index
    %c0_48 = arith.constant 0 : index
    %c0_49 = arith.constant 0 : index
    %60 = vector.load %arg2[%c8_47, %c0_48, %c0_49] : memref<9x24x8xbf16, #tpu.memory_space<vmem>>, vector<1x24x8xbf16>
    %61 = vector.shape_cast %60 : vector<1x24x8xbf16> to vector<24x8xbf16>
    %cst_50 = arith.constant dense<0.000000e+00> : vector<24x8xf32>
    %62 = tpu.matmul %59, %61, %cst_50 {dimension_numbers = #tpu.dot_dimension_numbers<[1], [0], [0], [1], [0, 0, 1, 1], [], []>} : vector<24x24xbf16>, vector<24x8xbf16>, vector<24x8xf32> -> vector<24x8xf32>
    %63 = arith.addf %56, %62 : vector<24x8xf32>
    %c0_51 = arith.constant 0 : index
    %c0_52 = arith.constant 0 : index
    %c0_53 = arith.constant 0 : index
    %64 = vector.load %arg3[%c0_51, %c0_52, %c0_53] : memref<1x24x8xf32, #tpu.memory_space<vmem>>, vector<1x24x8xf32>
    %65 = vector.shape_cast %64 : vector<1x24x8xf32> to vector<24x8xf32>
    %66 = vector.shape_cast %63 : vector<24x8xf32> to vector<1x24x8xf32>
    tpu.vector_store %arg3[%c0_51, %c0_52, %c0_53], %66 {strides = array<i32>} : memref<1x24x8xf32, #tpu.memory_space<vmem>>, vector<1x24x8xf32>,
    return
  }
  func.func @transform_0(%arg0: i32) -> (i32, i32, i32) {
    %c0_i32 = arith.constant 0 : i32
    %c0_i32_0 = arith.constant 0 : i32
    %c0_i32_1 = arith.constant 0 : i32
    return %arg0, %c0_i32, %c0_i32_0 : i32, i32, i32
  }
  func.func @transform_1(%arg0: i32) -> (i32, i32, i32) {
    %c0_i32 = arith.constant 0 : i32
    %c0_i32_0 = arith.constant 0 : i32
    %c0_i32_1 = arith.constant 0 : i32
    %c0_i32_2 = arith.constant 0 : i32
    return %c0_i32, %c0_i32_0, %c0_i32_1 : i32, i32, i32
  }
  func.func @transform_2(%arg0: i32) -> (i32, i32, i32) {
    %c0_i32 = arith.constant 0 : i32
    %c0_i32_0 = arith.constant 0 : i32
    %c0_i32_1 = arith.constant 0 : i32
    return %arg0, %c0_i32, %c0_i32_0 : i32, i32, i32
  }
}

module attributes {stable_mosaic.version = 11 : i64} {
  func.func @_fused_mm_kernel(%arg0: i32, %arg1: memref<32x24xf32, #tpu.memory_space<vmem>>, %arg2: memref<1x24xf32, #tpu.memory_space<vmem>>, %arg3: memref<1x24xf32, #tpu.memory_space<vmem>>, %arg4: memref<24x24xbf16, #tpu.memory_space<vmem>>, %arg5: memref<1x24xf32, #tpu.memory_space<vmem>>, %arg6: memref<1x24xf32, #tpu.memory_space<vmem>>, %arg7: memref<32x24xf32, #tpu.memory_space<vmem>>) attributes {dimension_semantics = [#tpu.dimension_semantics<parallel>], iteration_bounds = array<i64: 1>, scalar_prefetch = 0 : i64, scratch_operands = 0 : i64, tpu.core_type = #tpu.core_type<tc>, window_params = [{transform_indices = @transform_0, window_bounds = array<i64: 32, 24>}, {pipeline_mode = #tpu.pipeline_mode<synchronous>, transform_indices = @transform_1, window_bounds = array<i64: 1, 24>}, {pipeline_mode = #tpu.pipeline_mode<synchronous>, transform_indices = @transform_2, window_bounds = array<i64: 1, 24>}, {pipeline_mode = #tpu.pipeline_mode<synchronous>, transform_indices = @transform_3, window_bounds = array<i64: 24, 24>}, {pipeline_mode = #tpu.pipeline_mode<synchronous>, transform_indices = @transform_4, window_bounds = array<i64: 1, 24>}, {pipeline_mode = #tpu.pipeline_mode<synchronous>, transform_indices = @transform_5, window_bounds = array<i64: 1, 24>}, {transform_indices = @transform_6, window_bounds = array<i64: 32, 24>}]} {
    %c0 = arith.constant 0 : index
    %c0_0 = arith.constant 0 : index
    %0 = vector.load %arg1[%c0, %c0_0] : memref<32x24xf32, #tpu.memory_space<vmem>>, vector<32x24xf32>
    %c0_1 = arith.constant 0 : index
    %c0_2 = arith.constant 0 : index
    %1 = vector.load %arg2[%c0_1, %c0_2] : memref<1x24xf32, #tpu.memory_space<vmem>>, vector<1x24xf32>
    %2 = vector.broadcast %1 : vector<1x24xf32> to vector<32x24xf32>
    %3 = arith.mulf %0, %2 : vector<32x24xf32>
    %c0_3 = arith.constant 0 : index
    %c0_4 = arith.constant 0 : index
    %4 = vector.load %arg3[%c0_3, %c0_4] : memref<1x24xf32, #tpu.memory_space<vmem>>, vector<1x24xf32>
    %5 = vector.broadcast %4 : vector<1x24xf32> to vector<32x24xf32>
    %6 = arith.addf %3, %5 : vector<32x24xf32>
    %cst = arith.constant 0.000000e+00 : f32
    %7 = vector.broadcast %cst : f32 to vector<32x24xf32>
    %8 = arith.maximumf %6, %7 : vector<32x24xf32>
    %9 = arith.truncf %8 : vector<32x24xf32> to vector<32x24xbf16>
    %c0_5 = arith.constant 0 : index
    %c0_6 = arith.constant 0 : index
    %10 = vector.load %arg4[%c0_5, %c0_6] : memref<24x24xbf16, #tpu.memory_space<vmem>>, vector<24x24xbf16>
    %cst_7 = arith.constant dense<0.000000e+00> : vector<32x24xf32>
    %11 = tpu.matmul %9, %10, %cst_7 {dimension_numbers = #tpu.dot_dimension_numbers<[1], [0], [0], [1], [0, 0, 1, 1], [], []>} : vector<32x24xbf16>, vector<24x24xbf16>, vector<32x24xf32> -> vector<32x24xf32>
    %c0_8 = arith.constant 0 : index
    %c0_9 = arith.constant 0 : index
    %12 = vector.load %arg5[%c0_8, %c0_9] : memref<1x24xf32, #tpu.memory_space<vmem>>, vector<1x24xf32>
    %13 = vector.broadcast %12 : vector<1x24xf32> to vector<32x24xf32>
    %14 = arith.mulf %11, %13 : vector<32x24xf32>
    %c0_10 = arith.constant 0 : index
    %c0_11 = arith.constant 0 : index
    %15 = vector.load %arg6[%c0_10, %c0_11] : memref<1x24xf32, #tpu.memory_space<vmem>>, vector<1x24xf32>
    %16 = vector.broadcast %15 : vector<1x24xf32> to vector<32x24xf32>
    %17 = arith.addf %14, %16 : vector<32x24xf32>
    %cst_12 = arith.constant 0.000000e+00 : f32
    %18 = vector.broadcast %cst_12 : f32 to vector<32x24xf32>
    %19 = arith.maximumf %17, %18 : vector<32x24xf32>
    %c0_13 = arith.constant 0 : index
    %c0_14 = arith.constant 0 : index
    %20 = vector.load %arg7[%c0_13, %c0_14] : memref<32x24xf32, #tpu.memory_space<vmem>>, vector<32x24xf32>
    tpu.vector_store %arg7[%c0_13, %c0_14], %19 {strides = array<i32>} : memref<32x24xf32, #tpu.memory_space<vmem>>, vector<32x24xf32>,
    return
  }
  func.func @transform_0(%arg0: i32) -> (i32, i32) {
    %c0_i32 = arith.constant 0 : i32
    %c0_i32_0 = arith.constant 0 : i32
    return %arg0, %c0_i32 : i32, i32
  }
  func.func @transform_1(%arg0: i32) -> (i32, i32) {
    %c0_i32 = arith.constant 0 : i32
    %c0_i32_0 = arith.constant 0 : i32
    %c0_i32_1 = arith.constant 0 : i32
    return %c0_i32, %c0_i32_0 : i32, i32
  }
  func.func @transform_2(%arg0: i32) -> (i32, i32) {
    %c0_i32 = arith.constant 0 : i32
    %c0_i32_0 = arith.constant 0 : i32
    %c0_i32_1 = arith.constant 0 : i32
    return %c0_i32, %c0_i32_0 : i32, i32
  }
  func.func @transform_3(%arg0: i32) -> (i32, i32) {
    %c0_i32 = arith.constant 0 : i32
    %c0_i32_0 = arith.constant 0 : i32
    %c0_i32_1 = arith.constant 0 : i32
    return %c0_i32, %c0_i32_0 : i32, i32
  }
  func.func @transform_4(%arg0: i32) -> (i32, i32) {
    %c0_i32 = arith.constant 0 : i32
    %c0_i32_0 = arith.constant 0 : i32
    %c0_i32_1 = arith.constant 0 : i32
    return %c0_i32, %c0_i32_0 : i32, i32
  }
  func.func @transform_5(%arg0: i32) -> (i32, i32) {
    %c0_i32 = arith.constant 0 : i32
    %c0_i32_0 = arith.constant 0 : i32
    %c0_i32_1 = arith.constant 0 : i32
    return %c0_i32, %c0_i32_0 : i32, i32
  }
  func.func @transform_6(%arg0: i32) -> (i32, i32) {
    %c0_i32 = arith.constant 0 : i32
    %c0_i32_0 = arith.constant 0 : i32
    return %arg0, %c0_i32 : i32, i32
  }
}

module attributes {stable_mosaic.version = 11 : i64} {
  func.func @_fused_mm_kernel(%arg0: i32, %arg1: memref<32x32xf32, #tpu.memory_space<vmem>>, %arg2: memref<1x32xf32, #tpu.memory_space<vmem>>, %arg3: memref<1x32xf32, #tpu.memory_space<vmem>>, %arg4: memref<32x16xbf16, #tpu.memory_space<vmem>>, %arg5: memref<1x16xf32, #tpu.memory_space<vmem>>, %arg6: memref<1x16xf32, #tpu.memory_space<vmem>>, %arg7: memref<32x16xf32, #tpu.memory_space<vmem>>) attributes {dimension_semantics = [#tpu.dimension_semantics<parallel>], iteration_bounds = array<i64: 1>, scalar_prefetch = 0 : i64, scratch_operands = 0 : i64, tpu.core_type = #tpu.core_type<tc>, window_params = [{transform_indices = @transform_0, window_bounds = array<i64: 32, 32>}, {pipeline_mode = #tpu.pipeline_mode<synchronous>, transform_indices = @transform_1, window_bounds = array<i64: 1, 32>}, {pipeline_mode = #tpu.pipeline_mode<synchronous>, transform_indices = @transform_2, window_bounds = array<i64: 1, 32>}, {pipeline_mode = #tpu.pipeline_mode<synchronous>, transform_indices = @transform_3, window_bounds = array<i64: 32, 16>}, {pipeline_mode = #tpu.pipeline_mode<synchronous>, transform_indices = @transform_4, window_bounds = array<i64: 1, 16>}, {pipeline_mode = #tpu.pipeline_mode<synchronous>, transform_indices = @transform_5, window_bounds = array<i64: 1, 16>}, {transform_indices = @transform_6, window_bounds = array<i64: 32, 16>}]} {
    %c0 = arith.constant 0 : index
    %c0_0 = arith.constant 0 : index
    %0 = vector.load %arg1[%c0, %c0_0] : memref<32x32xf32, #tpu.memory_space<vmem>>, vector<32x32xf32>
    %c0_1 = arith.constant 0 : index
    %c0_2 = arith.constant 0 : index
    %1 = vector.load %arg2[%c0_1, %c0_2] : memref<1x32xf32, #tpu.memory_space<vmem>>, vector<1x32xf32>
    %2 = vector.broadcast %1 : vector<1x32xf32> to vector<32x32xf32>
    %3 = arith.mulf %0, %2 : vector<32x32xf32>
    %c0_3 = arith.constant 0 : index
    %c0_4 = arith.constant 0 : index
    %4 = vector.load %arg3[%c0_3, %c0_4] : memref<1x32xf32, #tpu.memory_space<vmem>>, vector<1x32xf32>
    %5 = vector.broadcast %4 : vector<1x32xf32> to vector<32x32xf32>
    %6 = arith.addf %3, %5 : vector<32x32xf32>
    %cst = arith.constant 0.000000e+00 : f32
    %7 = vector.broadcast %cst : f32 to vector<32x32xf32>
    %8 = arith.maximumf %6, %7 : vector<32x32xf32>
    %9 = arith.truncf %8 : vector<32x32xf32> to vector<32x32xbf16>
    %c0_5 = arith.constant 0 : index
    %c0_6 = arith.constant 0 : index
    %10 = vector.load %arg4[%c0_5, %c0_6] : memref<32x16xbf16, #tpu.memory_space<vmem>>, vector<32x16xbf16>
    %cst_7 = arith.constant dense<0.000000e+00> : vector<32x16xf32>
    %11 = tpu.matmul %9, %10, %cst_7 {dimension_numbers = #tpu.dot_dimension_numbers<[1], [0], [0], [1], [0, 0, 1, 1], [], []>} : vector<32x32xbf16>, vector<32x16xbf16>, vector<32x16xf32> -> vector<32x16xf32>
    %c0_8 = arith.constant 0 : index
    %c0_9 = arith.constant 0 : index
    %12 = vector.load %arg7[%c0_8, %c0_9] : memref<32x16xf32, #tpu.memory_space<vmem>>, vector<32x16xf32>
    tpu.vector_store %arg7[%c0_8, %c0_9], %11 {strides = array<i32>} : memref<32x16xf32, #tpu.memory_space<vmem>>, vector<32x16xf32>,
    return
  }
  func.func @transform_0(%arg0: i32) -> (i32, i32) {
    %c0_i32 = arith.constant 0 : i32
    %c0_i32_0 = arith.constant 0 : i32
    return %arg0, %c0_i32 : i32, i32
  }
  func.func @transform_1(%arg0: i32) -> (i32, i32) {
    %c0_i32 = arith.constant 0 : i32
    %c0_i32_0 = arith.constant 0 : i32
    %c0_i32_1 = arith.constant 0 : i32
    return %c0_i32, %c0_i32_0 : i32, i32
  }
  func.func @transform_2(%arg0: i32) -> (i32, i32) {
    %c0_i32 = arith.constant 0 : i32
    %c0_i32_0 = arith.constant 0 : i32
    %c0_i32_1 = arith.constant 0 : i32
    return %c0_i32, %c0_i32_0 : i32, i32
  }
  func.func @transform_3(%arg0: i32) -> (i32, i32) {
    %c0_i32 = arith.constant 0 : i32
    %c0_i32_0 = arith.constant 0 : i32
    %c0_i32_1 = arith.constant 0 : i32
    return %c0_i32, %c0_i32_0 : i32, i32
  }
  func.func @transform_4(%arg0: i32) -> (i32, i32) {
    %c0_i32 = arith.constant 0 : i32
    %c0_i32_0 = arith.constant 0 : i32
    %c0_i32_1 = arith.constant 0 : i32
    return %c0_i32, %c0_i32_0 : i32, i32
  }
  func.func @transform_5(%arg0: i32) -> (i32, i32) {
    %c0_i32 = arith.constant 0 : i32
    %c0_i32_0 = arith.constant 0 : i32
    %c0_i32_1 = arith.constant 0 : i32
    return %c0_i32, %c0_i32_0 : i32, i32
  }
  func.func @transform_6(%arg0: i32) -> (i32, i32) {
    %c0_i32 = arith.constant 0 : i32
    %c0_i32_0 = arith.constant 0 : i32
    return %arg0, %c0_i32 : i32, i32
  }
}

</mosaic_0001>

<bundles_post_ra>
// kernel: deep_cnn300_forward.13
= control target key start
LH: loop header
LB: loop body
LE: loop exit
PB: predicated region body
PF: predicated region fallthrough
CT: control target
= control target key end

     0   :  { %vm129_vm0 = vcmask 130048   ;;  %s431_s0 = inlined_call_operand.vmem [shape: f32[128,16], index: 0, kind: input, shape index: {}]   ;;  %s432_s1 = inlined_call_operand.vmem [shape: f32[128,16], index: 1, kind: input, shape index: {}]   ;;  %s433_s2 = inlined_call_operand.vmem [shape: f32[128,16], index: 2, kind: input, shape index: {}]   ;;  %s434_s3 = inlined_call_operand.vmem [shape: f32[128,16], index: 3, kind: input, shape index: {}]   ;;  %s435_s4 = inlined_call_operand.vmem [shape: f32[128,16], index: 4, kind: output, shape index: {}]  }
   0x1   :  { %v17_v0 = vld [vmem:[%s431_s0] sm:$0xff]  ;;  %v18_v5 = vld [vmem:[%s431_s0 + $0x8] sm:$0xff]  ;;  %v19_v11 = vld [vmem:[%s431_s0 + $0x10] sm:$0xff] }
   0x2   :  { %v33_v1 = vld [vmem:[%s432_s1] sm:$0xff]  ;;  %v34_v6 = vld [vmem:[%s432_s1 + $0x8] sm:$0xff]  ;;  %v35_v13 = vld [vmem:[%s432_s1 + $0x10] sm:$0xff] }
   0x3   :  { %v65_v2 = vld [vmem:[%s433_s2] sm:$0xff]  ;;  %v49_v3 = vmax.f32 %v17_v0, %v33_v1  ;;  %v50_v8 = vmax.f32 %v18_v5, %v34_v6  ;;  %v66_v9 = vld [vmem:[%s433_s2 + $0x8] sm:$0xff]  ;;  %v67_v14 = vld [vmem:[%s433_s2 + $0x10] sm:$0xff]  ;;  %v51_v17 = vmax.f32 %v19_v11, %v35_v13 }
   0x4   :  { %v81_v4 = vld [vmem:[%s434_s3] sm:$0xff]  ;;  %v82_v10 = vld [vmem:[%s434_s3 + $0x8] sm:$0xff]  ;;  %v83_v15 = vld [vmem:[%s434_s3 + $0x10] sm:$0xff] }
   0x5   :  { %v97_v7 = vmax.f32 %v65_v2, %v81_v4  ;;  %v98_v12 = vmax.f32 %v66_v9, %v82_v10  ;;  %v99_v18 = vmax.f32 %v67_v14, %v83_v15  ;;  %v20_v19 = vld [vmem:[%s431_s0 + $0x18] sm:$0xff]  ;;  %v21_v25 = vld [vmem:[%s431_s0 + $0x20] sm:$0xff]  ;;  %v22_v32 = vld [vmem:[%s431_s0 + $0x28] sm:$0xff] }
   0x6   :  { %v36_v20 = vld [vmem:[%s432_s1 + $0x18] sm:$0xff]  ;;  %v37_v26 = vld [vmem:[%s432_s1 + $0x20] sm:$0xff]  ;;  %v38_v34 = vld [vmem:[%s432_s1 + $0x28] sm:$0xff] }
   0x7   :  { %v113_v16 = vmax.f32 %v49_v3, %v97_v7  ;;  %v68_v21 = vld [vmem:[%s433_s2 + $0x18] sm:$0xff]  ;;  %v114_v22 = vmax.f32 %v50_v8, %v98_v12  ;;  %v52_v23 = vmax.f32 %v20_v19, %v36_v20  ;;  %v115_v27 = vmax.f32 %v51_v17, %v99_v18  ;;  %v69_v30 = vld [vmem:[%s433_s2 + $0x20] sm:$0xff]  ;;  %v70_v35 = vld [vmem:[%s433_s2 + $0x28] sm:$0xff] }
   0x8   :  { %v84_v24 = vld [vmem:[%s434_s3 + $0x18] sm:$0xff]  ;;  %v53_v29 = vmax.f32 %v21_v25, %v37_v26  ;;  %v85_v31 = vld [vmem:[%s434_s3 + $0x20] sm:$0xff]  ;;  %v86_v36 = vld [vmem:[%s434_s3 + $0x28] sm:$0xff]  ;;  %v54_v38 = vmax.f32 %v22_v32, %v38_v34 }
   0x9   :  { %130 = vst.msk [vmem:[%s435_s4] sm:$0xff] %vm129_vm0, %v113_v16  ;;  %v100_v28 = vmax.f32 %v68_v21, %v84_v24  ;;  %v101_v33 = vmax.f32 %v69_v30, %v85_v31  ;;  %v102_v39 = vmax.f32 %v70_v35, %v86_v36  ;;  %v23_v40 = vld [vmem:[%s431_s0 + $0x30] sm:$0xff]  ;;  %v24_v46 = vld [vmem:[%s431_s0 + $0x38] sm:$0xff]  ;;  %v25_v53 = vld [vmem:[%s431_s0 + $0x40] sm:$0xff] }
   0xa   :  { %131 = vst.msk [vmem:[%s435_s4 + $0x8] sm:$0xff] %vm129_vm0, %v114_v22  ;;  %v39_v41 = vld [vmem:[%s432_s1 + $0x30] sm:$0xff]  ;;  %v40_v47 = vld [vmem:[%s432_s1 + $0x38] sm:$0xff]  ;;  %v41_v55 = vld [vmem:[%s432_s1 + $0x40] sm:$0xff] }
   0xb   :  { %132 = vst.msk [vmem:[%s435_s4 + $0x10] sm:$0xff] %vm129_vm0, %v115_v27  ;;  %v116_v37 = vmax.f32 %v52_v23, %v100_v28  ;;  %v71_v42 = vld [vmem:[%s433_s2 + $0x30] sm:$0xff]  ;;  %v117_v43 = vmax.f32 %v53_v29, %v101_v33  ;;  %v55_v44 = vmax.f32 %v23_v40, %v39_v41  ;;  %v118_v48 = vmax.f32 %v54_v38, %v102_v39  ;;  %v72_v51 = vld [vmem:[%s433_s2 + $0x38] sm:$0xff]  ;;  %v73_v56 = vld [vmem:[%s433_s2 + $0x40] sm:$0xff] }
   0xc   :  { %v87_v45 = vld [vmem:[%s434_s3 + $0x30] sm:$0xff]  ;;  %v56_v50 = vmax.f32 %v24_v46, %v40_v47  ;;  %v88_v52 = vld [vmem:[%s434_s3 + $0x38] sm:$0xff]  ;;  %v89_v57 = vld [vmem:[%s434_s3 + $0x40] sm:$0xff]  ;;  %v57_v59 = vmax.f32 %v25_v53, %v41_v55 }
   0xd   :  { %133 = vst.msk [vmem:[%s435_s4 + $0x18] sm:$0xff] %vm129_vm0, %v116_v37  ;;  %v103_v49 = vmax.f32 %v71_v42, %v87_v45  ;;  %v104_v54 = vmax.f32 %v72_v51, %v88_v52  ;;  %v105_v60 = vmax.f32 %v73_v56, %v89_v57  ;;  %v26_v61 = vld [vmem:[%s431_s0 + $0x48] sm:$0xff]  ;;  %v27_v3 = vld [vmem:[%s431_s0 + $0x50] sm:$0xff]  ;;  %v28_v10 = vld [vmem:[%s431_s0 + $0x58] sm:$0xff] }
   0xe   :  { %134 = vst.msk [vmem:[%s435_s4 + $0x20] sm:$0xff] %vm129_vm0, %v117_v43  ;;  %v42_v62 = vld [vmem:[%s432_s1 + $0x48] sm:$0xff]  ;;  %v43_v4 = vld [vmem:[%s432_s1 + $0x50] sm:$0xff]  ;;  %v44_v12 = vld [vmem:[%s432_s1 + $0x58] sm:$0xff] }
   0xf   :  { %135 = vst.msk [vmem:[%s435_s4 + $0x28] sm:$0xff] %vm129_vm0, %v118_v48  ;;  %v119_v58 = vmax.f32 %v55_v44, %v103_v49  ;;  %v74_v63 = vld [vmem:[%s433_s2 + $0x48] sm:$0xff]  ;;  %v120_v0 = vmax.f32 %v56_v50, %v104_v54  ;;  %v58_v1 = vmax.f32 %v26_v61, %v42_v62  ;;  %v121_v5 = vmax.f32 %v57_v59, %v105_v60  ;;  %v75_v8 = vld [vmem:[%s433_s2 + $0x50] sm:$0xff]  ;;  %v76_v13 = vld [vmem:[%s433_s2 + $0x58] sm:$0xff] }
  0x10   :  { %v90_v2 = vld [vmem:[%s434_s3 + $0x48] sm:$0xff]  ;;  %v59_v7 = vmax.f32 %v27_v3, %v43_v4  ;;  %v91_v9 = vld [vmem:[%s434_s3 + $0x50] sm:$0xff]  ;;  %v92_v14 = vld [vmem:[%s434_s3 + $0x58] sm:$0xff]  ;;  %v60_v16 = vmax.f32 %v28_v10, %v44_v12 }
  0x11   :  { %136 = vst.msk [vmem:[%s435_s4 + $0x30] sm:$0xff] %vm129_vm0, %v119_v58  ;;  %v106_v6 = vmax.f32 %v74_v63, %v90_v2  ;;  %v107_v11 = vmax.f32 %v75_v8, %v91_v9  ;;  %v108_v17 = vmax.f32 %v76_v13, %v92_v14  ;;  %v29_v18 = vld [vmem:[%s431_s0 + $0x60] sm:$0xff]  ;;  %v30_v24 = vld [vmem:[%s431_s0 + $0x68] sm:$0xff]  ;;  %v31_v31 = vld [vmem:[%s431_s0 + $0x70] sm:$0xff] }
  0x12   :  { %137 = vst.msk [vmem:[%s435_s4 + $0x38] sm:$0xff] %vm129_vm0, %v120_v0  ;;  %v45_v19 = vld [vmem:[%s432_s1 + $0x60] sm:$0xff]  ;;  %v46_v25 = vld [vmem:[%s432_s1 + $0x68] sm:$0xff]  ;;  %v47_v33 = vld [vmem:[%s432_s1 + $0x70] sm:$0xff] }
  0x13   :  { %138 = vst.msk [vmem:[%s435_s4 + $0x40] sm:$0xff] %vm129_vm0, %v121_v5  ;;  %v122_v15 = vmax.f32 %v58_v1, %v106_v6  ;;  %v77_v20 = vld [vmem:[%s433_s2 + $0x60] sm:$0xff]  ;;  %v123_v21 = vmax.f32 %v59_v7, %v107_v11  ;;  %v61_v22 = vmax.f32 %v29_v18, %v45_v19  ;;  %v124_v26 = vmax.f32 %v60_v16, %v108_v17  ;;  %v78_v29 = vld [vmem:[%s433_s2 + $0x68] sm:$0xff]  ;;  %v79_v34 = vld [vmem:[%s433_s2 + $0x70] sm:$0xff] }
  0x14   :  { %v93_v23 = vld [vmem:[%s434_s3 + $0x60] sm:$0xff]  ;;  %v62_v28 = vmax.f32 %v30_v24, %v46_v25  ;;  %v94_v30 = vld [vmem:[%s434_s3 + $0x68] sm:$0xff]  ;;  %v95_v35 = vld [vmem:[%s434_s3 + $0x70] sm:$0xff]  ;;  %v63_v37 = vmax.f32 %v31_v31, %v47_v33 }
  0x15   :  { %139 = vst.msk [vmem:[%s435_s4 + $0x48] sm:$0xff] %vm129_vm0, %v122_v15  ;;  %v109_v27 = vmax.f32 %v77_v20, %v93_v23  ;;  %v110_v32 = vmax.f32 %v78_v29, %v94_v30  ;;  %v111_v38 = vmax.f32 %v79_v34, %v95_v35  ;;  %v32_v39 = vld [vmem:[%s431_s0 + $0x78] sm:$0xff] }
  0x16   :  { %140 = vst.msk [vmem:[%s435_s4 + $0x50] sm:$0xff] %vm129_vm0, %v123_v21  ;;  %v48_v40 = vld [vmem:[%s432_s1 + $0x78] sm:$0xff] }
  0x17   :  { %141 = vst.msk [vmem:[%s435_s4 + $0x58] sm:$0xff] %vm129_vm0, %v124_v26  ;;  %v125_v36 = vmax.f32 %v61_v22, %v109_v27  ;;  %v80_v41 = vld [vmem:[%s433_s2 + $0x78] sm:$0xff]  ;;  %v126_v42 = vmax.f32 %v62_v28, %v110_v32  ;;  %v64_v43 = vmax.f32 %v32_v39, %v48_v40  ;;  %v127_v45 = vmax.f32 %v63_v37, %v111_v38 }
  0x18   :  { %v96_v44 = vld [vmem:[%s434_s3 + $0x78] sm:$0xff] }
  0x19   :  { %142 = vst.msk [vmem:[%s435_s4 + $0x60] sm:$0xff] %vm129_vm0, %v125_v36  ;;  %v112_v46 = vmax.f32 %v80_v41, %v96_v44 }
  0x1a   :  { %143 = vst.msk [vmem:[%s435_s4 + $0x68] sm:$0xff] %vm129_vm0, %v126_v42 }
  0x1b   :  { %144 = vst.msk [vmem:[%s435_s4 + $0x70] sm:$0xff] %vm129_vm0, %v127_v45  ;;  %v128_v47 = vmax.f32 %v64_v43, %v112_v46 }
  0x1d   :  { %145 = vst.msk [vmem:[%s435_s4 + $0x78] sm:$0xff] %vm129_vm0, %v128_v47 }

// kernel: deep_cnn300_forward.14
= control target key start
LH: loop header
LB: loop body
LE: loop exit
PB: predicated region body
PF: predicated region fallthrough
CT: control target
= control target key end

     0   :  { %vm112_vm0 = vcmask 130048   ;;  %vm242_vm1 = vcmask 195584   ;;  %s507_s3 = inlined_call_operand.vmem [shape: bf16[16,24], index: 3, kind: input, shape index: {}]   ;;  %s508_s0 = inlined_call_operand.vmem [shape: f32[128,16], index: 0, kind: input, shape index: {}]   ;;  %s509_s1 = inlined_call_operand.vmem [shape: f32[1,16], index: 1, kind: input, shape index: {}]   ;;  %s510_s2 = inlined_call_operand.vmem [shape: f32[1,16], index: 2, kind: input, shape index: {}]   ;;  %s511_s4 = inlined_call_operand.vmem [shape: f32[1,24], index: 4, kind: input, shape index: {}]   ;;  %s512_s5 = inlined_call_operand.vmem [shape: f32[1,24], index: 5, kind: input, shape index: {}]   ;;  %s513_s6 = inlined_call_operand.vmem [shape: f32[128,24], index: 6, kind: output, shape index: {}]  }
   0x1   :  { %v275_v0 = vld [vmem:[%s507_s3] sm:$0xff]  ;;  %v25_v2 = vld [vmem:[%s508_s0 + $0x8] sm:$0xff]  ;;  %v26_v26 = vld [vmem:[%s508_s0 + $0x10] sm:$0xff] }
   0x2   :  { %v24_v1 = vld [vmem:[%s508_s0] sm:$0xff]  ;;  %144 = vmatpush.bf16.msra.mxu0 %v275_v0  ;;  %276 = vmatpush.bf16.msra.mxu1 %v275_v0  ;;  %v29_v6 = vld [vmem:[%s508_s0 + $0x28] sm:$0xff]  ;;  %v27_v27 = vld [vmem:[%s508_s0 + $0x18] sm:$0xff] }
   0x3   :  { %v279_v3 = vld [vmem:[%s509_s1] ss:$0 sm:$0xff]  ;;  %277 = vmatpush.bf16.msra.mxu2 %v275_v0  ;;  %278 = vmatpush.bf16.msra.mxu3 %v275_v0  ;;  %v33_v11 = vld [vmem:[%s508_s0 + $0x48] sm:$0xff]  ;;  %v30_v32 = vld [vmem:[%s508_s0 + $0x30] sm:$0xff] }
   0x4   :  { %v333_v4 = vld [vmem:[%s510_s2] ss:$0 sm:$0xff]  ;;  %v44_v7 = vmul.f32 %v279_v3, %v24_v1  ;;  %v45_v8 = vmul.f32 %v279_v3, %v25_v2  ;;  %v49_v13 = vmul.f32 %v279_v3, %v29_v6  ;;  %v53_v15 = vmul.f32 %v279_v3, %v33_v11  ;;  %v37_v16 = vld [vmem:[%s508_s0 + $0x68] sm:$0xff]  ;;  %v31_v39 = vld [vmem:[%s508_s0 + $0x38] sm:$0xff] }
   0x5   :  { %v28_v5 = vld [vmem:[%s508_s0 + $0x20] sm:$0xff]  ;;  %v57_v21 = vmul.f32 %v279_v3, %v37_v16  ;;  %v34_v40 = vld [vmem:[%s508_s0 + $0x50] sm:$0xff]  ;;  %v35_v41 = vld [vmem:[%s508_s0 + $0x58] sm:$0xff]  ;;  %v46_v46 = vmul.f32 %v279_v3, %v26_v26  ;;  %v47_v47 = vmul.f32 %v279_v3, %v27_v27  ;;  %v50_v48 = vmul.f32 %v279_v3, %v30_v32 }
   0x6   :  { %v48_v9 = vmul.f32 %v279_v3, %v28_v5  ;;  %v32_v10 = vld [vmem:[%s508_s0 + $0x40] sm:$0xff]  ;;  %v64_v18 = vadd.f32 %v333_v4, %v44_v7  ;;  %v65_v19 = vadd.f32 %v333_v4, %v45_v8  ;;  %v69_v22 = vadd.f32 %v333_v4, %v49_v13  ;;  %v38_v44 = vld [vmem:[%s508_s0 + $0x70] sm:$0xff]  ;;  %v39_v49 = vld [vmem:[%s508_s0 + $0x78] sm:$0xff] }
   0x7   :  { %v36_v12 = vld [vmem:[%s508_s0 + $0x60] sm:$0xff]  ;;  %v52_v14 = vmul.f32 %v279_v3, %v32_v10  ;;  %v73_v24 = vadd.f32 %v333_v4, %v53_v15  ;;  %v77_v31 = vadd.f32 %v333_v4, %v57_v21  ;;  %v51_v50 = vmul.f32 %v279_v3, %v31_v39 }
   0x8   :  { %v56_v17 = vmul.f32 %v279_v3, %v36_v12  ;;  %v68_v20 = vadd.f32 %v333_v4, %v48_v9  ;;  %v80_v28 = vmax.f32 %v64_v18, 0.0  ;;  %v81_v29 = vmax.f32 %v65_v19, 0.0  ;;  %v409_v12 = vld [vmem:[%s512_s5] ss:$0 sm:$0xff] }
   0x9   :  { %v72_v23 = vadd.f32 %v333_v4, %v52_v14  ;;  %v85_v33 = vmax.f32 %v69_v22, 0.0  ;;  %v89_v35 = vmax.f32 %v73_v24, 0.0  ;;  %v93_v38 = vmax.f32 %v77_v31, 0.0 }
   0xa   :  { %v76_v25 = vadd.f32 %v333_v4, %v56_v17  ;;  %v84_v30 = vmax.f32 %v68_v20, 0.0  ;;  %v96_v37 = vpack.c.bf16 %v81_v29, %v80_v28  ;;  %v54_v51 = vmul.f32 %v279_v3, %v34_v40 }
   0xb   :  { %v88_v34 = vmax.f32 %v72_v23, 0.0  ;;  %v55_v52 = vmul.f32 %v279_v3, %v35_v41  ;;  %v58_v53 = vmul.f32 %v279_v3, %v38_v44  ;;  %v59_v54 = vmul.f32 %v279_v3, %v39_v49 }
   0xc   :  { %v92_v36 = vmax.f32 %v76_v25, 0.0  ;;  %v98_v42 = vpack.c.bf16 %v85_v33, %v84_v30  ;;  %267 = vmatmul.msk.bf16.vlgmr.msra.gmra.mxu0 %vm112_vm0, %v96_v37  ;;  %v66_v55 = vadd.f32 %v333_v4, %v46_v46  ;;  %v67_v56 = vadd.f32 %v333_v4, %v47_v47 }
   0xd   :  { %v100_v43 = vpack.c.bf16 %v89_v35, %v88_v34  ;;  %v70_v57 = vadd.f32 %v333_v4, %v50_v48  ;;  %v71_v58 = vadd.f32 %v333_v4, %v51_v50  ;;  %v74_v59 = vadd.f32 %v333_v4, %v54_v51 }
   0xe   :  { %v102_v45 = vpack.c.bf16 %v93_v38, %v92_v36  ;;  %269 = vmatmul.msk.bf16.vlgmr.msra.gmra.mxu1 %vm112_vm0, %v98_v42  ;;  %v75_v60 = vadd.f32 %v333_v4, %v55_v52  ;;  %v78_v61 = vadd.f32 %v333_v4, %v58_v53  ;;  %v79_v62 = vadd.f32 %v333_v4, %v59_v54  ;;  %v404_v4 = vld [vmem:[%s511_s4] ss:$0 sm:$0xff] }
   0xf   :  { %271 = vmatmul.msk.bf16.vlgmr.msra.gmra.mxu2 %vm112_vm0, %v100_v43  ;;  %v82_v63 = vmax.f32 %v66_v55, 0.0  ;;  %v83_v0 = vmax.f32 %v67_v56, 0.0  ;;  %v86_v1 = vmax.f32 %v70_v57, 0.0  ;;  %v87_v2 = vmax.f32 %v71_v58, 0.0 }
  0x10   :  { %273 = vmatmul.msk.bf16.vlgmr.msra.gmra.mxu3 %vm112_vm0, %v102_v45  ;;  %v90_v3 = vmax.f32 %v74_v59, 0.0  ;;  %v91_v5 = vmax.f32 %v75_v60, 0.0  ;;  %v94_v6 = vmax.f32 %v78_v61, 0.0  ;;  %v95_v7 = vmax.f32 %v79_v62, 0.0 }
  0x11   :  { %v97_v8 = vpack.c.bf16 %v83_v0, %v82_v63  ;;  %v99_v9 = vpack.c.bf16 %v87_v2, %v86_v1 }
  0x12   :  { %v101_v10 = vpack.c.bf16 %v91_v5, %v90_v3  ;;  %v103_v11 = vpack.c.bf16 %v95_v7, %v94_v6 }
  0x1c   :  { %268 = vmatmul.msk.bf16.gmra.mxu0 %vm112_vm0, %v97_v8 }
  0x1e   :  { %270 = vmatmul.msk.bf16.gmra.mxu1 %vm112_vm0, %v99_v9 }
  0x1f   :  { %272 = vmatmul.msk.bf16.gmra.mxu2 %vm112_vm0, %v101_v10 }
  0x20   :  { %274 = vmatmul.msk.bf16.gmra.mxu3 %vm112_vm0, %v103_v11 }
  0x89   :  { %v146_v13 = vpop.f32.mrf.mxu0 }
  0x8a   :  { %v190_v14 = vmul.f32 %v404_v4, %v146_v13 }
  0x8b   :  { %v156_v15 = vpop.f32.mrf.mxu1 }
  0x8c   :  { %v194_v16 = vmul.f32 %v404_v4, %v156_v15  ;;  %v210_v17 = vadd.f32 %v409_v12, %v190_v14 }
  0x8e   :  { %v214_v18 = vadd.f32 %v409_v12, %v194_v16  ;;  %v226_v19 = vmax.f32 %v210_v17, 0.0 }
  0x90   :  { %v230_v20 = vmax.f32 %v214_v18, 0.0  ;;  %243 = vst.msk [vmem:[%s513_s6] sm:$0xff] %vm242_vm1, %v226_v19 }
  0x91   :  { %v148_v24 = vpop.f32.mrf.mxu0 }
  0x92   :  { %v166_v21 = vpop.f32.mrf.mxu2  ;;  %247 = vst.msk [vmem:[%s513_s6 + $0x20] sm:$0xff] %vm242_vm1, %v230_v20  ;;  %v191_v26 = vmul.f32 %v404_v4, %v148_v24 }
  0x93   :  { %v198_v22 = vmul.f32 %v404_v4, %v166_v21  ;;  %v176_v23 = vpop.f32.mrf.mxu3  ;;  %v158_v27 = vpop.f32.mrf.mxu1 }
  0x94   :  { %v202_v25 = vmul.f32 %v404_v4, %v176_v23  ;;  %v195_v29 = vmul.f32 %v404_v4, %v158_v27  ;;  %v211_v31 = vadd.f32 %v409_v12, %v191_v26 }
  0x95   :  { %v218_v28 = vadd.f32 %v409_v12, %v198_v22 }
  0x96   :  { %v222_v30 = vadd.f32 %v409_v12, %v202_v25  ;;  %v215_v33 = vadd.f32 %v409_v12, %v195_v29  ;;  %v227_v35 = vmax.f32 %v211_v31, 0.0 }
  0x97   :  { %v234_v32 = vmax.f32 %v218_v28, 0.0 }
  0x98   :  { %v238_v34 = vmax.f32 %v222_v30, 0.0  ;;  %v231_v36 = vmax.f32 %v215_v33, 0.0  ;;  %244 = vst.msk [vmem:[%s513_s6 + $0x8] sm:$0xff] %vm242_vm1, %v227_v35 }
  0x99   :  { %251 = vst.msk [vmem:[%s513_s6 + $0x40] sm:$0xff] %vm242_vm1, %v234_v32  ;;  %v151_v40 = vpop.f32.mrf.mxu0 }
  0x9a   :  { %255 = vst.msk [vmem:[%s513_s6 + $0x60] sm:$0xff] %vm242_vm1, %v238_v34  ;;  %v168_v37 = vpop.f32.mrf.mxu2  ;;  %v192_v42 = vmul.f32 %v404_v4, %v151_v40 }
  0x9b   :  { %v199_v38 = vmul.f32 %v404_v4, %v168_v37  ;;  %v178_v39 = vpop.f32.mrf.mxu3  ;;  %248 = vst.msk [vmem:[%s513_s6 + $0x28] sm:$0xff] %vm242_vm1, %v231_v36  ;;  %v161_v43 = vpop.f32.mrf.mxu1 }
  0x9c   :  { %v203_v41 = vmul.f32 %v404_v4, %v178_v39  ;;  %v196_v45 = vmul.f32 %v404_v4, %v161_v43  ;;  %v212_v47 = vadd.f32 %v409_v12, %v192_v42 }
  0x9d   :  { %v219_v44 = vadd.f32 %v409_v12, %v199_v38 }
  0x9e   :  { %v223_v46 = vadd.f32 %v409_v12, %v203_v41  ;;  %v216_v49 = vadd.f32 %v409_v12, %v196_v45  ;;  %v228_v51 = vmax.f32 %v212_v47, 0.0 }
  0x9f   :  { %v235_v48 = vmax.f32 %v219_v44, 0.0 }
  0xa0   :  { %v239_v50 = vmax.f32 %v223_v46, 0.0  ;;  %v232_v52 = vmax.f32 %v216_v49, 0.0  ;;  %245 = vst.msk [vmem:[%s513_s6 + $0x10] sm:$0xff] %vm242_vm1, %v228_v51 }
  0xa1   :  { %252 = vst.msk [vmem:[%s513_s6 + $0x48] sm:$0xff] %vm242_vm1, %v235_v48  ;;  %v153_v56 = vpop.f32.mrf.mxu0 }
  0xa2   :  { %256 = vst.msk [vmem:[%s513_s6 + $0x68] sm:$0xff] %vm242_vm1, %v239_v50  ;;  %v171_v53 = vpop.f32.mrf.mxu2  ;;  %v193_v58 = vmul.f32 %v404_v4, %v153_v56 }
  0xa3   :  { %v200_v54 = vmul.f32 %v404_v4, %v171_v53  ;;  %v181_v55 = vpop.f32.mrf.mxu3  ;;  %249 = vst.msk [vmem:[%s513_s6 + $0x30] sm:$0xff] %vm242_vm1, %v232_v52  ;;  %v163_v59 = vpop.f32.mrf.mxu1 }
  0xa4   :  { %v204_v57 = vmul.f32 %v404_v4, %v181_v55  ;;  %v197_v61 = vmul.f32 %v404_v4, %v163_v59  ;;  %v213_v63 = vadd.f32 %v409_v12, %v193_v58 }
  0xa5   :  { %v220_v60 = vadd.f32 %v409_v12, %v200_v54 }
  0xa6   :  { %v224_v62 = vadd.f32 %v409_v12, %v204_v57  ;;  %v217_v1 = vadd.f32 %v409_v12, %v197_v61  ;;  %v229_v3 = vmax.f32 %v213_v63, 0.0 }
  0xa7   :  { %v236_v0 = vmax.f32 %v220_v60, 0.0 }
  0xa8   :  { %v240_v2 = vmax.f32 %v224_v62, 0.0  ;;  %v233_v5 = vmax.f32 %v217_v1, 0.0  ;;  %246 = vst.msk [vmem:[%s513_s6 + $0x18] sm:$0xff] %vm242_vm1, %v229_v3 }
  0xa9   :  { %253 = vst.msk [vmem:[%s513_s6 + $0x50] sm:$0xff] %vm242_vm1, %v236_v0 }
  0xaa   :  { %257 = vst.msk [vmem:[%s513_s6 + $0x70] sm:$0xff] %vm242_vm1, %v240_v2  ;;  %v173_v6 = vpop.f32.mrf.mxu2 }
  0xab   :  { %v201_v7 = vmul.f32 %v404_v4, %v173_v6  ;;  %v183_v8 = vpop.f32.mrf.mxu3  ;;  %250 = vst.msk [vmem:[%s513_s6 + $0x38] sm:$0xff] %vm242_vm1, %v233_v5 }
  0xac   :  { %v205_v9 = vmul.f32 %v404_v4, %v183_v8 }
  0xad   :  { %v221_v10 = vadd.f32 %v409_v12, %v201_v7 }
  0xae   :  { %v225_v11 = vadd.f32 %v409_v12, %v205_v9 }
  0xaf   :  { %v237_v13 = vmax.f32 %v221_v10, 0.0 }
  0xb0   :  { %v241_v14 = vmax.f32 %v225_v11, 0.0 }
  0xb1   :  { %254 = vst.msk [vmem:[%s513_s6 + $0x58] sm:$0xff] %vm242_vm1, %v237_v13 }
  0xb2   :  { %258 = vst.msk [vmem:[%s513_s6 + $0x78] sm:$0xff] %vm242_vm1, %v241_v14 }

// kernel: deep_cnn300_forward.12
= control target key start
LH: loop header
LB: loop body
LE: loop exit
PB: predicated region body
PF: predicated region fallthrough
CT: control target
= control target key end

     0   :  { %vm389_vm0 = vcmask 1040384   ;;  %vm390_vm1 = vcmask 1041408   ;;  %v1095_v2 = vmov 65535   ;;  %vm292_vm2 = vcmask 154624   ;;  %s2011_s1 = inlined_call_operand.vmem [shape: f32[1,147], index: 1, kind: input, shape index: {}]   ;;  %s2012_s2 = inlined_call_operand.vmem [shape: f32[1,147], index: 2, kind: input, shape index: {}]   ;;  %s2013_s3 = inlined_call_operand.vmem [shape: bf16[147,16], index: 3, kind: input, shape index: {}]   ;;  %s2014_s0 = inlined_call_operand.vmem [shape: f32[512,147], index: 0, kind: input, shape index: {}]   ;;  %s2015_s4 = inlined_call_operand.vmem [shape: f32[1,16], index: 4, kind: input, shape index: {}]   ;;  %s2016_s5 = inlined_call_operand.vmem [shape: f32[1,16], index: 5, kind: input, shape index: {}]   ;;  %s2017_s6 = inlined_call_operand.vmem [shape: f32[512,16], index: 6, kind: output, shape index: {}]  }
   0x1   :  { %v1078_v0 = vld [vmem:[%s2013_s3 + $0x38] sm:$0xff]  ;;  %v234_v1 = vld [vmem:[%s2013_s3 + $0x48] sm:$0x3]  ;;  %v391_v3 = vsel %vm389_vm0, 4294967295, %v1095_v2  ;;  %v1077_v5 = vld [vmem:[%s2013_s3 + $0x30] sm:$0xff]  ;;  %vm934_vm3 = vcmask 130048  }
   0x2   :  { %v272_v4 = vunpack.c.l.b16 %v234_v1  ;;  %396 = vmatpush.bf16.msra.mxu0 %v1078_v0  ;;  %1080 = vmatpush.bf16.msra.mxu2 %v1078_v0  ;;  %v392_v6 = vsel %vm390_vm1, %v391_v3, 0  ;;  %v1076_v9 = vld [vmem:[%s2013_s3 + $0x28] sm:$0xff]  ;;  %v1079_v10 = vld [vmem:[%s2013_s3 + $0x40] sm:$0xff]  ;;  %v27_v12 = vld [vmem:[%s2014_s0 + $0x18] sm:$0xff] }
   0x3   :  { %v25_v11 = vld [vmem:[%s2014_s0 + $0x8] sm:$0xff]  ;;  %v95_v14 = vld [vmem:[%s2014_s0 + $0x238] sm:$0xff]  ;;  %v1075_v16 = vld [vmem:[%s2013_s3 + $0x20] sm:$0xff] }
   0x4   :  { %v282_v7 = vpack.c.b16 %v272_v4, %v272_v4  ;;  %v93_v13 = vld [vmem:[%s2014_s0 + $0x228] sm:$0xff]  ;;  %v153_v15 = vpack.c.bf16 %v27_v12, %v25_v11  ;;  %v1074_v18 = vld [vmem:[%s2013_s3 + $0x18] sm:$0xff]  ;;  %v1073_v19 = vld [vmem:[%s2013_s3 + $0x10] sm:$0xff] }
   0x5   :  { %v187_v17 = vpack.c.bf16 %v95_v14, %v93_v13  ;;  %v1072_v20 = vld [vmem:[%s2013_s3 + $0x8] sm:$0xff]  ;;  %v31_v22 = vld [vmem:[%s2014_s0 + $0x38] sm:$0xff]  ;;  %v1071_v26 = vld [vmem:[%s2013_s3] sm:$0xff] }
   0x6   :  { %v394_v8 = vand.u32 %v392_v6, %v282_v7  ;;  %397 = vmatpush.bf16.msra.mxu0 %v1077_v5  ;;  %1081 = vmatpush.bf16.msra.mxu2 %v1077_v5  ;;  %v29_v21 = vld [vmem:[%s2014_s0 + $0x28] sm:$0xff]  ;;  %v99_v24 = vld [vmem:[%s2014_s0 + $0x258] sm:$0xff]  ;;  %v24_v27 = vld [vmem:[%s2014_s0] sm:$0xff] }
   0x7   :  { %v97_v23 = vld [vmem:[%s2014_s0 + $0x248] sm:$0xff]  ;;  %v155_v25 = vpack.c.bf16 %v31_v22, %v29_v21  ;;  %v26_v28 = vld [vmem:[%s2014_s0 + $0x10] sm:$0xff]  ;;  %v88_v29 = vld [vmem:[%s2014_s0 + $0x200] sm:$0xff] }
   0x8   :  { %571 = vmatpush.bf16.msra.mxu1 %v394_v8  ;;  %1088 = vmatpush.bf16.msra.mxu3 %v394_v8  ;;  %v90_v30 = vld [vmem:[%s2014_s0 + $0x210] sm:$0xff]  ;;  %v189_v31 = vpack.c.bf16 %v99_v24, %v97_v23  ;;  %v152_v32 = vpack.c.bf16 %v26_v28, %v24_v27  ;;  %v33_v34 = vld [vmem:[%s2014_s0 + $0x48] sm:$0xff]  ;;  %v35_v35 = vld [vmem:[%s2014_s0 + $0x58] sm:$0xff] }
   0x9   :  { %v184_v33 = vpack.c.bf16 %v90_v30, %v88_v29  ;;  %v101_v36 = vld [vmem:[%s2014_s0 + $0x268] sm:$0xff]  ;;  %v103_v37 = vld [vmem:[%s2014_s0 + $0x278] sm:$0xff]  ;;  %v157_v38 = vpack.c.bf16 %v35_v35, %v33_v34  ;;  %v28_v39 = vld [vmem:[%s2014_s0 + $0x20] sm:$0xff] }
   0xa   :  { %398 = vmatpush.bf16.msra.mxu0 %v1076_v9  ;;  %1082 = vmatpush.bf16.msra.mxu2 %v1076_v9  ;;  %v30_v40 = vld [vmem:[%s2014_s0 + $0x30] sm:$0xff]  ;;  %v92_v41 = vld [vmem:[%s2014_s0 + $0x220] sm:$0xff]  ;;  %v191_v43 = vpack.c.bf16 %v103_v37, %v101_v36  ;;  %v37_v46 = vld [vmem:[%s2014_s0 + $0x68] sm:$0xff] }
   0xb   :  { %v94_v42 = vld [vmem:[%s2014_s0 + $0x230] sm:$0xff]  ;;  %v154_v44 = vpack.c.bf16 %v30_v40, %v28_v39  ;;  %v39_v47 = vld [vmem:[%s2014_s0 + $0x78] sm:$0xff]  ;;  %v105_v48 = vld [vmem:[%s2014_s0 + $0x288] sm:$0xff] }
   0xc   :  { %572 = vmatpush.bf16.msra.mxu1 %v1079_v10  ;;  %1089 = vmatpush.bf16.msra.mxu3 %v1079_v10  ;;  %v186_v45 = vpack.c.bf16 %v94_v42, %v92_v41  ;;  %v107_v49 = vld [vmem:[%s2014_s0 + $0x298] sm:$0xff]  ;;  %v159_v50 = vpack.c.bf16 %v39_v47, %v37_v46  ;;  %v32_v51 = vld [vmem:[%s2014_s0 + $0x40] sm:$0xff]  ;;  %v34_v52 = vld [vmem:[%s2014_s0 + $0x50] sm:$0xff] }
   0xd   :  { %v96_v53 = vld [vmem:[%s2014_s0 + $0x240] sm:$0xff]  ;;  %v98_v54 = vld [vmem:[%s2014_s0 + $0x250] sm:$0xff]  ;;  %v193_v55 = vpack.c.bf16 %v107_v49, %v105_v48  ;;  %v156_v56 = vpack.c.bf16 %v34_v52, %v32_v51  ;;  %v41_v58 = vld [vmem:[%s2014_s0 + $0x88] sm:$0xff] }
   0xe   :  { %399 = vmatpush.bf16.msra.mxu0 %v1075_v16  ;;  %1083 = vmatpush.bf16.msra.mxu2 %v1075_v16  ;;  %v188_v57 = vpack.c.bf16 %v98_v54, %v96_v53  ;;  %v43_v59 = vld [vmem:[%s2014_s0 + $0x98] sm:$0xff]  ;;  %v109_v60 = vld [vmem:[%s2014_s0 + $0x2a8] sm:$0xff]  ;;  %v36_v63 = vld [vmem:[%s2014_s0 + $0x60] sm:$0xff] }
   0xf   :  { %1039 = vmatmul.msk.bf16.vlgmr.msra.gmra.mxu1 %vm292_vm2, %v153_v15  ;;  %1056 = vmatmul.msk.bf16.vlgmr.msra.gmra.mxu3 %vm292_vm2, %v187_v17  ;;  %v111_v61 = vld [vmem:[%s2014_s0 + $0x2b8] sm:$0xff]  ;;  %v161_v62 = vpack.c.bf16 %v43_v59, %v41_v58  ;;  %v38_v0 = vld [vmem:[%s2014_s0 + $0x70] sm:$0xff]  ;;  %v100_v1 = vld [vmem:[%s2014_s0 + $0x260] sm:$0xff] }
  0x10   :  { %v102_v2 = vld [vmem:[%s2014_s0 + $0x270] sm:$0xff]  ;;  %v195_v3 = vpack.c.bf16 %v111_v61, %v109_v60  ;;  %v158_v4 = vpack.c.bf16 %v38_v0, %v36_v63  ;;  %v45_v6 = vld [vmem:[%s2014_s0 + $0xa8] sm:$0xff]  ;;  %v47_v7 = vld [vmem:[%s2014_s0 + $0xb8] sm:$0xff] }
  0x11   :  { %v190_v5 = vpack.c.bf16 %v102_v2, %v100_v1  ;;  %v113_v8 = vld [vmem:[%s2014_s0 + $0x2c8] sm:$0xff]  ;;  %v115_v9 = vld [vmem:[%s2014_s0 + $0x2d8] sm:$0xff]  ;;  %v163_v10 = vpack.c.bf16 %v47_v7, %v45_v6  ;;  %v40_v11 = vld [vmem:[%s2014_s0 + $0x80] sm:$0xff] }
  0x12   :  { %400 = vmatpush.bf16.msra.mxu0 %v1074_v18  ;;  %1084 = vmatpush.bf16.msra.mxu2 %v1074_v18  ;;  %v42_v12 = vld [vmem:[%s2014_s0 + $0x90] sm:$0xff]  ;;  %v104_v13 = vld [vmem:[%s2014_s0 + $0x280] sm:$0xff]  ;;  %v197_v15 = vpack.c.bf16 %v115_v9, %v113_v8  ;;  %v49_v18 = vld [vmem:[%s2014_s0 + $0xc8] sm:$0xff] }
  0x13   :  { %v106_v14 = vld [vmem:[%s2014_s0 + $0x290] sm:$0xff]  ;;  %v160_v16 = vpack.c.bf16 %v42_v12, %v40_v11  ;;  %v119_v21 = vld [vmem:[%s2014_s0 + $0x2f8] sm:$0xff]  ;;  %v44_v23 = vld [vmem:[%s2014_s0 + $0xa0] sm:$0xff] }
  0x14   :  { %v192_v17 = vpack.c.bf16 %v106_v14, %v104_v13  ;;  %v46_v24 = vld [vmem:[%s2014_s0 + $0xb0] sm:$0xff]  ;;  %v53_v30 = vld [vmem:[%s2014_s0 + $0xe8] sm:$0xff]  ;;  %v48_v35 = vld [vmem:[%s2014_s0 + $0xc0] sm:$0xff] }
  0x15   :  { %v162_v28 = vpack.c.bf16 %v46_v24, %v44_v23  ;;  %v50_v36 = vld [vmem:[%s2014_s0 + $0xd0] sm:$0xff]  ;;  %v112_v37 = vld [vmem:[%s2014_s0 + $0x2c0] sm:$0xff]  ;;  %v57_v42 = vld [vmem:[%s2014_s0 + $0x108] sm:$0xff] }
  0x16   :  { %401 = vmatpush.bf16.msra.mxu0 %v1073_v19  ;;  %1085 = vmatpush.bf16.msra.mxu2 %v1073_v19  ;;  %v51_v19 = vld [vmem:[%s2014_s0 + $0xd8] sm:$0xff]  ;;  %v164_v40 = vpack.c.bf16 %v50_v36, %v48_v35  ;;  %v52_v47 = vld [vmem:[%s2014_s0 + $0xe0] sm:$0xff]  ;;  %v54_v48 = vld [vmem:[%s2014_s0 + $0xf0] sm:$0xff] }
  0x17   :  { %v165_v22 = vpack.c.bf16 %v51_v19, %v49_v18  ;;  %v118_v51 = vld [vmem:[%s2014_s0 + $0x2f0] sm:$0xff]  ;;  %v166_v53 = vpack.c.bf16 %v54_v48, %v52_v47  ;;  %v63_v58 = vld [vmem:[%s2014_s0 + $0x138] sm:$0xff]  ;;  %v129_v59 = vld [vmem:[%s2014_s0 + $0x348] sm:$0xff] }
  0x18   :  { %v131_v60 = vld [vmem:[%s2014_s0 + $0x358] sm:$0xff]  ;;  %v58_v63 = vld [vmem:[%s2014_s0 + $0x110] sm:$0xff]  ;;  %v120_v2 = vld [vmem:[%s2014_s0 + $0x300] sm:$0xff] }
  0x19   :  { %v65_v19 = vld [vmem:[%s2014_s0 + $0x148] sm:$0xff] }
  0x1a   :  { %402 = vmatpush.bf16.msra.mxu0 %v1072_v20  ;;  %1086 = vmatpush.bf16.msra.mxu2 %v1072_v20  ;;  %v117_v20 = vld [vmem:[%s2014_s0 + $0x2e8] sm:$0xff] }
  0x1b   :  { %v199_v27 = vpack.c.bf16 %v119_v21, %v117_v20  ;;  %v67_v20 = vld [vmem:[%s2014_s0 + $0x158] sm:$0xff]  ;;  %v133_v21 = vld [vmem:[%s2014_s0 + $0x368] sm:$0xff] }
  0x1c   :  { %v173_v24 = vpack.c.bf16 %v67_v20, %v65_v19  ;;  %v69_v48 = vld [vmem:[%s2014_s0 + $0x168] sm:$0xff] }
  0x1e   :  { %403 = vmatpush.bf16.msra.mxu0 %v1071_v26  ;;  %1087 = vmatpush.bf16.msra.mxu2 %v1071_v26  ;;  %v110_v26 = vld [vmem:[%s2014_s0 + $0x2b0] sm:$0xff] }
  0x1f   :  { %1040 = vmatmul.msk.bf16.gmra.mxu1 %vm292_vm2, %v155_v25  ;;  %1057 = vmatmul.msk.bf16.gmra.mxu3 %vm292_vm2, %v189_v31  ;;  %v108_v25 = vld [vmem:[%s2014_s0 + $0x2a0] sm:$0xff]  ;;  %v55_v31 = vld [vmem:[%s2014_s0 + $0xf8] sm:$0xff] }
  0x20   :  { %v194_v29 = vpack.c.bf16 %v110_v26, %v108_v25  ;;  %v167_v34 = vpack.c.bf16 %v55_v31, %v53_v30  ;;  %v60_v25 = vld [vmem:[%s2014_s0 + $0x120] sm:$0xff]  ;;  %v62_v26 = vld [vmem:[%s2014_s0 + $0x130] sm:$0xff] }
  0x21   :  { %404 = vmatmul.bf16.vlgmr.msra.gmra.mxu0 %v152_v32  ;;  %484 = vmatmul.bf16.vlgmr.msra.gmra.mxu2 %v184_v33  ;;  %v121_v32 = vld [vmem:[%s2014_s0 + $0x308] sm:$0xff]  ;;  %v123_v33 = vld [vmem:[%s2014_s0 + $0x318] sm:$0xff]  ;;  %v124_v30 = vld [vmem:[%s2014_s0 + $0x320] sm:$0xff]  ;;  %v170_v35 = vpack.c.bf16 %v62_v26, %v60_v25 }
  0x22   :  { %v201_v39 = vpack.c.bf16 %v123_v33, %v121_v32  ;;  %v126_v31 = vld [vmem:[%s2014_s0 + $0x330] sm:$0xff]  ;;  %v75_v25 = vld [vmem:[%s2014_s0 + $0x198] sm:$0xff] }
  0x2f   :  { %1041 = vmatmul.msk.bf16.gmra.mxu1 %vm292_vm2, %v157_v38  ;;  %1058 = vmatmul.msk.bf16.gmra.mxu3 %vm292_vm2, %v191_v43  ;;  %v114_v38 = vld [vmem:[%s2014_s0 + $0x2d0] sm:$0xff]  ;;  %v59_v43 = vld [vmem:[%s2014_s0 + $0x118] sm:$0xff] }
  0x30   :  { %v196_v41 = vpack.c.bf16 %v114_v38, %v112_v37  ;;  %v169_v46 = vpack.c.bf16 %v59_v43, %v57_v42  ;;  %v202_v37 = vpack.c.bf16 %v126_v31, %v124_v30 }
  0x31   :  { %409 = vmatmul.bf16.gmra.mxu0 %v154_v44  ;;  %489 = vmatmul.bf16.gmra.mxu2 %v186_v45  ;;  %v125_v44 = vld [vmem:[%s2014_s0 + $0x328] sm:$0xff]  ;;  %v127_v45 = vld [vmem:[%s2014_s0 + $0x338] sm:$0xff] }
  0x32   :  { %v203_v52 = vpack.c.bf16 %v127_v45, %v125_v44 }
  0x3f   :  { %1042 = vmatmul.msk.bf16.gmra.mxu1 %vm292_vm2, %v159_v50  ;;  %1059 = vmatmul.msk.bf16.gmra.mxu3 %vm292_vm2, %v193_v55  ;;  %v116_v50 = vld [vmem:[%s2014_s0 + $0x2e0] sm:$0xff] }
  0x40   :  { %v198_v54 = vpack.c.bf16 %v118_v51, %v116_v50  ;;  %v137_v51 = vld [vmem:[%s2014_s0 + $0x388] sm:$0xff] }
  0x41   :  { %414 = vmatmul.bf16.gmra.mxu0 %v156_v56  ;;  %494 = vmatmul.bf16.gmra.mxu2 %v188_v57  ;;  %v61_v57 = vld [vmem:[%s2014_s0 + $0x128] sm:$0xff] }
  0x42   :  { %v171_v61 = vpack.c.bf16 %v63_v58, %v61_v57  ;;  %v66_v57 = vld [vmem:[%s2014_s0 + $0x150] sm:$0xff] }
  0x4f   :  { %1043 = vmatmul.msk.bf16.gmra.mxu1 %vm292_vm2, %v161_v62  ;;  %1060 = vmatmul.msk.bf16.gmra.mxu3 %vm292_vm2, %v195_v3  ;;  %v56_v62 = vld [vmem:[%s2014_s0 + $0x100] sm:$0xff]  ;;  %v122_v3 = vld [vmem:[%s2014_s0 + $0x310] sm:$0xff] }
  0x50   :  { %v168_v6 = vpack.c.bf16 %v58_v63, %v56_v62  ;;  %v200_v8 = vpack.c.bf16 %v122_v3, %v120_v2  ;;  %v130_v62 = vld [vmem:[%s2014_s0 + $0x350] sm:$0xff] }
  0x51   :  { %419 = vmatmul.bf16.gmra.mxu0 %v158_v4  ;;  %499 = vmatmul.bf16.gmra.mxu2 %v190_v5  ;;  %v205_v4 = vpack.c.bf16 %v131_v60, %v129_v59  ;;  %v1414_v5 = vld [vmem:[%s2015_s4] ss:$0 sm:$0xff] }
  0x5f   :  { %1044 = vmatmul.msk.bf16.gmra.mxu1 %vm292_vm2, %v163_v10  ;;  %1061 = vmatmul.msk.bf16.gmra.mxu3 %vm292_vm2, %v197_v15  ;;  %v1420_v10 = vld [vmem:[%s2016_s5] ss:$0 sm:$0xff] }
  0x61   :  { %424 = vmatmul.bf16.gmra.mxu0 %v160_v16  ;;  %504 = vmatmul.bf16.gmra.mxu2 %v192_v17 }
  0x6f   :  { %1045 = vmatmul.msk.bf16.gmra.mxu1 %vm292_vm2, %v165_v22  ;;  %1062 = vmatmul.msk.bf16.gmra.mxu3 %vm292_vm2, %v199_v27  ;;  %v135_v22 = vld [vmem:[%s2014_s0 + $0x378] sm:$0xff] }
  0x70   :  { %v207_v32 = vpack.c.bf16 %v135_v22, %v133_v21 }
  0x71   :  { %429 = vmatmul.bf16.gmra.mxu0 %v162_v28  ;;  %509 = vmatmul.bf16.gmra.mxu2 %v194_v29 }
  0x7f   :  { %1046 = vmatmul.msk.bf16.gmra.mxu1 %vm292_vm2, %v167_v34  ;;  %1063 = vmatmul.msk.bf16.gmra.mxu3 %vm292_vm2, %v201_v39 }
  0x81   :  { %434 = vmatmul.bf16.gmra.mxu0 %v164_v40  ;;  %514 = vmatmul.bf16.gmra.mxu2 %v196_v41 }
  0x8c   :  { %v574_v49 = vpop.f32.mrf.mxu1 }
  0x8f   :  { %1047 = vmatmul.msk.bf16.gmra.mxu1 %vm292_vm2, %v169_v46  ;;  %1064 = vmatmul.msk.bf16.gmra.mxu3 %vm292_vm2, %v203_v52  ;;  %v139_v52 = vld [vmem:[%s2014_s0 + $0x398] sm:$0xff] }
  0x90   :  { %v209_v63 = vpack.c.bf16 %v139_v52, %v137_v51 }
  0x91   :  { %439 = vmatmul.bf16.gmra.mxu0 %v166_v53  ;;  %519 = vmatmul.bf16.gmra.mxu2 %v198_v54 }
  0x92   :  { %v1383_v55 = vpop.f32.mrf.mxu3 }
  0x94   :  { %v576_v56 = vpop.f32.mrf.mxu1 }
  0x9a   :  { %v1403_v0 = vpop.f32.mrf.mxu3 }
  0x9c   :  { %v579_v1 = vpop.f32.mrf.mxu1 }
  0x9e   :  { %v405_v7 = vpop.f32.mrf.mxu0 }
  0x9f   :  { %1048 = vmatmul.msk.bf16.gmra.mxu1 %vm292_vm2, %v171_v61  ;;  %v575_v9 = vadd.f32 %v574_v49, %v405_v7  ;;  %1065 = vmatmul.msk.bf16.gmra.mxu3 %vm292_vm2, %v205_v4  ;;  %v71_v49 = vld [vmem:[%s2014_s0 + $0x178] sm:$0xff]  ;;  %v128_v61 = vld [vmem:[%s2014_s0 + $0x340] sm:$0xff] }
  0xa1   :  { %v738_v11 = vmul.f32 %v1414_v5, %v575_v9  ;;  %444 = vmatmul.bf16.gmra.mxu0 %v168_v6  ;;  %524 = vmatmul.bf16.gmra.mxu2 %v200_v8  ;;  %v204_v8 = vpack.c.bf16 %v130_v62, %v128_v61  ;;  %v77_v62 = vld [vmem:[%s2014_s0 + $0x1a8] sm:$0xff] }
  0xa2   :  { %v1424_v12 = vpop.f32.mrf.mxu3 }
  0xa3   :  { %v806_v13 = vadd.f32 %v1420_v10, %v738_v11 }
  0xa4   :  { %v581_v14 = vpop.f32.mrf.mxu1  ;;  %v1427_v16 = vpop.f32.mrf.mxu2 }
  0xa5   :  { %v870_v15 = vmax.f32 %v806_v13, 0.0 }
  0xa6   :  { %v407_v17 = vpop.f32.mrf.mxu0 }
  0xa7   :  { %935 = vst.msk [vmem:[%s2017_s6] sm:$0xff] %vm934_vm3, %v870_v15  ;;  %v577_v18 = vadd.f32 %v576_v56, %v407_v17  ;;  %v64_v56 = vld [vmem:[%s2014_s0 + $0x140] sm:$0xff] }
  0xa8   :  { %v172_v4 = vpack.c.bf16 %v66_v57, %v64_v56 }
  0xa9   :  { %v739_v23 = vmul.f32 %v1414_v5, %v577_v18 }
  0xaa   :  { %v1452_v27 = vpop.f32.mrf.mxu3 }
  0xab   :  { %v807_v28 = vadd.f32 %v1420_v10, %v739_v23 }
  0xac   :  { %v584_v29 = vpop.f32.mrf.mxu1  ;;  %v1461_v34 = vpop.f32.mrf.mxu2 }
  0xad   :  { %v871_v33 = vmax.f32 %v807_v28, 0.0  ;;  %v143_v28 = vld [vmem:[%s2014_s0 + $0x3b8] sm:$0xff] }
  0xae   :  { %v410_v36 = vpop.f32.mrf.mxu0 }
  0xaf   :  { %1049 = vmatmul.msk.bf16.gmra.mxu1 %vm292_vm2, %v173_v24  ;;  %936 = vst.msk [vmem:[%s2017_s6 + $0x8] sm:$0xff] %vm934_vm3, %v871_v33  ;;  %v580_v38 = vadd.f32 %v579_v1, %v410_v36  ;;  %1066 = vmatmul.msk.bf16.gmra.mxu3 %vm292_vm2, %v207_v32  ;;  %v73_v24 = vld [vmem:[%s2014_s0 + $0x188] sm:$0xff]  ;;  %v68_v32 = vld [vmem:[%s2014_s0 + $0x160] sm:$0xff]  ;;  %v70_v33 = vld [vmem:[%s2014_s0 + $0x170] sm:$0xff] }
  0xb0   :  { %v177_v31 = vpack.c.bf16 %v75_v25, %v73_v24 }
  0xb1   :  { %v740_v39 = vmul.f32 %v1414_v5, %v580_v38  ;;  %449 = vmatmul.bf16.gmra.mxu0 %v170_v35  ;;  %529 = vmatmul.bf16.gmra.mxu2 %v202_v37  ;;  %v132_v38 = vld [vmem:[%s2014_s0 + $0x360] sm:$0xff] }
  0xb2   :  { %v1470_v40 = vpop.f32.mrf.mxu3 }
  0xb3   :  { %v808_v41 = vadd.f32 %v1420_v10, %v740_v39  ;;  %v134_v39 = vld [vmem:[%s2014_s0 + $0x370] sm:$0xff] }
  0xb4   :  { %v586_v42 = vpop.f32.mrf.mxu1  ;;  %v490_v44 = vpop.f32.mrf.mxu2 }
  0xb5   :  { %v872_v43 = vmax.f32 %v808_v41, 0.0  ;;  %v660_v45 = vadd.f32 %v1383_v55, %v490_v44  ;;  %v175_v55 = vpack.c.bf16 %v71_v49, %v69_v48  ;;  %v206_v48 = vpack.c.bf16 %v134_v39, %v132_v38  ;;  %v81_v39 = vld [vmem:[%s2014_s0 + $0x1c8] sm:$0xff] }
  0xb6   :  { %v412_v46 = vpop.f32.mrf.mxu0 }
  0xb7   :  { %937 = vst.msk [vmem:[%s2017_s6 + $0x10] sm:$0xff] %vm934_vm3, %v872_v43  ;;  %v582_v47 = vadd.f32 %v581_v14, %v412_v46  ;;  %v772_v50 = vmul.f32 %v1414_v5, %v660_v45  ;;  %v174_v45 = vpack.c.bf16 %v70_v33, %v68_v32 }
  0xb9   :  { %v741_v53 = vmul.f32 %v1414_v5, %v582_v47  ;;  %v840_v54 = vadd.f32 %v1420_v10, %v772_v50 }
  0xba   :  { %v1499_v58 = vpop.f32.mrf.mxu3 }
  0xbb   :  { %v809_v59 = vadd.f32 %v1420_v10, %v741_v53  ;;  %v904_v1 = vmax.f32 %v840_v54, 0.0 }
  0xbc   :  { %v589_v60 = vpop.f32.mrf.mxu1  ;;  %v492_v3 = vpop.f32.mrf.mxu2 }
  0xbd   :  { %v873_v2 = vmax.f32 %v809_v59, 0.0  ;;  %969 = vst.msk [vmem:[%s2017_s6 + $0x110] sm:$0xff] %vm934_vm3, %v904_v1  ;;  %v662_v6 = vadd.f32 %v1403_v0, %v492_v3 }
  0xbe   :  { %v415_v7 = vpop.f32.mrf.mxu0 }
  0xbf   :  { %1050 = vmatmul.msk.bf16.gmra.mxu1 %vm292_vm2, %v175_v55  ;;  %938 = vst.msk [vmem:[%s2017_s6 + $0x18] sm:$0xff] %vm934_vm3, %v873_v2  ;;  %v585_v9 = vadd.f32 %v584_v29, %v415_v7  ;;  %1067 = vmatmul.msk.bf16.gmra.mxu3 %vm292_vm2, %v209_v63  ;;  %v773_v11 = vmul.f32 %v1414_v5, %v662_v6  ;;  %v79_v63 = vld [vmem:[%s2014_s0 + $0x1b8] sm:$0xff]  ;;  %v72_v7 = vld [vmem:[%s2014_s0 + $0x180] sm:$0xff] }
  0xc0   :  { %v147_v2 = vld [vmem:[%s2014_s0 + $0x3d8] sm:$0xff]  ;;  %v179_v6 = vpack.c.bf16 %v79_v63, %v77_v62 }
  0xc1   :  { %v742_v13 = vmul.f32 %v1414_v5, %v585_v9  ;;  %454 = vmatmul.bf16.gmra.mxu0 %v172_v4  ;;  %v841_v14 = vadd.f32 %v1420_v10, %v773_v11  ;;  %534 = vmatmul.bf16.gmra.mxu2 %v204_v8  ;;  %v74_v8 = vld [vmem:[%s2014_s0 + $0x190] sm:$0xff] }
  0xc2   :  { %v1522_v0 = vpop.f32.mrf.mxu3 }
  0xc3   :  { %v810_v15 = vadd.f32 %v1420_v10, %v742_v13  ;;  %v905_v18 = vmax.f32 %v841_v14, 0.0  ;;  %v136_v14 = vld [vmem:[%s2014_s0 + $0x380] sm:$0xff] }
  0xc4   :  { %v591_v17 = vpop.f32.mrf.mxu1  ;;  %v495_v20 = vpop.f32.mrf.mxu2 }
  0xc5   :  { %v874_v19 = vmax.f32 %v810_v15, 0.0  ;;  %970 = vst.msk [vmem:[%s2017_s6 + $0x118] sm:$0xff] %vm934_vm3, %v905_v18  ;;  %v665_v21 = vadd.f32 %v1424_v12, %v495_v20  ;;  %v141_v12 = vld [vmem:[%s2014_s0 + $0x3a8] sm:$0xff]  ;;  %v138_v15 = vld [vmem:[%s2014_s0 + $0x390] sm:$0xff] }
  0xc6   :  { %v417_v22 = vpop.f32.mrf.mxu0  ;;  %v211_v41 = vpack.c.bf16 %v143_v28, %v141_v12  ;;  %v208_v24 = vpack.c.bf16 %v138_v15, %v136_v14  ;;  %v85_v15 = vld [vmem:[%s2014_s0 + $0x1e8] sm:$0xff] }
  0xc7   :  { %939 = vst.msk [vmem:[%s2017_s6 + $0x20] sm:$0xff] %vm934_vm3, %v874_v19  ;;  %v587_v23 = vadd.f32 %v586_v42, %v417_v22  ;;  %v774_v26 = vmul.f32 %v1414_v5, %v665_v21  ;;  %v176_v21 = vpack.c.bf16 %v74_v8, %v72_v7 }
  0xc9   :  { %v743_v29 = vmul.f32 %v1414_v5, %v587_v23  ;;  %v842_v30 = vadd.f32 %v1420_v10, %v774_v26 }
  0xca   :  { %v1555_v35 = vpop.f32.mrf.mxu3 }
  0xcb   :  { %v811_v36 = vadd.f32 %v1420_v10, %v743_v29  ;;  %v906_v42 = vmax.f32 %v842_v30, 0.0 }
  0xcc   :  { %v594_v37 = vpop.f32.mrf.mxu1  ;;  %v497_v44 = vpop.f32.mrf.mxu2 }
  0xcd   :  { %v875_v43 = vmax.f32 %v811_v36, 0.0  ;;  %971 = vst.msk [vmem:[%s2017_s6 + $0x120] sm:$0xff] %vm934_vm3, %v906_v42  ;;  %v667_v46 = vadd.f32 %v1452_v27, %v497_v44 }
  0xce   :  { %v420_v47 = vpop.f32.mrf.mxu0 }
  0xcf   :  { %1051 = vmatmul.msk.bf16.gmra.mxu1 %vm292_vm2, %v177_v31  ;;  %940 = vst.msk [vmem:[%s2017_s6 + $0x28] sm:$0xff] %vm934_vm3, %v875_v43  ;;  %v590_v49 = vadd.f32 %v589_v60, %v420_v47  ;;  %1068 = vmatmul.msk.bf16.gmra.mxu3 %vm292_vm2, %v211_v41  ;;  %v775_v50 = vmul.f32 %v1414_v5, %v667_v46  ;;  %v83_v41 = vld [vmem:[%s2014_s0 + $0x1d8] sm:$0xff]  ;;  %v76_v47 = vld [vmem:[%s2014_s0 + $0x1a0] sm:$0xff] }
  0xd0   :  { %v151_v43 = vld [vmem:[%s2014_s0 + $0x3f8] sm:$0xff]  ;;  %v181_v46 = vpack.c.bf16 %v83_v41, %v81_v39 }
  0xd1   :  { %v744_v51 = vmul.f32 %v1414_v5, %v590_v49  ;;  %459 = vmatmul.bf16.gmra.mxu0 %v174_v45  ;;  %v843_v52 = vadd.f32 %v1420_v10, %v775_v50  ;;  %539 = vmatmul.bf16.gmra.mxu2 %v206_v48  ;;  %v78_v48 = vld [vmem:[%s2014_s0 + $0x1b0] sm:$0xff] }
  0xd2   :  { %v1578_v27 = vpop.f32.mrf.mxu3 }
  0xd3   :  { %v812_v53 = vadd.f32 %v1420_v10, %v744_v51  ;;  %v907_v55 = vmax.f32 %v843_v52, 0.0  ;;  %v140_v52 = vld [vmem:[%s2014_s0 + $0x3a0] sm:$0xff] }
  0xd4   :  { %v596_v54 = vpop.f32.mrf.mxu1  ;;  %v500_v57 = vpop.f32.mrf.mxu2 }
  0xd5   :  { %v876_v56 = vmax.f32 %v812_v53, 0.0  ;;  %972 = vst.msk [vmem:[%s2017_s6 + $0x128] sm:$0xff] %vm934_vm3, %v907_v55  ;;  %v670_v59 = vadd.f32 %v1470_v40, %v500_v57  ;;  %v145_v40 = vld [vmem:[%s2014_s0 + $0x3c8] sm:$0xff]  ;;  %v142_v53 = vld [vmem:[%s2014_s0 + $0x3b0] sm:$0xff] }
  0xd6   :  { %v422_v60 = vpop.f32.mrf.mxu0  ;;  %v210_v62 = vpack.c.bf16 %v142_v53, %v140_v52 }
  0xd7   :  { %941 = vst.msk [vmem:[%s2017_s6 + $0x30] sm:$0xff] %vm934_vm3, %v876_v56  ;;  %v592_v61 = vadd.f32 %v591_v17, %v422_v60  ;;  %v776_v1 = vmul.f32 %v1414_v5, %v670_v59  ;;  %v213_v17 = vpack.c.bf16 %v147_v2, %v145_v40  ;;  %v178_v59 = vpack.c.bf16 %v78_v48, %v76_v47  ;;  %v89_v48 = vld [vmem:[%s2014_s0 + $0x208] sm:$0xff] }
  0xd9   :  { %v745_v3 = vmul.f32 %v1414_v5, %v592_v61  ;;  %v844_v4 = vadd.f32 %v1420_v10, %v776_v1 }
  0xda   :  { %v1611_v9 = vpop.f32.mrf.mxu3 }
  0xdb   :  { %v813_v11 = vadd.f32 %v1420_v10, %v745_v3  ;;  %v908_v18 = vmax.f32 %v844_v4, 0.0 }
  0xdc   :  { %v599_v13 = vpop.f32.mrf.mxu1  ;;  %v502_v20 = vpop.f32.mrf.mxu2 }
  0xdd   :  { %v877_v19 = vmax.f32 %v813_v11, 0.0  ;;  %973 = vst.msk [vmem:[%s2017_s6 + $0x130] sm:$0xff] %vm934_vm3, %v908_v18  ;;  %v672_v22 = vadd.f32 %v1499_v58, %v502_v20 }
  0xde   :  { %v425_v23 = vpop.f32.mrf.mxu0 }
  0xdf   :  { %1052 = vmatmul.msk.bf16.gmra.mxu1 %vm292_vm2, %v179_v6  ;;  %942 = vst.msk [vmem:[%s2017_s6 + $0x38] sm:$0xff] %vm934_vm3, %v877_v19  ;;  %v595_v25 = vadd.f32 %v594_v37, %v425_v23  ;;  %1069 = vmatmul.msk.bf16.gmra.mxu3 %vm292_vm2, %v213_v17  ;;  %v777_v26 = vmul.f32 %v1414_v5, %v672_v22  ;;  %v87_v17 = vld [vmem:[%s2014_s0 + $0x1f8] sm:$0xff]  ;;  %v82_v22 = vld [vmem:[%s2014_s0 + $0x1d0] sm:$0xff] }
  0xe0   :  { %v183_v20 = vpack.c.bf16 %v87_v17, %v85_v15 }
  0xe1   :  { %v746_v12 = vmul.f32 %v1414_v5, %v595_v25  ;;  %464 = vmatmul.bf16.gmra.mxu0 %v176_v21  ;;  %v845_v28 = vadd.f32 %v1420_v10, %v777_v26  ;;  %544 = vmatmul.bf16.gmra.mxu2 %v208_v24  ;;  %v80_v21 = vld [vmem:[%s2014_s0 + $0x1c0] sm:$0xff]  ;;  %v146_v26 = vld [vmem:[%s2014_s0 + $0x3d0] sm:$0xff] }
  0xe2   :  { %v1634_v58 = vpop.f32.mrf.mxu3  ;;  %v144_v25 = vld [vmem:[%s2014_s0 + $0x3c0] sm:$0xff] }
  0xe3   :  { %v814_v29 = vadd.f32 %v1420_v10, %v746_v12  ;;  %v909_v31 = vmax.f32 %v845_v28, 0.0 }
  0xe4   :  { %v601_v30 = vpop.f32.mrf.mxu1  ;;  %v505_v33 = vpop.f32.mrf.mxu2 }
  0xe5   :  { %v878_v32 = vmax.f32 %v814_v29, 0.0  ;;  %974 = vst.msk [vmem:[%s2017_s6 + $0x138] sm:$0xff] %vm934_vm3, %v909_v31  ;;  %v675_v36 = vadd.f32 %v1522_v0, %v505_v33  ;;  %v149_v0 = vld [vmem:[%s2014_s0 + $0x3e8] sm:$0xff] }
  0xe6   :  { %v427_v37 = vpop.f32.mrf.mxu0 }
  0xe7   :  { %943 = vst.msk [vmem:[%s2017_s6 + $0x40] sm:$0xff] %vm934_vm3, %v878_v32  ;;  %v597_v38 = vadd.f32 %v596_v54, %v427_v37  ;;  %v778_v42 = vmul.f32 %v1414_v5, %v675_v36  ;;  %v215_v54 = vpack.c.bf16 %v151_v43, %v149_v0  ;;  %v212_v36 = vpack.c.bf16 %v146_v26, %v144_v25 }
  0xe9   :  { %v747_v44 = vmul.f32 %v1414_v5, %v597_v38  ;;  %v846_v45 = vadd.f32 %v1420_v10, %v778_v42 }
  0xea   :  { %v1667_v49 = vpop.f32.mrf.mxu3 }
  0xeb   :  { %v815_v50 = vadd.f32 %v1420_v10, %v747_v44  ;;  %v910_v55 = vmax.f32 %v846_v45, 0.0 }
  0xec   :  { %v604_v51 = vpop.f32.mrf.mxu1  ;;  %v507_v57 = vpop.f32.mrf.mxu2 }
  0xed   :  { %v879_v56 = vmax.f32 %v815_v50, 0.0  ;;  %975 = vst.msk [vmem:[%s2017_s6 + $0x140] sm:$0xff] %vm934_vm3, %v910_v55  ;;  %v677_v60 = vadd.f32 %v1555_v35, %v507_v57  ;;  %v91_v50 = vld [vmem:[%s2014_s0 + $0x218] sm:$0xff]  ;;  %v84_v55 = vld [vmem:[%s2014_s0 + $0x1e0] sm:$0xff] }
  0xee   :  { %v430_v61 = vpop.f32.mrf.mxu0 }
  0xef   :  { %1053 = vmatmul.msk.bf16.gmra.mxu1 %vm292_vm2, %v181_v46  ;;  %944 = vst.msk [vmem:[%s2017_s6 + $0x48] sm:$0xff] %vm934_vm3, %v879_v56  ;;  %v600_v63 = vadd.f32 %v599_v13, %v430_v61  ;;  %1070 = vmatmul.msk.bf16.gmra.mxu3 %vm292_vm2, %v215_v54  ;;  %v779_v1 = vmul.f32 %v1414_v5, %v677_v60  ;;  %v86_v56 = vld [vmem:[%s2014_s0 + $0x1f0] sm:$0xff]  ;;  %v148_v60 = vld [vmem:[%s2014_s0 + $0x3e0] sm:$0xff] }
  0xf0   :  { %v185_v54 = vpack.c.bf16 %v91_v50, %v89_v48  ;;  %v150_v61 = vld [vmem:[%s2014_s0 + $0x3f0] sm:$0xff] }
  0xf1   :  { %v748_v40 = vmul.f32 %v1414_v5, %v600_v63  ;;  %469 = vmatmul.bf16.gmra.mxu0 %v178_v59  ;;  %v847_v2 = vadd.f32 %v1420_v10, %v779_v1  ;;  %549 = vmatmul.bf16.gmra.mxu2 %v210_v62 }
  0xf2   :  { %v1691_v4 = vpop.f32.mrf.mxu3 }
  0xf3   :  { %v816_v35 = vadd.f32 %v1420_v10, %v748_v40  ;;  %v911_v6 = vmax.f32 %v847_v2, 0.0  ;;  %v182_v40 = vpack.c.bf16 %v86_v56, %v84_v55 }
  0xf4   :  { %v606_v3 = vpop.f32.mrf.mxu1  ;;  %v510_v8 = vpop.f32.mrf.mxu2 }
  0xf5   :  { %v880_v7 = vmax.f32 %v816_v35, 0.0  ;;  %976 = vst.msk [vmem:[%s2017_s6 + $0x148] sm:$0xff] %vm934_vm3, %v911_v6  ;;  %v680_v11 = vadd.f32 %v1578_v27, %v510_v8 }
  0xf6   :  { %v432_v13 = vpop.f32.mrf.mxu0 }
  0xf7   :  { %945 = vst.msk [vmem:[%s2017_s6 + $0x50] sm:$0xff] %vm934_vm3, %v880_v7  ;;  %v602_v14 = vadd.f32 %v601_v30, %v432_v13  ;;  %v780_v18 = vmul.f32 %v1414_v5, %v680_v11  ;;  %v180_v30 = vpack.c.bf16 %v82_v22, %v80_v21 }
  0xf9   :  { %v749_v19 = vmul.f32 %v1414_v5, %v602_v14  ;;  %v848_v27 = vadd.f32 %v1420_v10, %v780_v18 }
  0xfa   :  { %v1724_v31 = vpop.f32.mrf.mxu3 }
  0xfb   :  { %v817_v23 = vadd.f32 %v1420_v10, %v749_v19  ;;  %v912_v12 = vmax.f32 %v848_v27, 0.0 }
  0xfc   :  { %v609_v24 = vpop.f32.mrf.mxu1  ;;  %v512_v29 = vpop.f32.mrf.mxu2 }
  0xfd   :  { %v881_v28 = vmax.f32 %v817_v23, 0.0  ;;  %977 = vst.msk [vmem:[%s2017_s6 + $0x150] sm:$0xff] %vm934_vm3, %v912_v12  ;;  %v682_v32 = vadd.f32 %v1611_v9, %v512_v29 }
  0xfe   :  { %v435_v33 = vpop.f32.mrf.mxu0 }
  0xff   :  { %1054 = vmatmul.msk.bf16.gmra.mxu1 %vm292_vm2, %v183_v20  ;;  %946 = vst.msk [vmem:[%s2017_s6 + $0x58] sm:$0xff] %vm934_vm3, %v881_v28  ;;  %v605_v37 = vadd.f32 %v604_v51, %v435_v33  ;;  %v781_v38 = vmul.f32 %v1414_v5, %v682_v32 }
 0x101   :  { %v750_v39 = vmul.f32 %v1414_v5, %v605_v37  ;;  %474 = vmatmul.bf16.gmra.mxu0 %v180_v30  ;;  %v849_v41 = vadd.f32 %v1420_v10, %v781_v38  ;;  %554 = vmatmul.bf16.gmra.mxu2 %v212_v36 }
 0x102   :  { %v694_v51 = vpop.f32.mrf.mxu3 }
 0x103   :  { %v818_v9 = vadd.f32 %v1420_v10, %v750_v39  ;;  %v913_v0 = vmax.f32 %v849_v41, 0.0 }
 0x104   :  { %v611_v42 = vpop.f32.mrf.mxu1  ;;  %v515_v44 = vpop.f32.mrf.mxu2 }
 0x105   :  { %v882_v43 = vmax.f32 %v818_v9, 0.0  ;;  %978 = vst.msk [vmem:[%s2017_s6 + $0x158] sm:$0xff] %vm934_vm3, %v913_v0  ;;  %v685_v45 = vadd.f32 %v1634_v58, %v515_v44 }
 0x106   :  { %v437_v46 = vpop.f32.mrf.mxu0 }
 0x107   :  { %947 = vst.msk [vmem:[%s2017_s6 + $0x60] sm:$0xff] %vm934_vm3, %v882_v43  ;;  %v607_v47 = vadd.f32 %v606_v3, %v437_v46  ;;  %v782_v52 = vmul.f32 %v1414_v5, %v685_v45  ;;  %v214_v3 = vpack.c.bf16 %v150_v61, %v148_v60 }
 0x109   :  { %v751_v58 = vmul.f32 %v1414_v5, %v607_v47  ;;  %v850_v53 = vadd.f32 %v1420_v10, %v782_v52 }
 0x10a   :  { %v696_v11 = vpop.f32.mrf.mxu3 }
 0x10b   :  { %v819_v57 = vadd.f32 %v1420_v10, %v751_v58  ;;  %v914_v62 = vmax.f32 %v850_v53, 0.0 }
 0x10c   :  { %v614_v59 = vpop.f32.mrf.mxu1  ;;  %v517_v1 = vpop.f32.mrf.mxu2 }
 0x10d   :  { %v883_v63 = vmax.f32 %v819_v57, 0.0  ;;  %979 = vst.msk [vmem:[%s2017_s6 + $0x160] sm:$0xff] %vm934_vm3, %v914_v62  ;;  %v687_v2 = vadd.f32 %v1667_v49, %v517_v1 }
 0x10e   :  { %v440_v35 = vpop.f32.mrf.mxu0 }
 0x10f   :  { %1055 = vmatmul.msk.bf16.gmra.mxu1 %vm292_vm2, %v185_v54  ;;  %948 = vst.msk [vmem:[%s2017_s6 + $0x68] sm:$0xff] %vm934_vm3, %v883_v63  ;;  %v610_v6 = vadd.f32 %v609_v24, %v440_v35  ;;  %v783_v7 = vmul.f32 %v1414_v5, %v687_v2 }
 0x111   :  { %v752_v8 = vmul.f32 %v1414_v5, %v610_v6  ;;  %479 = vmatmul.bf16.gmra.mxu0 %v182_v40  ;;  %v851_v13 = vadd.f32 %v1420_v10, %v783_v7  ;;  %559 = vmatmul.bf16.gmra.mxu2 %v214_v3 }
 0x112   :  { %v699_v26 = vpop.f32.mrf.mxu3 }
 0x113   :  { %v820_v49 = vadd.f32 %v1420_v10, %v752_v8  ;;  %v915_v15 = vmax.f32 %v851_v13, 0.0 }
 0x114   :  { %v616_v14 = vpop.f32.mrf.mxu1  ;;  %v520_v18 = vpop.f32.mrf.mxu2 }
 0x115   :  { %v884_v17 = vmax.f32 %v820_v49, 0.0  ;;  %980 = vst.msk [vmem:[%s2017_s6 + $0x168] sm:$0xff] %vm934_vm3, %v915_v15  ;;  %v690_v19 = vadd.f32 %v1691_v4, %v520_v18 }
 0x116   :  { %v442_v27 = vpop.f32.mrf.mxu0 }
 0x117   :  { %949 = vst.msk [vmem:[%s2017_s6 + $0x70] sm:$0xff] %vm934_vm3, %v884_v17  ;;  %v612_v20 = vadd.f32 %v611_v42, %v442_v27  ;;  %v784_v21 = vmul.f32 %v1414_v5, %v690_v19 }
 0x119   :  { %v753_v22 = vmul.f32 %v1414_v5, %v612_v20  ;;  %v852_v23 = vadd.f32 %v1420_v10, %v784_v21 }
 0x11b   :  { %v821_v24 = vadd.f32 %v1420_v10, %v753_v22  ;;  %v916_v12 = vmax.f32 %v852_v23, 0.0 }
 0x11c   :  { %v619_v25 = vpop.f32.mrf.mxu1  ;;  %v522_v4 = vpop.f32.mrf.mxu2 }
 0x11d   :  { %v885_v28 = vmax.f32 %v821_v24, 0.0  ;;  %981 = vst.msk [vmem:[%s2017_s6 + $0x170] sm:$0xff] %vm934_vm3, %v916_v12  ;;  %v692_v29 = vadd.f32 %v1724_v31, %v522_v4  ;;  %v701_v31 = vpop.f32.mrf.mxu3 }
 0x11e   :  { %v445_v30 = vpop.f32.mrf.mxu0 }
 0x11f   :  { %950 = vst.msk [vmem:[%s2017_s6 + $0x78] sm:$0xff] %vm934_vm3, %v885_v28  ;;  %v615_v32 = vadd.f32 %v614_v59, %v445_v30  ;;  %v785_v33 = vmul.f32 %v1414_v5, %v692_v29 }
 0x121   :  { %v754_v36 = vmul.f32 %v1414_v5, %v615_v32  ;;  %v853_v37 = vadd.f32 %v1420_v10, %v785_v33 }
 0x123   :  { %v822_v38 = vadd.f32 %v1420_v10, %v754_v36  ;;  %v917_v41 = vmax.f32 %v853_v37, 0.0 }
 0x124   :  { %v621_v39 = vpop.f32.mrf.mxu1  ;;  %v525_v42 = vpop.f32.mrf.mxu2 }
 0x125   :  { %v886_v9 = vmax.f32 %v822_v38, 0.0  ;;  %982 = vst.msk [vmem:[%s2017_s6 + $0x178] sm:$0xff] %vm934_vm3, %v917_v41  ;;  %v695_v0 = vadd.f32 %v694_v51, %v525_v42  ;;  %v704_v56 = vpop.f32.mrf.mxu3 }
 0x126   :  { %v447_v43 = vpop.f32.mrf.mxu0 }
 0x127   :  { %951 = vst.msk [vmem:[%s2017_s6 + $0x80] sm:$0xff] %vm934_vm3, %v886_v9  ;;  %v617_v44 = vadd.f32 %v616_v14, %v447_v43  ;;  %v786_v45 = vmul.f32 %v1414_v5, %v695_v0 }
 0x129   :  { %v755_v46 = vmul.f32 %v1414_v5, %v617_v44  ;;  %v854_v47 = vadd.f32 %v1420_v10, %v786_v45 }
 0x12b   :  { %v823_v48 = vadd.f32 %v1420_v10, %v755_v46  ;;  %v918_v52 = vmax.f32 %v854_v47, 0.0 }
 0x12c   :  { %v624_v50 = vpop.f32.mrf.mxu1  ;;  %v527_v53 = vpop.f32.mrf.mxu2 }
 0x12d   :  { %v887_v58 = vmax.f32 %v823_v48, 0.0  ;;  %983 = vst.msk [vmem:[%s2017_s6 + $0x180] sm:$0xff] %vm934_vm3, %v918_v52  ;;  %v697_v51 = vadd.f32 %v696_v11, %v527_v53  ;;  %v706_v8 = vpop.f32.mrf.mxu3 }
 0x12e   :  { %v450_v54 = vpop.f32.mrf.mxu0 }
 0x12f   :  { %952 = vst.msk [vmem:[%s2017_s6 + $0x88] sm:$0xff] %vm934_vm3, %v887_v58  ;;  %v620_v55 = vadd.f32 %v619_v25, %v450_v54  ;;  %v787_v57 = vmul.f32 %v1414_v5, %v697_v51 }
 0x131   :  { %v756_v59 = vmul.f32 %v1414_v5, %v620_v55  ;;  %v855_v60 = vadd.f32 %v1420_v10, %v787_v57 }
 0x133   :  { %v824_v61 = vadd.f32 %v1420_v10, %v756_v59  ;;  %v919_v63 = vmax.f32 %v855_v60, 0.0 }
 0x134   :  { %v626_v62 = vpop.f32.mrf.mxu1  ;;  %v530_v40 = vpop.f32.mrf.mxu2 }
 0x135   :  { %v888_v1 = vmax.f32 %v824_v61, 0.0  ;;  %984 = vst.msk [vmem:[%s2017_s6 + $0x188] sm:$0xff] %vm934_vm3, %v919_v63  ;;  %v700_v2 = vadd.f32 %v699_v26, %v530_v40  ;;  %v709_v25 = vpop.f32.mrf.mxu3 }
 0x136   :  { %v452_v35 = vpop.f32.mrf.mxu0 }
 0x137   :  { %953 = vst.msk [vmem:[%s2017_s6 + $0x90] sm:$0xff] %vm934_vm3, %v888_v1  ;;  %v622_v3 = vadd.f32 %v621_v39, %v452_v35  ;;  %v788_v6 = vmul.f32 %v1414_v5, %v700_v2 }
 0x139   :  { %v757_v7 = vmul.f32 %v1414_v5, %v622_v3  ;;  %v856_v11 = vadd.f32 %v1420_v10, %v788_v6 }
 0x13b   :  { %v825_v13 = vadd.f32 %v1420_v10, %v757_v7  ;;  %v920_v14 = vmax.f32 %v856_v11, 0.0 }
 0x13c   :  { %v629_v49 = vpop.f32.mrf.mxu1  ;;  %v532_v17 = vpop.f32.mrf.mxu2 }
 0x13d   :  { %v889_v15 = vmax.f32 %v825_v13, 0.0  ;;  %985 = vst.msk [vmem:[%s2017_s6 + $0x190] sm:$0xff] %vm934_vm3, %v920_v14  ;;  %v702_v18 = vadd.f32 %v701_v31, %v532_v17  ;;  %v711_v42 = vpop.f32.mrf.mxu3 }
 0x13e   :  { %v455_v19 = vpop.f32.mrf.mxu0 }
 0x13f   :  { %954 = vst.msk [vmem:[%s2017_s6 + $0x98] sm:$0xff] %vm934_vm3, %v889_v15  ;;  %v625_v27 = vadd.f32 %v624_v50, %v455_v19  ;;  %v789_v20 = vmul.f32 %v1414_v5, %v702_v18 }
 0x141   :  { %v758_v21 = vmul.f32 %v1414_v5, %v625_v27  ;;  %v857_v22 = vadd.f32 %v1420_v10, %v789_v20 }
 0x143   :  { %v826_v23 = vadd.f32 %v1420_v10, %v758_v21  ;;  %v921_v26 = vmax.f32 %v857_v22, 0.0 }
 0x144   :  { %v631_v24 = vpop.f32.mrf.mxu1  ;;  %v535_v28 = vpop.f32.mrf.mxu2 }
 0x145   :  { %v890_v12 = vmax.f32 %v826_v23, 0.0  ;;  %986 = vst.msk [vmem:[%s2017_s6 + $0x198] sm:$0xff] %vm934_vm3, %v921_v26  ;;  %v705_v4 = vadd.f32 %v704_v56, %v535_v28  ;;  %v714_v55 = vpop.f32.mrf.mxu3 }
 0x146   :  { %v457_v29 = vpop.f32.mrf.mxu0 }
 0x147   :  { %955 = vst.msk [vmem:[%s2017_s6 + $0xa0] sm:$0xff] %vm934_vm3, %v890_v12  ;;  %v627_v30 = vadd.f32 %v626_v62, %v457_v29  ;;  %v790_v32 = vmul.f32 %v1414_v5, %v705_v4 }
 0x149   :  { %v759_v33 = vmul.f32 %v1414_v5, %v627_v30  ;;  %v858_v36 = vadd.f32 %v1420_v10, %v790_v32 }
 0x14b   :  { %v827_v37 = vadd.f32 %v1420_v10, %v759_v33  ;;  %v922_v39 = vmax.f32 %v858_v36, 0.0 }
 0x14c   :  { %v634_v38 = vpop.f32.mrf.mxu1  ;;  %v537_v9 = vpop.f32.mrf.mxu2 }
 0x14d   :  { %v891_v41 = vmax.f32 %v827_v37, 0.0  ;;  %987 = vst.msk [vmem:[%s2017_s6 + $0x1a0] sm:$0xff] %vm934_vm3, %v922_v39  ;;  %v707_v31 = vadd.f32 %v706_v8, %v537_v9  ;;  %v716_v7 = vpop.f32.mrf.mxu3 }
 0x14e   :  { %v460_v0 = vpop.f32.mrf.mxu0 }
 0x14f   :  { %956 = vst.msk [vmem:[%s2017_s6 + $0xa8] sm:$0xff] %vm934_vm3, %v891_v41  ;;  %v630_v43 = vadd.f32 %v629_v49, %v460_v0  ;;  %v791_v44 = vmul.f32 %v1414_v5, %v707_v31 }
 0x151   :  { %v760_v45 = vmul.f32 %v1414_v5, %v630_v43  ;;  %v859_v46 = vadd.f32 %v1420_v10, %v791_v44 }
 0x153   :  { %v828_v47 = vadd.f32 %v1420_v10, %v760_v45  ;;  %v923_v50 = vmax.f32 %v859_v46, 0.0 }
 0x154   :  { %v636_v48 = vpop.f32.mrf.mxu1  ;;  %v540_v58 = vpop.f32.mrf.mxu2 }
 0x155   :  { %v892_v52 = vmax.f32 %v828_v47, 0.0  ;;  %988 = vst.msk [vmem:[%s2017_s6 + $0x1a8] sm:$0xff] %vm934_vm3, %v923_v50  ;;  %v710_v53 = vadd.f32 %v709_v25, %v540_v58 }
 0x156   :  { %v462_v51 = vpop.f32.mrf.mxu0 }
 0x157   :  { %957 = vst.msk [vmem:[%s2017_s6 + $0xb0] sm:$0xff] %vm934_vm3, %v892_v52  ;;  %v632_v54 = vadd.f32 %v631_v24, %v462_v51  ;;  %v792_v56 = vmul.f32 %v1414_v5, %v710_v53  ;;  %v719_v24 = vpop.f32.mrf.mxu3 }
 0x159   :  { %v761_v57 = vmul.f32 %v1414_v5, %v632_v54  ;;  %v860_v59 = vadd.f32 %v1420_v10, %v792_v56 }
 0x15b   :  { %v829_v60 = vadd.f32 %v1420_v10, %v761_v57  ;;  %v924_v62 = vmax.f32 %v860_v59, 0.0 }
 0x15c   :  { %v639_v61 = vpop.f32.mrf.mxu1  ;;  %v542_v1 = vpop.f32.mrf.mxu2 }
 0x15d   :  { %v893_v63 = vmax.f32 %v829_v60, 0.0  ;;  %989 = vst.msk [vmem:[%s2017_s6 + $0x1b0] sm:$0xff] %vm934_vm3, %v924_v62  ;;  %v712_v40 = vadd.f32 %v711_v42, %v542_v1 }
 0x15e   :  { %v465_v2 = vpop.f32.mrf.mxu0 }
 0x15f   :  { %958 = vst.msk [vmem:[%s2017_s6 + $0xb8] sm:$0xff] %vm934_vm3, %v893_v63  ;;  %v635_v35 = vadd.f32 %v634_v38, %v465_v2  ;;  %v793_v3 = vmul.f32 %v1414_v5, %v712_v40  ;;  %v721_v9 = vpop.f32.mrf.mxu3 }
 0x161   :  { %v762_v6 = vmul.f32 %v1414_v5, %v635_v35  ;;  %v861_v8 = vadd.f32 %v1420_v10, %v793_v3 }
 0x163   :  { %v830_v11 = vadd.f32 %v1420_v10, %v762_v6  ;;  %v925_v49 = vmax.f32 %v861_v8, 0.0 }
 0x164   :  { %v641_v13 = vpop.f32.mrf.mxu1  ;;  %v545_v15 = vpop.f32.mrf.mxu2 }
 0x165   :  { %v894_v14 = vmax.f32 %v830_v11, 0.0  ;;  %990 = vst.msk [vmem:[%s2017_s6 + $0x1b8] sm:$0xff] %vm934_vm3, %v925_v49  ;;  %v715_v17 = vadd.f32 %v714_v55, %v545_v15 }
 0x166   :  { %v467_v18 = vpop.f32.mrf.mxu0 }
 0x167   :  { %959 = vst.msk [vmem:[%s2017_s6 + $0xc0] sm:$0xff] %vm934_vm3, %v894_v14  ;;  %v637_v19 = vadd.f32 %v636_v48, %v467_v18  ;;  %v794_v27 = vmul.f32 %v1414_v5, %v715_v17  ;;  %v724_v51 = vpop.f32.mrf.mxu3  ;;  %v1093_v17 = vld [vmem:[%s2015_s4] ss:$0 sm:$0xff] }
 0x169   :  { %v763_v20 = vmul.f32 %v1414_v5, %v637_v19  ;;  %v862_v21 = vadd.f32 %v1420_v10, %v794_v27 }
 0x16b   :  { %v831_v22 = vadd.f32 %v1420_v10, %v763_v20  ;;  %v926_v25 = vmax.f32 %v862_v21, 0.0 }
 0x16c   :  { %v644_v23 = vpop.f32.mrf.mxu1  ;;  %v547_v12 = vpop.f32.mrf.mxu2 }
 0x16d   :  { %v895_v26 = vmax.f32 %v831_v22, 0.0  ;;  %991 = vst.msk [vmem:[%s2017_s6 + $0x1c0] sm:$0xff] %vm934_vm3, %v926_v25  ;;  %v717_v28 = vadd.f32 %v716_v7, %v547_v12 }
 0x16e   :  { %v470_v4 = vpop.f32.mrf.mxu0 }
 0x16f   :  { %960 = vst.msk [vmem:[%s2017_s6 + $0xc8] sm:$0xff] %vm934_vm3, %v895_v26  ;;  %v640_v29 = vadd.f32 %v639_v61, %v470_v4  ;;  %v795_v30 = vmul.f32 %v1414_v5, %v717_v28  ;;  %v726_v3 = vpop.f32.mrf.mxu3 }
 0x171   :  { %v764_v32 = vmul.f32 %v1414_v5, %v640_v29  ;;  %v863_v33 = vadd.f32 %v1420_v10, %v795_v30 }
 0x173   :  { %v832_v36 = vadd.f32 %v1420_v10, %v764_v32  ;;  %v927_v38 = vmax.f32 %v863_v33, 0.0 }
 0x174   :  { %v646_v37 = vpop.f32.mrf.mxu1  ;;  %v550_v41 = vpop.f32.mrf.mxu2 }
 0x175   :  { %v896_v39 = vmax.f32 %v832_v36, 0.0  ;;  %992 = vst.msk [vmem:[%s2017_s6 + $0x1c8] sm:$0xff] %vm934_vm3, %v927_v38  ;;  %v720_v42 = vadd.f32 %v719_v24, %v550_v41 }
 0x176   :  { %v472_v31 = vpop.f32.mrf.mxu0 }
 0x177   :  { %961 = vst.msk [vmem:[%s2017_s6 + $0xd0] sm:$0xff] %vm934_vm3, %v896_v39  ;;  %v642_v0 = vadd.f32 %v641_v13, %v472_v31  ;;  %v796_v43 = vmul.f32 %v1414_v5, %v720_v42  ;;  %v729_v24 = vpop.f32.mrf.mxu3 }
 0x179   :  { %v765_v44 = vmul.f32 %v1414_v5, %v642_v0  ;;  %v864_v45 = vadd.f32 %v1420_v10, %v796_v43 }
 0x17b   :  { %v833_v46 = vadd.f32 %v1420_v10, %v765_v44  ;;  %v928_v48 = vmax.f32 %v864_v45, 0.0 }
 0x17c   :  { %v649_v47 = vpop.f32.mrf.mxu1  ;;  %v552_v52 = vpop.f32.mrf.mxu2 }
 0x17d   :  { %v897_v50 = vmax.f32 %v833_v46, 0.0  ;;  %993 = vst.msk [vmem:[%s2017_s6 + $0x1d0] sm:$0xff] %vm934_vm3, %v928_v48  ;;  %v722_v58 = vadd.f32 %v721_v9, %v552_v52 }
 0x17e   :  { %v475_v53 = vpop.f32.mrf.mxu0 }
 0x17f   :  { %962 = vst.msk [vmem:[%s2017_s6 + $0xd8] sm:$0xff] %vm934_vm3, %v897_v50  ;;  %v645_v54 = vadd.f32 %v644_v23, %v475_v53  ;;  %v797_v55 = vmul.f32 %v1414_v5, %v722_v58  ;;  %v731_v31 = vpop.f32.mrf.mxu3 }
 0x181   :  { %v766_v56 = vmul.f32 %v1414_v5, %v645_v54  ;;  %v865_v57 = vadd.f32 %v1420_v10, %v797_v55 }
 0x183   :  { %v834_v59 = vadd.f32 %v1420_v10, %v766_v56  ;;  %v929_v61 = vmax.f32 %v865_v57, 0.0 }
 0x184   :  { %v651_v60 = vpop.f32.mrf.mxu1  ;;  %v555_v63 = vpop.f32.mrf.mxu2 }
 0x185   :  { %v898_v62 = vmax.f32 %v834_v59, 0.0  ;;  %994 = vst.msk [vmem:[%s2017_s6 + $0x1d8] sm:$0xff] %vm934_vm3, %v929_v61  ;;  %v725_v1 = vadd.f32 %v724_v51, %v555_v63 }
 0x186   :  { %v477_v40 = vpop.f32.mrf.mxu0 }
 0x187   :  { %963 = vst.msk [vmem:[%s2017_s6 + $0xe0] sm:$0xff] %vm934_vm3, %v898_v62  ;;  %v647_v2 = vadd.f32 %v646_v37, %v477_v40  ;;  %v798_v35 = vmul.f32 %v1414_v5, %v725_v1 }
 0x189   :  { %v767_v6 = vmul.f32 %v1414_v5, %v647_v2  ;;  %v866_v7 = vadd.f32 %v1420_v10, %v798_v35 }
 0x18b   :  { %v835_v8 = vadd.f32 %v1420_v10, %v767_v6  ;;  %v930_v13 = vmax.f32 %v866_v7, 0.0 }
 0x18c   :  { %v654_v11 = vpop.f32.mrf.mxu1  ;;  %v557_v15 = vpop.f32.mrf.mxu2 }
 0x18d   :  { %v655_v49 = vadd.f32 %v654_v11, %v1427_v16  ;;  %v899_v14 = vmax.f32 %v835_v8, 0.0  ;;  %995 = vst.msk [vmem:[%s2017_s6 + $0x1e0] sm:$0xff] %vm934_vm3, %v930_v13  ;;  %v727_v18 = vadd.f32 %v726_v3, %v557_v15  ;;  %v1094_v16 = vld [vmem:[%s2016_s5] ss:$0 sm:$0xff] }
 0x18e   :  { %v480_v19 = vpop.f32.mrf.mxu0 }
 0x18f   :  { %v770_v5 = vmul.f32 %v1093_v17, %v655_v49  ;;  %964 = vst.msk [vmem:[%s2017_s6 + $0xe8] sm:$0xff] %vm934_vm3, %v899_v14  ;;  %v650_v10 = vadd.f32 %v649_v47, %v480_v19  ;;  %v799_v20 = vmul.f32 %v1093_v17, %v727_v18 }
 0x191   :  { %v838_v27 = vadd.f32 %v1094_v16, %v770_v5  ;;  %v768_v21 = vmul.f32 %v1093_v17, %v650_v10  ;;  %v867_v23 = vadd.f32 %v1094_v16, %v799_v20 }
 0x193   :  { %v902_v22 = vmax.f32 %v838_v27, 0.0  ;;  %v836_v25 = vadd.f32 %v1094_v16, %v768_v21  ;;  %v931_v12 = vmax.f32 %v867_v23, 0.0 }
 0x194   :  { %v656_v26 = vpop.f32.mrf.mxu1  ;;  %v560_v29 = vpop.f32.mrf.mxu2 }
 0x195   :  { %967 = vst.msk [vmem:[%s2017_s6 + $0x100] sm:$0xff] %vm934_vm3, %v902_v22  ;;  %v657_v28 = vadd.f32 %v656_v26, %v1461_v34  ;;  %v900_v4 = vmax.f32 %v836_v25, 0.0  ;;  %v730_v32 = vadd.f32 %v729_v24, %v560_v29 }
 0x196   :  { %996 = vst.msk [vmem:[%s2017_s6 + $0x1e8] sm:$0xff] %vm934_vm3, %v931_v12  ;;  %v482_v33 = vpop.f32.mrf.mxu0 }
 0x197   :  { %v771_v30 = vmul.f32 %v1093_v17, %v657_v28  ;;  %965 = vst.msk [vmem:[%s2017_s6 + $0xf0] sm:$0xff] %vm934_vm3, %v900_v4  ;;  %v652_v36 = vadd.f32 %v651_v60, %v482_v33  ;;  %v800_v38 = vmul.f32 %v1093_v17, %v730_v32 }
 0x199   :  { %v839_v37 = vadd.f32 %v1094_v16, %v771_v30  ;;  %v769_v39 = vmul.f32 %v1093_v17, %v652_v36  ;;  %v868_v41 = vadd.f32 %v1094_v16, %v800_v38 }
 0x19b   :  { %v903_v34 = vmax.f32 %v839_v37, 0.0  ;;  %v837_v9 = vadd.f32 %v1094_v16, %v769_v39  ;;  %v932_v42 = vmax.f32 %v868_v41, 0.0 }
 0x19c   :  { %v562_v43 = vpop.f32.mrf.mxu2 }
 0x19d   :  { %968 = vst.msk [vmem:[%s2017_s6 + $0x108] sm:$0xff] %vm934_vm3, %v903_v34  ;;  %v901_v0 = vmax.f32 %v837_v9, 0.0  ;;  %v732_v44 = vadd.f32 %v731_v31, %v562_v43 }
 0x19e   :  { %997 = vst.msk [vmem:[%s2017_s6 + $0x1f0] sm:$0xff] %vm934_vm3, %v932_v42 }
 0x19f   :  { %966 = vst.msk [vmem:[%s2017_s6 + $0xf8] sm:$0xff] %vm934_vm3, %v901_v0  ;;  %v801_v45 = vmul.f32 %v1093_v17, %v732_v44 }
 0x1a1   :  { %v869_v46 = vadd.f32 %v1094_v16, %v801_v45 }
 0x1a3   :  { %v933_v47 = vmax.f32 %v869_v46, 0.0 }
 0x1a5   :  { %998 = vst.msk [vmem:[%s2017_s6 + $0x1f8] sm:$0xff] %vm934_vm3, %v933_v47 }

// kernel: deep_cnn300_forward.16
= control target key start
LH: loop header
LB: loop body
LE: loop exit
PB: predicated region body
PF: predicated region fallthrough
CT: control target
= control target key end

     0   :  { %vm141_vm0 = vcmask 1043456   ;;  %vm116_vm1 = vcmask 195584   ;;  %s538_s3 = inlined_call_operand.vmem [shape: bf16[24,24], index: 3, kind: input, shape index: {}]   ;;  %s539_s0 = inlined_call_operand.vmem [shape: f32[128,24], index: 0, kind: input, shape index: {}]   ;;  %s540_s1 = inlined_call_operand.vmem [shape: f32[1,24], index: 1, kind: input, shape index: {}]   ;;  %s541_s2 = inlined_call_operand.vmem [shape: f32[1,24], index: 2, kind: input, shape index: {}]   ;;  %s542_s4 = inlined_call_operand.vmem [shape: f32[1,24], index: 4, kind: input, shape index: {}]   ;;  %s543_s5 = inlined_call_operand.vmem [shape: f32[1,24], index: 5, kind: input, shape index: {}]   ;;  %s544_s6 = inlined_call_operand.vmem [shape: f32[128,24], index: 6, kind: output, shape index: {}]  }
   0x1   :  { %v106_v0 = vld [vmem:[%s538_s3 + $0x8] sm:$0xf]  ;;  %v24_v1 = vld [vmem:[%s539_s0] sm:$0xff]  ;;  %v26_v37 = vld [vmem:[%s539_s0 + $0x10] sm:$0xff] }
   0x2   :  { %v112_v2 = vunpack.c.l.b16 %v106_v0  ;;  %v25_v3 = vld [vmem:[%s539_s0 + $0x8] sm:$0xff]  ;;  %v340_v4 = vld [vmem:[%s540_s1] ss:$0 sm:$0xff]  ;;  %v27_v41 = vld [vmem:[%s539_s0 + $0x18] sm:$0xff] }
   0x3   :  { %v345_v5 = vld [vmem:[%s541_s2] ss:$0 sm:$0xff]  ;;  %v44_v8 = vmul.f32 %v340_v4, %v24_v1  ;;  %v45_v9 = vmul.f32 %v340_v4, %v25_v3  ;;  %v29_v10 = vld [vmem:[%s539_s0 + $0x28] sm:$0xff]  ;;  %v30_v42 = vld [vmem:[%s539_s0 + $0x30] sm:$0xff]  ;;  %v46_v48 = vmul.f32 %v340_v4, %v26_v37  ;;  %v47_v49 = vmul.f32 %v340_v4, %v27_v41 }
   0x4   :  { %v28_v6 = vld [vmem:[%s539_s0 + $0x20] sm:$0xff]  ;;  %v114_v7 = vpack.c.b16 %v112_v2, %v112_v2  ;;  %v33_v13 = vld [vmem:[%s539_s0 + $0x48] sm:$0xff]  ;;  %v49_v14 = vmul.f32 %v340_v4, %v29_v10  ;;  %v31_v43 = vld [vmem:[%s539_s0 + $0x38] sm:$0xff]  ;;  %v50_v50 = vmul.f32 %v340_v4, %v30_v42 }
   0x5   :  { %v48_v11 = vmul.f32 %v340_v4, %v28_v6  ;;  %v32_v12 = vld [vmem:[%s539_s0 + $0x40] sm:$0xff]  ;;  %v53_v16 = vmul.f32 %v340_v4, %v33_v13  ;;  %v64_v19 = vadd.f32 %v345_v5, %v44_v8  ;;  %v65_v20 = vadd.f32 %v345_v5, %v45_v9  ;;  %v37_v22 = vld [vmem:[%s539_s0 + $0x68] sm:$0xff]  ;;  %v34_v45 = vld [vmem:[%s539_s0 + $0x50] sm:$0xff] }
   0x6   :  { %v52_v15 = vmul.f32 %v340_v4, %v32_v12  ;;  %v36_v17 = vld [vmem:[%s539_s0 + $0x60] sm:$0xff]  ;;  %v143_v18 = vsel %vm141_vm0, %v114_v7, 0  ;;  %v69_v24 = vadd.f32 %v345_v5, %v49_v14  ;;  %v57_v34 = vmul.f32 %v340_v4, %v37_v22  ;;  %v35_v46 = vld [vmem:[%s539_s0 + $0x58] sm:$0xff]  ;;  %v38_v52 = vld [vmem:[%s539_s0 + $0x70] sm:$0xff] }
   0x7   :  { %v68_v21 = vadd.f32 %v345_v5, %v48_v11  ;;  %151 = vmatpush.bf16.msra.mxu0 %v143_v18  ;;  %283 = vmatpush.bf16.msra.mxu1 %v143_v18  ;;  %v282_v23 = vld [vmem:[%s538_s3] sm:$0xff]  ;;  %v73_v26 = vadd.f32 %v345_v5, %v53_v16  ;;  %v80_v27 = vmax.f32 %v64_v19, 0.0  ;;  %v81_v28 = vmax.f32 %v65_v20, 0.0  ;;  %v39_v53 = vld [vmem:[%s539_s0 + $0x78] sm:$0xff] }
   0x8   :  { %v72_v25 = vadd.f32 %v345_v5, %v52_v15  ;;  %284 = vmatpush.bf16.msra.mxu2 %v143_v18  ;;  %285 = vmatpush.bf16.msra.mxu3 %v143_v18  ;;  %v56_v30 = vmul.f32 %v340_v4, %v36_v17  ;;  %v85_v31 = vmax.f32 %v69_v24, 0.0  ;;  %v77_v40 = vadd.f32 %v345_v5, %v57_v34  ;;  %v440_v16 = vld [vmem:[%s543_s5] ss:$0 sm:$0xff] }
   0x9   :  { %v84_v29 = vmax.f32 %v68_v21, 0.0  ;;  %v89_v33 = vmax.f32 %v73_v26, 0.0  ;;  %v96_v35 = vpack.c.bf16 %v81_v28, %v80_v27  ;;  %v51_v51 = vmul.f32 %v340_v4, %v31_v43 }
   0xa   :  { %v88_v32 = vmax.f32 %v72_v25, 0.0  ;;  %v76_v36 = vadd.f32 %v345_v5, %v56_v30  ;;  %v93_v47 = vmax.f32 %v77_v40, 0.0  ;;  %v54_v55 = vmul.f32 %v340_v4, %v34_v45 }
   0xb   :  { %152 = vmatpush.bf16.msra.mxu0 %v282_v23  ;;  %286 = vmatpush.bf16.msra.mxu1 %v282_v23  ;;  %v98_v38 = vpack.c.bf16 %v85_v31, %v84_v29  ;;  %v55_v56 = vmul.f32 %v340_v4, %v35_v46  ;;  %v58_v57 = vmul.f32 %v340_v4, %v38_v52 }
   0xc   :  { %v100_v39 = vpack.c.bf16 %v89_v33, %v88_v32  ;;  %287 = vmatpush.bf16.msra.mxu2 %v282_v23  ;;  %288 = vmatpush.bf16.msra.mxu3 %v282_v23  ;;  %v92_v44 = vmax.f32 %v76_v36, 0.0  ;;  %v59_v58 = vmul.f32 %v340_v4, %v39_v53  ;;  %v66_v59 = vadd.f32 %v345_v5, %v46_v48 }
   0xd   :  { %v67_v60 = vadd.f32 %v345_v5, %v47_v49  ;;  %v70_v61 = vadd.f32 %v345_v5, %v50_v50  ;;  %v71_v62 = vadd.f32 %v345_v5, %v51_v51  ;;  %v74_v63 = vadd.f32 %v345_v5, %v54_v55 }
   0xe   :  { %274 = vmatmul.msk.bf16.vlgmr.msra.gmra.mxu0 %vm116_vm1, %v96_v35  ;;  %276 = vmatmul.msk.bf16.vlgmr.msra.gmra.mxu1 %vm116_vm1, %v98_v38  ;;  %v102_v54 = vpack.c.bf16 %v93_v47, %v92_v44  ;;  %v75_v0 = vadd.f32 %v345_v5, %v55_v56  ;;  %v78_v1 = vadd.f32 %v345_v5, %v58_v57  ;;  %v82_v3 = vmax.f32 %v66_v59, 0.0 }
   0xf   :  { %278 = vmatmul.msk.bf16.vlgmr.msra.gmra.mxu2 %vm116_vm1, %v100_v39  ;;  %v79_v2 = vadd.f32 %v345_v5, %v59_v58  ;;  %v83_v6 = vmax.f32 %v67_v60, 0.0  ;;  %v86_v7 = vmax.f32 %v70_v61, 0.0  ;;  %v87_v4 = vmax.f32 %v71_v62, 0.0  ;;  %v435_v5 = vld [vmem:[%s542_s4] ss:$0 sm:$0xff] }
  0x10   :  { %280 = vmatmul.msk.bf16.vlgmr.msra.gmra.mxu3 %vm116_vm1, %v102_v54  ;;  %v90_v8 = vmax.f32 %v74_v63, 0.0  ;;  %v91_v9 = vmax.f32 %v75_v0, 0.0  ;;  %v94_v10 = vmax.f32 %v78_v1, 0.0 }
  0x11   :  { %v95_v11 = vmax.f32 %v79_v2, 0.0  ;;  %v97_v12 = vpack.c.bf16 %v83_v6, %v82_v3  ;;  %v99_v13 = vpack.c.bf16 %v87_v4, %v86_v7 }
  0x12   :  { %v101_v14 = vpack.c.bf16 %v91_v9, %v90_v8 }
  0x13   :  { %v103_v15 = vpack.c.bf16 %v95_v11, %v94_v10 }
  0x1e   :  { %275 = vmatmul.msk.bf16.gmra.mxu0 %vm116_vm1, %v97_v12  ;;  %277 = vmatmul.msk.bf16.gmra.mxu1 %vm116_vm1, %v99_v13 }
  0x1f   :  { %279 = vmatmul.msk.bf16.gmra.mxu2 %vm116_vm1, %v101_v14 }
  0x20   :  { %281 = vmatmul.msk.bf16.gmra.mxu3 %vm116_vm1, %v103_v15 }
  0x8b   :  { %v154_v17 = vpop.f32.mrf.mxu0  ;;  %v164_v18 = vpop.f32.mrf.mxu1 }
  0x8c   :  { %v198_v19 = vmul.f32 %v435_v5, %v154_v17  ;;  %v202_v20 = vmul.f32 %v435_v5, %v164_v18 }
  0x8e   :  { %v218_v21 = vadd.f32 %v440_v16, %v198_v19  ;;  %v222_v22 = vadd.f32 %v440_v16, %v202_v20 }
  0x90   :  { %v234_v23 = vmax.f32 %v218_v21, 0.0  ;;  %v238_v24 = vmax.f32 %v222_v22, 0.0 }
  0x92   :  { %250 = vst.msk [vmem:[%s544_s6] sm:$0xff] %vm116_vm1, %v234_v23  ;;  %v174_v25 = vpop.f32.mrf.mxu2 }
  0x93   :  { %254 = vst.msk [vmem:[%s544_s6 + $0x20] sm:$0xff] %vm116_vm1, %v238_v24  ;;  %v206_v26 = vmul.f32 %v435_v5, %v174_v25  ;;  %v156_v27 = vpop.f32.mrf.mxu0  ;;  %v166_v28 = vpop.f32.mrf.mxu1 }
  0x94   :  { %v184_v29 = vpop.f32.mrf.mxu3  ;;  %v199_v30 = vmul.f32 %v435_v5, %v156_v27  ;;  %v203_v31 = vmul.f32 %v435_v5, %v166_v28 }
  0x95   :  { %v226_v32 = vadd.f32 %v440_v16, %v206_v26  ;;  %v210_v33 = vmul.f32 %v435_v5, %v184_v29 }
  0x96   :  { %v219_v34 = vadd.f32 %v440_v16, %v199_v30  ;;  %v223_v35 = vadd.f32 %v440_v16, %v203_v31 }
  0x97   :  { %v242_v36 = vmax.f32 %v226_v32, 0.0  ;;  %v230_v37 = vadd.f32 %v440_v16, %v210_v33 }
  0x98   :  { %v235_v38 = vmax.f32 %v219_v34, 0.0  ;;  %v239_v39 = vmax.f32 %v223_v35, 0.0 }
  0x99   :  { %258 = vst.msk [vmem:[%s544_s6 + $0x40] sm:$0xff] %vm116_vm1, %v242_v36  ;;  %v246_v40 = vmax.f32 %v230_v37, 0.0 }
  0x9a   :  { %251 = vst.msk [vmem:[%s544_s6 + $0x8] sm:$0xff] %vm116_vm1, %v235_v38  ;;  %v176_v41 = vpop.f32.mrf.mxu2 }
  0x9b   :  { %262 = vst.msk [vmem:[%s544_s6 + $0x60] sm:$0xff] %vm116_vm1, %v246_v40  ;;  %v207_v42 = vmul.f32 %v435_v5, %v176_v41  ;;  %v159_v43 = vpop.f32.mrf.mxu0  ;;  %v169_v44 = vpop.f32.mrf.mxu1 }
  0x9c   :  { %255 = vst.msk [vmem:[%s544_s6 + $0x28] sm:$0xff] %vm116_vm1, %v239_v39  ;;  %v186_v45 = vpop.f32.mrf.mxu3  ;;  %v200_v46 = vmul.f32 %v435_v5, %v159_v43  ;;  %v204_v47 = vmul.f32 %v435_v5, %v169_v44 }
  0x9d   :  { %v227_v48 = vadd.f32 %v440_v16, %v207_v42  ;;  %v211_v49 = vmul.f32 %v435_v5, %v186_v45 }
  0x9e   :  { %v220_v50 = vadd.f32 %v440_v16, %v200_v46  ;;  %v224_v51 = vadd.f32 %v440_v16, %v204_v47 }
  0x9f   :  { %v243_v52 = vmax.f32 %v227_v48, 0.0  ;;  %v231_v53 = vadd.f32 %v440_v16, %v211_v49 }
  0xa0   :  { %v236_v54 = vmax.f32 %v220_v50, 0.0  ;;  %v240_v55 = vmax.f32 %v224_v51, 0.0 }
  0xa1   :  { %259 = vst.msk [vmem:[%s544_s6 + $0x48] sm:$0xff] %vm116_vm1, %v243_v52  ;;  %v247_v56 = vmax.f32 %v231_v53, 0.0 }
  0xa2   :  { %252 = vst.msk [vmem:[%s544_s6 + $0x10] sm:$0xff] %vm116_vm1, %v236_v54  ;;  %v179_v57 = vpop.f32.mrf.mxu2 }
  0xa3   :  { %263 = vst.msk [vmem:[%s544_s6 + $0x68] sm:$0xff] %vm116_vm1, %v247_v56  ;;  %v208_v58 = vmul.f32 %v435_v5, %v179_v57  ;;  %v161_v59 = vpop.f32.mrf.mxu0  ;;  %v171_v60 = vpop.f32.mrf.mxu1 }
  0xa4   :  { %256 = vst.msk [vmem:[%s544_s6 + $0x30] sm:$0xff] %vm116_vm1, %v240_v55  ;;  %v189_v61 = vpop.f32.mrf.mxu3  ;;  %v201_v62 = vmul.f32 %v435_v5, %v161_v59  ;;  %v205_v63 = vmul.f32 %v435_v5, %v171_v60 }
  0xa5   :  { %v228_v0 = vadd.f32 %v440_v16, %v208_v58  ;;  %v212_v1 = vmul.f32 %v435_v5, %v189_v61 }
  0xa6   :  { %v221_v2 = vadd.f32 %v440_v16, %v201_v62  ;;  %v225_v3 = vadd.f32 %v440_v16, %v205_v63 }
  0xa7   :  { %v244_v6 = vmax.f32 %v228_v0, 0.0  ;;  %v232_v7 = vadd.f32 %v440_v16, %v212_v1 }
  0xa8   :  { %v237_v4 = vmax.f32 %v221_v2, 0.0  ;;  %v241_v8 = vmax.f32 %v225_v3, 0.0 }
  0xa9   :  { %260 = vst.msk [vmem:[%s544_s6 + $0x50] sm:$0xff] %vm116_vm1, %v244_v6  ;;  %v248_v9 = vmax.f32 %v232_v7, 0.0 }
  0xaa   :  { %253 = vst.msk [vmem:[%s544_s6 + $0x18] sm:$0xff] %vm116_vm1, %v237_v4  ;;  %v181_v10 = vpop.f32.mrf.mxu2 }
  0xab   :  { %264 = vst.msk [vmem:[%s544_s6 + $0x70] sm:$0xff] %vm116_vm1, %v248_v9  ;;  %v209_v11 = vmul.f32 %v435_v5, %v181_v10 }
  0xac   :  { %257 = vst.msk [vmem:[%s544_s6 + $0x38] sm:$0xff] %vm116_vm1, %v241_v8  ;;  %v191_v12 = vpop.f32.mrf.mxu3 }
  0xad   :  { %v229_v13 = vadd.f32 %v440_v16, %v209_v11  ;;  %v213_v14 = vmul.f32 %v435_v5, %v191_v12 }
  0xaf   :  { %v245_v15 = vmax.f32 %v229_v13, 0.0  ;;  %v233_v17 = vadd.f32 %v440_v16, %v213_v14 }
  0xb1   :  { %261 = vst.msk [vmem:[%s544_s6 + $0x58] sm:$0xff] %vm116_vm1, %v245_v15  ;;  %v249_v18 = vmax.f32 %v233_v17, 0.0 }
  0xb3   :  { %265 = vst.msk [vmem:[%s544_s6 + $0x78] sm:$0xff] %vm116_vm1, %v249_v18 }

// kernel: deep_cnn300_forward.15
= control target key start
LH: loop header
LB: loop body
LE: loop exit
PB: predicated region body
PF: predicated region fallthrough
CT: control target
= control target key end

     0   :  { %s1164_s9 = smov 0   ;;  %s1428_s0 = inlined_call_operand.vmem [shape: f32[2,110,24], index: 0, kind: input, shape index: {}]   ;;  %s1429_s1 = inlined_call_operand.vmem [shape: bf16[9,24,8], index: 1, kind: input, shape index: {}]   ;;  %s1430_s2 = inlined_call_operand.vmem [shape: f32[2,80,8], index: 2, kind: output, shape index: {}]  }
   0x1 LB: > { %s1002_s10 = sadd.s32 4294967295, %s1147_s9   ;;  %p1006_p0 = scmp.ge.s32.totalorder %s1147_s9, 1  ;;  %s1147_s9 = sphi %s1164_s9, %s12_s9  }
   0x2   : > { %p112_p1 = scmp.lt.s32.totalorder %s1147_s9, 3 }
   0x4   : > { %p113_p2 = pnand %p1006_p0, %p112_p1 }
   0x5   : > { %p134_p3 = scmp.lt.s32.totalorder (!%p113_p2), %s1002_s10, 1 }
   0x6   : > { %116 = sbr.rel (%p113_p2) target bundleno = 347 (0x15b), region = 28 }
   0xb   : > { %v1011_v0 = vld [vmem:[%s1429_s1 + $0x14] sm:$0xf]  ;;  %v1032_v2 = vld [vmem:[%s1429_s1 + $0x20] sm:$0xf]  ;;  %v162_v3 = vld [vmem:[%s1429_s1 + $0x8] sm:$0xf] }
   0xc   : > { %v187_v1 = vunpack.c.l.b16 %v1011_v0  ;;  %vm207_vm0 = vcmask 1043456   ;;  %s1432_s10 = smov (!%p134_p3, %s1002_s10), 1  ;;  %v330_v4 = vunpack.c.l.b16 %v1032_v2  ;;  %v250_v5 = vunpack.c.l.b16 %v162_v3  ;;  %v1044_v6 = vld [vmem:[%s1429_s1 + $0x2c] sm:$0xf]  ;;  %v1056_v8 = vld [vmem:[%s1429_s1 + $0x38] sm:$0xf] }
   0xd   : > { %s1131_s21 = smul.u32 112, %s1432_s10  ;;  %v510_v10 = vunpack.c.l.b16 %v1056_v8  ;;  %v420_v13 = vunpack.c.l.b16 %v1044_v6  ;;  %v1117_v14 = vld [vmem:[%s1429_s1 + $0xc] sm:$0xff]  ;;  %vm191_vm1 = vcmask 195584   ;;  %v1118_v30 = vld [vmem:[%s1429_s1 + $0x18] sm:$0xff]  ;;  %v1116_v33 = vld [vmem:[%s1429_s1] sm:$0xff]  ;;  %vm936_vm2 = vcmask 64512  }
   0xe   : > { %v189_v7 = vpack.c.b16 %v187_v1, %v187_v1  ;;  %v332_v9 = vpack.c.b16 %v330_v4, %v330_v4  ;;  %v252_v12 = vpack.c.b16 %v250_v5, %v250_v5  ;;  %v1080_v35 = vld [vmem:[%s1429_s1 + $0x50] sm:$0xf]  ;;  %v1092_v36 = vld [vmem:[%s1429_s1 + $0x5c] sm:$0xf]  ;;  %v1068_v40 = vld [vmem:[%s1429_s1 + $0x44] sm:$0xf] }
   0xf   : > { %s1197_s26 = scalar_lea.vmem %s1428_s0, %s1131_s21  ;;  %v512_v18 = vpack.c.b16 %v510_v10, %v510_v10  ;;  %v422_v26 = vpack.c.b16 %v420_v13, %v420_v13  ;;  %v1120_v37 = vld [vmem:[%s1429_s1 + $0x30] sm:$0xff]  ;;  %v690_v38 = vunpack.c.l.b16 %v1080_v35  ;;  %v780_v39 = vunpack.c.l.b16 %v1092_v36  ;;  %v1104_v42 = vld [vmem:[%s1429_s1 + $0x68] sm:$0xf]  ;;  %s1132_s25 = smul.u32 80, %s1432_s10 }
  0x10   : > { %v209_v11 = vsel %vm207_vm0, %v189_v7, 0  ;;  %v165_v15 = vld [vmem:[%s1197_s26 + $0x11] sm:$0xff]  ;;  %v166_v16 = vld [vmem:[%s1197_s26 + $0x19] sm:$0xff]  ;;  %v167_v17 = vld [vmem:[%s1197_s26 + $0x21] sm:$0xff]  ;;  %v350_v20 = vsel %vm207_vm0, %v332_v9, 0  ;;  %v270_v25 = vsel %vm207_vm0, %v252_v12, 0  ;;  %v600_v41 = vunpack.c.l.b16 %v1068_v40 }
  0x11   : > { %1125 = vmatpush.bf16.msra.mxu1 %v209_v11  ;;  %1126 = vmatpush.bf16.msra.mxu2 %v209_v11  ;;  %v168_v19 = vld [vmem:[%s1197_s26 + $0x29] sm:$0xff]  ;;  %v171_v21 = vld [vmem:[%s1197_s26 + $0x41] sm:$0xff]  ;;  %v174_v23 = vpack.c.bf16 %v166_v16, %v165_v15  ;;  %v530_v32 = vsel %vm207_vm0, %v512_v18, 0  ;;  %v440_v34 = vsel %vm207_vm0, %v422_v26, 0  ;;  %v692_v44 = vpack.c.b16 %v690_v38, %v690_v38  ;;  %v169_v53 = vld [vmem:[%s1197_s26 + $0x31] sm:$0xff]  ;;  %s1394_s28 = scalar_lea.vmem %s1430_s2, %s1132_s25 }
  0x12   : > { %1127 = vmatpush.bf16.msra.mxu3 %v209_v11  ;;  %217 = vmatpush.bf16.msra.mxu0 %v209_v11  ;;  %v172_v22 = vld [vmem:[%s1197_s26 + $0x49] sm:$0xff]  ;;  %v175_v24 = vpack.c.bf16 %v168_v19, %v167_v17  ;;  %v163_v28 = vld [vmem:[%s1197_s26 + $0x1] sm:$0xff]  ;;  %v782_v45 = vpack.c.b16 %v780_v39, %v780_v39  ;;  %v870_v46 = vunpack.c.l.b16 %v1104_v42  ;;  %v602_v47 = vpack.c.b16 %v600_v41, %v600_v41  ;;  %v170_v54 = vld [vmem:[%s1197_s26 + $0x39] sm:$0xff] }
  0x13   : > { %v177_v27 = vpack.c.bf16 %v172_v22, %v171_v21  ;;  %v164_v29 = vld [vmem:[%s1197_s26 + $0x9] sm:$0xff]  ;;  %v710_v48 = vsel %vm207_vm0, %v692_v44, 0  ;;  %v145_v55 = vld [vmem:[%s1197_s26] sm:$0xff]  ;;  %v397_v58 = vld [vmem:[%s1197_s26 + $0x12] sm:$0xff]  ;;  %v176_v61 = vpack.c.bf16 %v170_v54, %v169_v53 }
  0x14   : > { %v173_v31 = vpack.c.bf16 %v164_v29, %v163_v28  ;;  %v1119_v43 = vld [vmem:[%s1429_s1 + $0x24] sm:$0xff]  ;;  %v800_v49 = vsel %vm207_vm0, %v782_v45, 0  ;;  %v872_v50 = vpack.c.b16 %v870_v46, %v870_v46  ;;  %v620_v51 = vsel %vm207_vm0, %v602_v47, 0  ;;  %v487_v60 = vld [vmem:[%s1197_s26 + $0x13] sm:$0xff]  ;;  %v488_v6 = vld [vmem:[%s1197_s26 + $0x1b] sm:$0xff] }
  0x15   : > { %1128 = vmatpush.bf16.msra.mxu1 %v1117_v14  ;;  %1129 = vmatpush.bf16.msra.mxu2 %v1117_v14  ;;  %v146_v56 = vld [vmem:[%s1197_s26 + $0x8] sm:$0xff]  ;;  %v147_v1 = vld [vmem:[%s1197_s26 + $0x10] sm:$0xff]  ;;  %v148_v2 = vld [vmem:[%s1197_s26 + $0x18] sm:$0xff] }
  0x16   : > { %1130 = vmatpush.bf16.msra.mxu3 %v1117_v14  ;;  %218 = vmatpush.bf16.msra.mxu0 %v1117_v14  ;;  %v890_v52 = vsel %vm207_vm0, %v872_v50, 0  ;;  %v396_v57 = vld [vmem:[%s1197_s26 + $0xa] sm:$0xff]  ;;  %v155_v62 = vpack.c.bf16 %v146_v56, %v145_v55  ;;  %v306_v3 = vld [vmem:[%s1197_s26 + $0x2] sm:$0xff]  ;;  %v398_v4 = vld [vmem:[%s1197_s26 + $0x1a] sm:$0xff]  ;;  %v156_v8 = vpack.c.bf16 %v148_v2, %v147_v1 }
  0x17   : > { %v486_v59 = vld [vmem:[%s1197_s26 + $0xb] sm:$0xff]  ;;  %v406_v63 = vpack.c.bf16 %v397_v58, %v396_v57  ;;  %v399_v5 = vld [vmem:[%s1197_s26 + $0x22] sm:$0xff]  ;;  %v316_v9 = vpack.c.bf16 %v396_v57, %v306_v3  ;;  %v1123_v13 = vld [vmem:[%s1429_s1 + $0x54] sm:$0xff]  ;;  %v317_v22 = vpack.c.bf16 %v398_v4, %v397_v58 }
  0x18   : > { %1017 = vmatmul.msk.bf16.vlgmr.msra.gmra.mxu1 %vm191_vm1, %v174_v23  ;;  %1018 = vmatmul.msk.bf16.vlgmr.msra.gmra.mxu2 %vm191_vm1, %v175_v24  ;;  %v496_v0 = vpack.c.bf16 %v487_v60, %v486_v59  ;;  %v489_v7 = vld [vmem:[%s1197_s26 + $0x23] sm:$0xff]  ;;  %v407_v10 = vpack.c.bf16 %v399_v5, %v398_v4  ;;  %v401_v18 = vld [vmem:[%s1197_s26 + $0x32] sm:$0xff]  ;;  %v402_v28 = vld [vmem:[%s1197_s26 + $0x3a] sm:$0xff] }
  0x19   : > { %358 = vmatpush.bf16.msrb.mxu2 %v350_v20  ;;  %278 = vmatpush.bf16.msrb.mxu1 %v270_v25  ;;  %v497_v11 = vpack.c.bf16 %v489_v7, %v488_v6  ;;  %v1122_v12 = vld [vmem:[%s1429_s1 + $0x48] sm:$0xff]  ;;  %v1121_v14 = vld [vmem:[%s1429_s1 + $0x3c] sm:$0xff]  ;;  %v491_v20 = vld [vmem:[%s1197_s26 + $0x33] sm:$0xff] }
  0x1a   : > { %1020 = vmatmul.msk.bf16.vlgmr.msra.gmra.mxu3 %vm191_vm1, %v177_v27  ;;  %538 = vmatpush.bf16.msrb.mxu0 %v530_v32  ;;  %v149_v15 = vld [vmem:[%s1197_s26 + $0x20] sm:$0xff]  ;;  %v150_v16 = vld [vmem:[%s1197_s26 + $0x28] sm:$0xff]  ;;  %v151_v26 = vld [vmem:[%s1197_s26 + $0x30] sm:$0xff] }
  0x1b   : > { %1016 = vmatmul.msk.bf16.vlgmr.msra.gmra.mxu0 %vm191_vm1, %v173_v31  ;;  %448 = vmatpush.bf16.msrb.mxu3 %v440_v34  ;;  %v400_v17 = vld [vmem:[%s1197_s26 + $0x2a] sm:$0xff]  ;;  %v157_v21 = vpack.c.bf16 %v150_v16, %v149_v15  ;;  %v1124_v25 = vld [vmem:[%s1429_s1 + $0x60] sm:$0xff]  ;;  %v152_v27 = vld [vmem:[%s1197_s26 + $0x38] sm:$0xff] }
  0x1c   : > { %v490_v19 = vld [vmem:[%s1197_s26 + $0x2b] sm:$0xff]  ;;  %v408_v23 = vpack.c.bf16 %v401_v18, %v400_v17  ;;  %v403_v29 = vld [vmem:[%s1197_s26 + $0x42] sm:$0xff]  ;;  %v158_v32 = vpack.c.bf16 %v152_v27, %v151_v26  ;;  %v495_v41 = vld [vmem:[%s1197_s26 + $0x53] sm:$0xff] }
  0x1d   : > { %359 = vmatpush.bf16.msrb.mxu2 %v1118_v30  ;;  %279 = vmatpush.bf16.msrb.mxu1 %v1116_v33  ;;  %v498_v24 = vpack.c.bf16 %v491_v20, %v490_v19  ;;  %v492_v30 = vld [vmem:[%s1197_s26 + $0x3b] sm:$0xff]  ;;  %v493_v31 = vld [vmem:[%s1197_s26 + $0x43] sm:$0xff]  ;;  %v318_v33 = vpack.c.bf16 %v400_v17, %v399_v5  ;;  %v409_v34 = vpack.c.bf16 %v403_v29, %v402_v28  ;;  %v405_v39 = vld [vmem:[%s1197_s26 + $0x52] sm:$0xff] }
  0x1e   : > { %539 = vmatpush.bf16.msrb.mxu0 %v1120_v37  ;;  %v499_v35 = vpack.c.bf16 %v493_v31, %v492_v30  ;;  %v153_v36 = vld [vmem:[%s1197_s26 + $0x40] sm:$0xff]  ;;  %v154_v37 = vld [vmem:[%s1197_s26 + $0x48] sm:$0xff]  ;;  %v577_v47 = vld [vmem:[%s1197_s26 + $0x14] sm:$0xff] }
  0x1f   : > { %449 = vmatpush.bf16.msrb.mxu3 %v1119_v43  ;;  %v404_v38 = vld [vmem:[%s1197_s26 + $0x4a] sm:$0xff]  ;;  %v159_v42 = vpack.c.bf16 %v154_v37, %v153_v36  ;;  %v319_v43 = vpack.c.bf16 %v402_v28, %v401_v18  ;;  %v846_v50 = vld [vmem:[%s1197_s26 + $0x16] sm:$0xff]  ;;  %v851_v7 = vld [vmem:[%s1197_s26 + $0x3e] sm:$0xff] }
  0x20   : > { %v494_v40 = vld [vmem:[%s1197_s26 + $0x4b] sm:$0xff]  ;;  %v410_v44 = vpack.c.bf16 %v405_v39, %v404_v38  ;;  %v578_v56 = vld [vmem:[%s1197_s26 + $0x1c] sm:$0xff]  ;;  %v581_v3 = vld [vmem:[%s1197_s26 + $0x34] sm:$0xff] }
  0x21   : > { %718 = vmatpush.bf16.msra.mxu2 %v710_v48  ;;  %628 = vmatpush.bf16.msra.mxu1 %v620_v51  ;;  %v500_v45 = vpack.c.bf16 %v495_v41, %v494_v40  ;;  %v576_v46 = vld [vmem:[%s1197_s26 + $0xc] sm:$0xff]  ;;  %v756_v48 = vld [vmem:[%s1197_s26 + $0x15] sm:$0xff]  ;;  %v847_v51 = vld [vmem:[%s1197_s26 + $0x1e] sm:$0xff] }
  0x22   : > { %898 = vmatpush.bf16.msra.mxu0 %v890_v52  ;;  %v320_v52 = vpack.c.bf16 %v404_v38, %v403_v29  ;;  %v586_v53 = vpack.c.bf16 %v577_v47, %v576_v46  ;;  %v856_v55 = vpack.c.bf16 %v847_v51, %v846_v50  ;;  %v579_v57 = vld [vmem:[%s1197_s26 + $0x24] sm:$0xff]  ;;  %v759_v59 = vld [vmem:[%s1197_s26 + $0x2d] sm:$0xff]  ;;  %v760_v4 = vld [vmem:[%s1197_s26 + $0x35] sm:$0xff] }
  0x23   : > { %808 = vmatpush.bf16.msra.mxu3 %v800_v49  ;;  %v757_v49 = vld [vmem:[%s1197_s26 + $0x1d] sm:$0xff]  ;;  %v758_v58 = vld [vmem:[%s1197_s26 + $0x25] sm:$0xff]  ;;  %v585_v39 = vld [vmem:[%s1197_s26 + $0x54] sm:$0xff] }
  0x24   : > { %v766_v54 = vpack.c.bf16 %v757_v49, %v756_v48  ;;  %v848_v60 = vld [vmem:[%s1197_s26 + $0x26] sm:$0xff]  ;;  %v761_v5 = vld [vmem:[%s1197_s26 + $0x3d] sm:$0xff]  ;;  %v764_v40 = vld [vmem:[%s1197_s26 + $0x55] sm:$0xff] }
  0x25   : > { %719 = vmatpush.bf16.msra.mxu2 %v1122_v12  ;;  %629 = vmatpush.bf16.msra.mxu1 %v1121_v14  ;;  %v580_v2 = vld [vmem:[%s1197_s26 + $0x2c] sm:$0xff]  ;;  %v850_v6 = vld [vmem:[%s1197_s26 + $0x36] sm:$0xff]  ;;  %v583_v19 = vld [vmem:[%s1197_s26 + $0x44] sm:$0xff] }
  0x26   : > { %899 = vmatpush.bf16.msra.mxu0 %v1124_v25  ;;  %v858_v12 = vpack.c.bf16 %v851_v7, %v850_v6  ;;  %v582_v18 = vld [vmem:[%s1197_s26 + $0x3c] sm:$0xff]  ;;  %v762_v20 = vld [vmem:[%s1197_s26 + $0x45] sm:$0xff] }
  0x27   : > { %809 = vmatpush.bf16.msra.mxu3 %v1123_v13  ;;  %v589_v25 = vpack.c.bf16 %v583_v19, %v582_v18  ;;  %v678_v26 = vpack.c.bf16 %v582_v18, %v581_v3  ;;  %v584_v38 = vld [vmem:[%s1197_s26 + $0x4c] sm:$0xff]  ;;  %v765_v41 = vld [vmem:[%s1197_s26 + $0x5d] sm:$0xff] }
  0x28   : > { %1019 = vmatmul.msk.bf16.gmra.mxu2 %vm191_vm1, %v176_v61  ;;  %1025 = vmatmul.msk.bf16.vlgmr.msrb.gmra.mxu1 %vm191_vm1, %v155_v62  ;;  %v849_v61 = vld [vmem:[%s1197_s26 + $0x2e] sm:$0xff]  ;;  %v587_v62 = vpack.c.bf16 %v579_v57, %v578_v56  ;;  %v679_v46 = vpack.c.bf16 %v584_v38, %v583_v19  ;;  %v770_v49 = vpack.c.bf16 %v765_v41, %v764_v40 }
  0x29   : > { %v857_v1 = vpack.c.bf16 %v849_v61, %v848_v60  ;;  %v675_v61 = vld [vmem:[%s1197_s26 + $0x5c] sm:$0xff] }
  0x2a   : > { %1049 = vmatmul.msk.bf16.vlgmr.msrb.gmra.mxu3 %vm191_vm1, %v406_v63  ;;  %v676_v63 = vpack.c.bf16 %v578_v56, %v577_v47 }
  0x2b   : > { %1061 = vmatmul.msk.bf16.vlgmr.msrb.gmra.mxu0 %vm191_vm1, %v496_v0  ;;  %v767_v0 = vpack.c.bf16 %v759_v59, %v758_v58 }
  0x38   : > { %1026 = vmatmul.msk.bf16.gmra.mxu1 %vm191_vm1, %v156_v8  ;;  %1037 = vmatmul.msk.bf16.vlgmr.msrb.gmra.mxu2 %vm191_vm1, %v316_v9  ;;  %v588_v8 = vpack.c.bf16 %v581_v3, %v580_v2  ;;  %v677_v9 = vpack.c.bf16 %v580_v2, %v579_v57 }
  0x3a   : > { %1050 = vmatmul.msk.bf16.gmra.mxu3 %vm191_vm1, %v407_v10 }
  0x3b   : > { %1062 = vmatmul.msk.bf16.gmra.mxu0 %vm191_vm1, %v497_v11  ;;  %v768_v11 = vpack.c.bf16 %v761_v5, %v760_v4 }
  0x48   : > { %1027 = vmatmul.msk.bf16.gmra.mxu1 %vm191_vm1, %v157_v21  ;;  %1038 = vmatmul.msk.bf16.gmra.mxu2 %vm191_vm1, %v317_v22  ;;  %v763_v21 = vld [vmem:[%s1197_s26 + $0x4d] sm:$0xff] }
  0x49   : > { %v769_v29 = vpack.c.bf16 %v763_v21, %v762_v20 }
  0x4a   : > { %1051 = vmatmul.msk.bf16.gmra.mxu3 %vm191_vm1, %v408_v23  ;;  %v852_v23 = vld [vmem:[%s1197_s26 + $0x46] sm:$0xff] }
  0x4b   : > { %1063 = vmatmul.msk.bf16.gmra.mxu0 %vm191_vm1, %v498_v24  ;;  %v853_v24 = vld [vmem:[%s1197_s26 + $0x4e] sm:$0xff] }
  0x4c   : > { %v859_v31 = vpack.c.bf16 %v853_v24, %v852_v23 }
  0x58   : > { %1028 = vmatmul.msk.bf16.gmra.mxu1 %vm191_vm1, %v158_v32  ;;  %1039 = vmatmul.msk.bf16.gmra.mxu2 %vm191_vm1, %v318_v33 }
  0x5a   : > { %1052 = vmatmul.msk.bf16.gmra.mxu3 %vm191_vm1, %v409_v34 }
  0x5b   : > { %1064 = vmatmul.msk.bf16.gmra.mxu0 %vm191_vm1, %v499_v35 }
  0x68   : > { %1029 = vmatmul.msk.bf16.gmra.mxu1 %vm191_vm1, %v159_v42  ;;  %1040 = vmatmul.msk.bf16.gmra.mxu2 %vm191_vm1, %v319_v43  ;;  %v854_v43 = vld [vmem:[%s1197_s26 + $0x56] sm:$0xff] }
  0x6a   : > { %1053 = vmatmul.msk.bf16.gmra.mxu3 %vm191_vm1, %v410_v44  ;;  %v855_v44 = vld [vmem:[%s1197_s26 + $0x5e] sm:$0xff] }
  0x6b   : > { %1065 = vmatmul.msk.bf16.gmra.mxu0 %vm191_vm1, %v500_v45  ;;  %v590_v45 = vpack.c.bf16 %v585_v39, %v584_v38  ;;  %v860_v51 = vpack.c.bf16 %v855_v44, %v854_v43 }
  0x78   : > { %1041 = vmatmul.msk.bf16.gmra.mxu2 %vm191_vm1, %v320_v52  ;;  %1073 = vmatmul.msk.bf16.vlgmr.msra.gmra.mxu1 %vm191_vm1, %v586_v53 }
  0x7a   : > { %1097 = vmatmul.msk.bf16.vlgmr.msra.gmra.mxu3 %vm191_vm1, %v766_v54 }
  0x7b   : > { %1109 = vmatmul.msk.bf16.vlgmr.msra.gmra.mxu0 %vm191_vm1, %v856_v55 }
  0x88   : > { %1074 = vmatmul.msk.bf16.gmra.mxu1 %vm191_vm1, %v587_v62  ;;  %1085 = vmatmul.msk.bf16.vlgmr.msra.gmra.mxu2 %vm191_vm1, %v676_v63 }
  0x8a   : > { %1098 = vmatmul.msk.bf16.gmra.mxu3 %vm191_vm1, %v767_v0  ;;  %v680_v0 = vpack.c.bf16 %v675_v61, %v585_v39 }
  0x8b   : > { %1110 = vmatmul.msk.bf16.gmra.mxu0 %vm191_vm1, %v857_v1 }
  0x95   : > { %v225_v10 = vpop.f32.mrf.mxu1 }
  0x98   : > { %v220_v13 = vpop.f32.mrf.mxu0  ;;  %1075 = vmatmul.msk.bf16.gmra.mxu1 %vm191_vm1, %v588_v8  ;;  %1086 = vmatmul.msk.bf16.gmra.mxu2 %vm191_vm1, %v677_v9 }
  0x9a   : > { %1099 = vmatmul.msk.bf16.gmra.mxu3 %vm191_vm1, %v768_v11 }
  0x9b   : > { %1111 = vmatmul.msk.bf16.gmra.mxu0 %vm191_vm1, %v858_v12  ;;  %v230_v14 = vpop.f32.mrf.mxu2 }
  0x9d   : > { %v1338_v15 = vpop.f32.mrf.mxu3  ;;  %v227_v16 = vpop.f32.mrf.mxu1 }
  0xa0   : > { %v222_v17 = vpop.f32.mrf.mxu0 }
  0xa3   : > { %v1344_v22 = vpop.f32.mrf.mxu2 }
  0xa5   : > { %v1348_v27 = vpop.f32.mrf.mxu3  ;;  %v281_v28 = vpop.f32.mrf.mxu1 }
  0xa6   : > { %v282_v30 = vadd.f32 %v281_v28, %v220_v13 }
  0xa8   : > { %v541_v32 = vpop.f32.mrf.mxu0  ;;  %1076 = vmatmul.msk.bf16.gmra.mxu1 %vm191_vm1, %v589_v25  ;;  %1087 = vmatmul.msk.bf16.gmra.mxu2 %vm191_vm1, %v678_v26 }
  0xaa   : > { %1100 = vmatmul.msk.bf16.gmra.mxu3 %vm191_vm1, %v769_v29 }
  0xab   : > { %1112 = vmatmul.msk.bf16.gmra.mxu0 %vm191_vm1, %v859_v31  ;;  %v235_v33 = vpop.f32.mrf.mxu2 }
  0xad   : > { %v451_v34 = vpop.f32.mrf.mxu3  ;;  %v283_v35 = vpop.f32.mrf.mxu1 }
  0xae   : > { %v284_v36 = vadd.f32 %v283_v35, %v222_v17 }
  0xb0   : > { %v543_v37 = vpop.f32.mrf.mxu0 }
  0xb3   : > { %v237_v42 = vpop.f32.mrf.mxu2 }
  0xb5   : > { %v453_v47 = vpop.f32.mrf.mxu3  ;;  %v286_v48 = vpop.f32.mrf.mxu1 }
  0xb6   : > { %v287_v50 = vadd.f32 %v286_v48, %v225_v10 }
  0xb8   : > { %v546_v52 = vpop.f32.mrf.mxu0  ;;  %1077 = vmatmul.msk.bf16.gmra.mxu1 %vm191_vm1, %v590_v45  ;;  %1088 = vmatmul.msk.bf16.gmra.mxu2 %vm191_vm1, %v679_v46 }
  0xba   : > { %1101 = vmatmul.msk.bf16.gmra.mxu3 %vm191_vm1, %v770_v49 }
  0xbb   : > { %1113 = vmatmul.msk.bf16.gmra.mxu0 %vm191_vm1, %v860_v51  ;;  %v361_v53 = vpop.f32.mrf.mxu2 }
  0xbc   : > { %v386_v54 = vadd.f32 %v361_v53, %v282_v30 }
  0xbd   : > { %v456_v55 = vpop.f32.mrf.mxu3  ;;  %v288_v56 = vpop.f32.mrf.mxu1 }
  0xbe   : > { %v476_v57 = vadd.f32 %v451_v34, %v386_v54  ;;  %v289_v58 = vadd.f32 %v288_v56, %v227_v16 }
  0xc0   : > { %v548_v59 = vpop.f32.mrf.mxu0  ;;  %v1364_v60 = vadd.f32 %v541_v32, %v476_v57 }
  0xc3   : > { %v363_v62 = vpop.f32.mrf.mxu2 }
  0xc4   : > { %v387_v63 = vadd.f32 %v363_v62, %v284_v36 }
  0xc5   : > { %v458_v1 = vpop.f32.mrf.mxu3  ;;  %v291_v2 = vpop.f32.mrf.mxu1 }
  0xc6   : > { %v477_v3 = vadd.f32 %v453_v47, %v387_v63  ;;  %v292_v4 = vadd.f32 %v291_v2, %v230_v14 }
  0xc8   : > { %v551_v5 = vpop.f32.mrf.mxu0  ;;  %1089 = vmatmul.msk.bf16.gmra.mxu2 %vm191_vm1, %v680_v0  ;;  %v1368_v6 = vadd.f32 %v543_v37, %v477_v3 }
  0xcb   : > { %v366_v7 = vpop.f32.mrf.mxu2 }
  0xcc   : > { %v388_v8 = vadd.f32 %v366_v7, %v287_v50 }
  0xcd   : > { %v461_v9 = vpop.f32.mrf.mxu3  ;;  %v293_v10 = vpop.f32.mrf.mxu1 }
  0xce   : > { %v478_v11 = vadd.f32 %v456_v55, %v388_v8  ;;  %v294_v12 = vadd.f32 %v293_v10, %v1344_v22 }
  0xd0   : > { %v553_v13 = vpop.f32.mrf.mxu0  ;;  %v1371_v16 = vadd.f32 %v546_v52, %v478_v11 }
  0xd3   : > { %v368_v17 = vpop.f32.mrf.mxu2 }
  0xd4   : > { %v389_v18 = vadd.f32 %v368_v17, %v289_v58 }
  0xd5   : > { %v463_v19 = vpop.f32.mrf.mxu3  ;;  %v296_v20 = vpop.f32.mrf.mxu1 }
  0xd6   : > { %v479_v14 = vadd.f32 %v458_v1, %v389_v18  ;;  %v297_v21 = vadd.f32 %v296_v20, %v235_v33 }
  0xd8   : > { %v556_v23 = vpop.f32.mrf.mxu0  ;;  %v1373_v24 = vadd.f32 %v548_v59, %v479_v14 }
  0xdb   : > { %v371_v25 = vpop.f32.mrf.mxu2 }
  0xdc   : > { %v390_v26 = vadd.f32 %v371_v25, %v292_v4 }
  0xdd   : > { %v466_v28 = vpop.f32.mrf.mxu3  ;;  %v298_v29 = vpop.f32.mrf.mxu1 }
  0xde   : > { %v480_v30 = vadd.f32 %v461_v9, %v390_v26  ;;  %v299_v31 = vadd.f32 %v298_v29, %v237_v42 }
  0xe0   : > { %v558_v32 = vpop.f32.mrf.mxu0  ;;  %v1375_v22 = vadd.f32 %v551_v5, %v480_v30 }
  0xe3   : > { %v373_v34 = vpop.f32.mrf.mxu2 }
  0xe4   : > { %v391_v35 = vadd.f32 %v373_v34, %v294_v12 }
  0xe5   : > { %v468_v36 = vpop.f32.mrf.mxu3  ;;  %v301_v37 = vpop.f32.mrf.mxu1 }
  0xe6   : > { %v481_v38 = vadd.f32 %v463_v19, %v391_v35  ;;  %v302_v53 = vadd.f32 %v301_v37, %v1338_v15 }
  0xe8   : > { %v1377_v39 = vadd.f32 %v553_v13, %v481_v38  ;;  %v561_v33 = vpop.f32.mrf.mxu0 }
  0xeb   : > { %v376_v40 = vpop.f32.mrf.mxu2 }
  0xec   : > { %v392_v41 = vadd.f32 %v376_v40, %v297_v21 }
  0xed   : > { %v471_v43 = vpop.f32.mrf.mxu3  ;;  %v303_v44 = vpop.f32.mrf.mxu1 }
  0xee   : > { %v482_v45 = vadd.f32 %v466_v28, %v392_v41  ;;  %v304_v62 = vadd.f32 %v303_v44, %v1348_v27 }
  0xf0   : > { %v1379_v46 = vadd.f32 %v556_v23, %v482_v45  ;;  %v563_v42 = vpop.f32.mrf.mxu0 }
  0xf3   : > { %v378_v47 = vpop.f32.mrf.mxu2 }
  0xf4   : > { %v393_v48 = vadd.f32 %v378_v47, %v299_v31 }
  0xf5   : > { %v473_v49 = vpop.f32.mrf.mxu3  ;;  %v631_v50 = vpop.f32.mrf.mxu1 }
  0xf6   : > { %v483_v51 = vadd.f32 %v468_v36, %v393_v48  ;;  %v656_v15 = vadd.f32 %v631_v50, %v1364_v60 }
  0xf8   : > { %v1381_v52 = vadd.f32 %v558_v32, %v483_v51  ;;  %v901_v57 = vpop.f32.mrf.mxu0 }
  0xfb   : > { %v381_v54 = vpop.f32.mrf.mxu2 }
  0xfc   : > { %v394_v55 = vadd.f32 %v381_v54, %v302_v53 }
  0xfd   : > { %v811_v56 = vpop.f32.mrf.mxu3  ;;  %v633_v59 = vpop.f32.mrf.mxu1 }
  0xfe   : > { %v484_v58 = vadd.f32 %v471_v43, %v394_v55  ;;  %v657_v12 = vadd.f32 %v633_v59, %v1368_v6 }
 0x100   : > { %v1384_v61 = vadd.f32 %v561_v33, %v484_v58  ;;  %v903_v3 = vpop.f32.mrf.mxu0 }
 0x103   : > { %v383_v63 = vpop.f32.mrf.mxu2 }
 0x104   : > { %v395_v0 = vadd.f32 %v383_v63, %v304_v62 }
 0x105   : > { %v813_v1 = vpop.f32.mrf.mxu3  ;;  %v636_v5 = vpop.f32.mrf.mxu1 }
 0x106   : > { %v485_v2 = vadd.f32 %v473_v49, %v395_v0  ;;  %v658_v14 = vadd.f32 %v636_v5, %v1371_v16 }
 0x108   : > { %v1387_v4 = vadd.f32 %v563_v42, %v485_v2  ;;  %v906_v11 = vpop.f32.mrf.mxu0 }
 0x10b   : > { %v721_v7 = vpop.f32.mrf.mxu2 }
 0x10c   : > { %v746_v8 = vadd.f32 %v721_v7, %v656_v15 }
 0x10d   : > { %v816_v27 = vpop.f32.mrf.mxu3  ;;  %v638_v60 = vpop.f32.mrf.mxu1 }
 0x10e   : > { %v836_v9 = vadd.f32 %v811_v56, %v746_v8  ;;  %v659_v29 = vadd.f32 %v638_v60, %v1373_v24 }
 0x110   : > { %v926_v10 = vadd.f32 %v901_v57, %v836_v9  ;;  %v908_v23 = vpop.f32.mrf.mxu0 }
 0x112   : > { %937 = vst.msk [vmem:[%s1394_s28] sm:$0xff] %vm936_vm2, %v926_v10 }
 0x113   : > { %v723_v13 = vpop.f32.mrf.mxu2 }
 0x114   : > { %v747_v17 = vadd.f32 %v723_v13, %v657_v12 }
 0x115   : > { %v818_v20 = vpop.f32.mrf.mxu3  ;;  %v641_v26 = vpop.f32.mrf.mxu1 }
 0x116   : > { %v837_v18 = vadd.f32 %v813_v1, %v747_v17  ;;  %v660_v37 = vadd.f32 %v641_v26, %v1375_v22 }
 0x118   : > { %v927_v19 = vadd.f32 %v903_v3, %v837_v18  ;;  %v911_v34 = vpop.f32.mrf.mxu0 }
 0x11a   : > { %938 = vst.msk [vmem:[%s1394_s28 + $0x8] sm:$0xff] %vm936_vm2, %v927_v19 }
 0x11b   : > { %v726_v21 = vpop.f32.mrf.mxu2 }
 0x11c   : > { %v748_v25 = vadd.f32 %v726_v21, %v658_v14 }
 0x11d   : > { %v821_v31 = vpop.f32.mrf.mxu3  ;;  %v643_v16 = vpop.f32.mrf.mxu1 }
 0x11e   : > { %v838_v28 = vadd.f32 %v816_v27, %v748_v25  ;;  %v661_v45 = vadd.f32 %v643_v16, %v1377_v39 }
 0x120   : > { %v928_v6 = vadd.f32 %v906_v11, %v838_v28  ;;  %v913_v24 = vpop.f32.mrf.mxu0 }
 0x122   : > { %939 = vst.msk [vmem:[%s1394_s28 + $0x10] sm:$0xff] %vm936_vm2, %v928_v6 }
 0x123   : > { %v728_v30 = vpop.f32.mrf.mxu2 }
 0x124   : > { %v749_v32 = vadd.f32 %v728_v30, %v659_v29 }
 0x125   : > { %v823_v40 = vpop.f32.mrf.mxu3  ;;  %v646_v44 = vpop.f32.mrf.mxu1 }
 0x126   : > { %v839_v35 = vadd.f32 %v818_v20, %v749_v32  ;;  %v662_v51 = vadd.f32 %v646_v44, %v1379_v46 }
 0x128   : > { %v929_v36 = vadd.f32 %v908_v23, %v839_v35  ;;  %v916_v50 = vpop.f32.mrf.mxu0 }
 0x12a   : > { %940 = vst.msk [vmem:[%s1394_s28 + $0x18] sm:$0xff] %vm936_vm2, %v929_v36 }
 0x12b   : > { %v731_v38 = vpop.f32.mrf.mxu2 }
 0x12c   : > { %v750_v33 = vadd.f32 %v731_v38, %v660_v37 }
 0x12d   : > { %v826_v49 = vpop.f32.mrf.mxu3  ;;  %v648_v53 = vpop.f32.mrf.mxu1 }
 0x12e   : > { %v840_v41 = vadd.f32 %v821_v31, %v750_v33  ;;  %v663_v58 = vadd.f32 %v648_v53, %v1381_v52 }
 0x130   : > { %v930_v43 = vadd.f32 %v911_v34, %v840_v41  ;;  %v918_v59 = vpop.f32.mrf.mxu0 }
 0x132   : > { %941 = vst.msk [vmem:[%s1394_s28 + $0x20] sm:$0xff] %vm936_vm2, %v930_v43 }
 0x133   : > { %v733_v47 = vpop.f32.mrf.mxu2 }
 0x134   : > { %v751_v42 = vadd.f32 %v733_v47, %v661_v45 }
 0x135   : > { %v828_v39 = vpop.f32.mrf.mxu3  ;;  %v651_v0 = vpop.f32.mrf.mxu1 }
 0x136   : > { %v841_v48 = vadd.f32 %v823_v40, %v751_v42  ;;  %v664_v2 = vadd.f32 %v651_v0, %v1384_v61 }
 0x138   : > { %v931_v22 = vadd.f32 %v913_v24, %v841_v48  ;;  %v921_v7 = vpop.f32.mrf.mxu0 }
 0x13a   : > { %942 = vst.msk [vmem:[%s1394_s28 + $0x28] sm:$0xff] %vm936_vm2, %v931_v22 }
 0x13b   : > { %v736_v54 = vpop.f32.mrf.mxu2 }
 0x13c   : > { %v752_v55 = vadd.f32 %v736_v54, %v662_v51 }
 0x13d   : > { %v831_v3 = vpop.f32.mrf.mxu3  ;;  %v653_v52 = vpop.f32.mrf.mxu1 }
 0x13e   : > { %v842_v56 = vadd.f32 %v826_v49, %v752_v55  ;;  %v665_v27 = vadd.f32 %v653_v52, %v1387_v4 }
 0x140   : > { %v932_v57 = vadd.f32 %v916_v50, %v842_v56  ;;  %v923_v13 = vpop.f32.mrf.mxu0 }
 0x142   : > { %943 = vst.msk [vmem:[%s1394_s28 + $0x30] sm:$0xff] %vm936_vm2, %v932_v57 }
 0x143   : > { %v738_v62 = vpop.f32.mrf.mxu2 }
 0x144   : > { %v753_v63 = vadd.f32 %v738_v62, %v663_v58 }
 0x145   : > { %v833_v12 = vpop.f32.mrf.mxu3 }
 0x146   : > { %v843_v1 = vadd.f32 %v828_v39, %v753_v63 }
 0x148   : > { %v933_v46 = vadd.f32 %v918_v59, %v843_v1 }
 0x14a   : > { %944 = vst.msk [vmem:[%s1394_s28 + $0x38] sm:$0xff] %vm936_vm2, %v933_v46 }
 0x14b   : > { %v741_v5 = vpop.f32.mrf.mxu2 }
 0x14c   : > { %v754_v15 = vadd.f32 %v741_v5, %v664_v2 }
 0x14e   : > { %v844_v8 = vadd.f32 %v831_v3, %v754_v15 }
 0x150   : > { %v934_v9 = vadd.f32 %v921_v7, %v844_v8 }
 0x152   : > { %945 = vst.msk [vmem:[%s1394_s28 + $0x40] sm:$0xff] %vm936_vm2, %v934_v9 }
 0x153   : > { %v743_v10 = vpop.f32.mrf.mxu2 }
 0x154   : > { %v755_v11 = vadd.f32 %v743_v10, %v665_v27 }
 0x156   : > { %v845_v60 = vadd.f32 %v833_v12, %v755_v11 }
 0x158   : > { %v935_v61 = vadd.f32 %v923_v13, %v845_v60 }
 0x15a   : > { %946 = vst.msk [vmem:[%s1394_s28 + $0x48] sm:$0xff] %vm936_vm2, %v935_v61 }
 0x15b PF: > { %s12_s9 = sadd.s32 1, %s1147_s9  }
 0x15c   : > { %p9_p4 = scmp.ge.s32.totalorder %s12_s9, 4  }
 0x15e   :  { %11 = sbr.rel (!%p9_p4) target bundleno = 1 (0x1), region = 66 }

// kernel: deep_cnn300_forward.19
= control target key start
LH: loop header
LB: loop body
LE: loop exit
PB: predicated region body
PF: predicated region fallthrough
CT: control target
= control target key end

     0   :  { %vm58_vm0 = vcmask 130048   ;;  %vm104_vm1 = vcmask 195584   ;;  %s199_s3 = inlined_call_operand.vmem [shape: bf16[16,24], index: 3, kind: input, shape index: {}]   ;;  %s200_s0 = inlined_call_operand.vmem [shape: f32[32,16], index: 0, kind: input, shape index: {}]   ;;  %s201_s1 = inlined_call_operand.vmem [shape: f32[1,16], index: 1, kind: input, shape index: {}]   ;;  %s202_s2 = inlined_call_operand.vmem [shape: f32[1,16], index: 2, kind: input, shape index: {}]   ;;  %s203_s4 = inlined_call_operand.vmem [shape: f32[1,24], index: 4, kind: input, shape index: {}]   ;;  %s204_s5 = inlined_call_operand.vmem [shape: f32[1,24], index: 5, kind: input, shape index: {}]   ;;  %s205_s6 = inlined_call_operand.vmem [shape: f32[32,24], index: 6, kind: output, shape index: {}]  }
   0x1   :  { %v119_v0 = vld [vmem:[%s199_s3] sm:$0xff]  ;;  %v25_v2 = vld [vmem:[%s200_s0 + $0x8] sm:$0xff]  ;;  %v26_v5 = vld [vmem:[%s200_s0 + $0x10] sm:$0xff] }
   0x2   :  { %v24_v1 = vld [vmem:[%s200_s0] sm:$0xff]  ;;  %72 = vmatpush.bf16.msra.mxu0 %v119_v0  ;;  %120 = vmatpush.bf16.msra.mxu1 %v119_v0  ;;  %v27_v6 = vld [vmem:[%s200_s0 + $0x18] sm:$0xff] }
   0x3   :  { %v121_v3 = vld [vmem:[%s201_s1] ss:$0 sm:$0xff] }
   0x4   :  { %v122_v4 = vld [vmem:[%s202_s2] ss:$0 sm:$0xff]  ;;  %v32_v7 = vmul.f32 %v121_v3, %v24_v1  ;;  %v33_v8 = vmul.f32 %v121_v3, %v25_v2  ;;  %v34_v9 = vmul.f32 %v121_v3, %v26_v5  ;;  %v35_v10 = vmul.f32 %v121_v3, %v27_v6 }
   0x5   :  { %v123_v21 = vld [vmem:[%s203_s4] ss:$0 sm:$0xff] }
   0x6   :  { %v40_v11 = vadd.f32 %v122_v4, %v32_v7  ;;  %v41_v12 = vadd.f32 %v122_v4, %v33_v8  ;;  %v42_v13 = vadd.f32 %v122_v4, %v34_v9  ;;  %v43_v14 = vadd.f32 %v122_v4, %v35_v10  ;;  %v124_v22 = vld [vmem:[%s204_s5] ss:$0 sm:$0xff] }
   0x8   :  { %v44_v15 = vmax.f32 %v40_v11, 0.0  ;;  %v45_v16 = vmax.f32 %v41_v12, 0.0  ;;  %v46_v17 = vmax.f32 %v42_v13, 0.0  ;;  %v47_v18 = vmax.f32 %v43_v14, 0.0 }
   0xa   :  { %v48_v19 = vpack.c.bf16 %v45_v16, %v44_v15  ;;  %v49_v20 = vpack.c.bf16 %v47_v18, %v46_v17 }
   0xc   :  { %117 = vmatmul.msk.bf16.vlgmr.msra.gmra.mxu0 %vm58_vm0, %v48_v19  ;;  %118 = vmatmul.msk.bf16.vlgmr.msra.gmra.mxu1 %vm58_vm0, %v49_v20 }
  0x89   :  { %v74_v23 = vpop.f32.mrf.mxu0  ;;  %v79_v24 = vpop.f32.mrf.mxu1 }
  0x8a   :  { %v88_v25 = vmul.f32 %v123_v21, %v74_v23  ;;  %v90_v26 = vmul.f32 %v123_v21, %v79_v24 }
  0x8c   :  { %v96_v27 = vadd.f32 %v124_v22, %v88_v25  ;;  %v98_v28 = vadd.f32 %v124_v22, %v90_v26 }
  0x8e   :  { %v100_v29 = vmax.f32 %v96_v27, 0.0  ;;  %v102_v30 = vmax.f32 %v98_v28, 0.0 }
  0x90   :  { %105 = vst.msk [vmem:[%s205_s6] sm:$0xff] %vm104_vm1, %v100_v29 }
  0x91   :  { %107 = vst.msk [vmem:[%s205_s6 + $0x10] sm:$0xff] %vm104_vm1, %v102_v30  ;;  %v76_v31 = vpop.f32.mrf.mxu0  ;;  %v81_v32 = vpop.f32.mrf.mxu1 }
  0x92   :  { %v89_v33 = vmul.f32 %v123_v21, %v76_v31  ;;  %v91_v34 = vmul.f32 %v123_v21, %v81_v32 }
  0x94   :  { %v97_v35 = vadd.f32 %v124_v22, %v89_v33  ;;  %v99_v36 = vadd.f32 %v124_v22, %v91_v34 }
  0x96   :  { %v101_v37 = vmax.f32 %v97_v35, 0.0  ;;  %v103_v38 = vmax.f32 %v99_v36, 0.0 }
  0x98   :  { %106 = vst.msk [vmem:[%s205_s6 + $0x8] sm:$0xff] %vm104_vm1, %v101_v37 }
  0x99   :  { %108 = vst.msk [vmem:[%s205_s6 + $0x18] sm:$0xff] %vm104_vm1, %v103_v38 }

// kernel: deep_cnn300_forward.18
= control target key start
LH: loop header
LB: loop body
LE: loop exit
PB: predicated region body
PF: predicated region fallthrough
CT: control target
= control target key end

     0   :  { %vm133_vm0 = vcmask 261120   ;;  %vm159_vm1 = vcmask 130048   ;;  %s332_s6 = inlined_call_operand.vmem [shape: bf16[32,16], index: 6, kind: input, shape index: {}]   ;;  %s333_s0 = inlined_call_operand.vmem [shape: f32[32,32], index: 0, kind: input, shape index: {}]   ;;  %s334_s1 = inlined_call_operand.vmem [shape: f32[32,32], index: 1, kind: input, shape index: {}]   ;;  %s335_s4 = inlined_call_operand.vmem [shape: f32[1,32], index: 4, kind: input, shape index: {}]   ;;  %s336_s5 = inlined_call_operand.vmem [shape: f32[1,32], index: 5, kind: input, shape index: {}]   ;;  %s337_s2 = inlined_call_operand.vmem [shape: f32[32,32], index: 2, kind: input, shape index: {}]   ;;  %s338_s3 = inlined_call_operand.vmem [shape: f32[32,32], index: 3, kind: input, shape index: {}]   ;;  %s339_s7 = inlined_call_operand.vmem [shape: f32[32,16], index: 7, kind: output, shape index: {}]  }
   0x1   :  { %v179_v0 = vld [vmem:[%s332_s6 + $0x8] sm:$0xff]  ;;  %v178_v1 = vld [vmem:[%s332_s6] sm:$0xff]  ;;  %v31_v27 = vld [vmem:[%s333_s0 + $0x10] sm:$0xff] }
   0x2   :  { %v29_v2 = vld [vmem:[%s333_s0] sm:$0xff]  ;;  %v30_v3 = vld [vmem:[%s333_s0 + $0x8] sm:$0xff]  ;;  %146 = vmatpush.bf16.msra.mxu0 %v179_v0  ;;  %180 = vmatpush.bf16.msra.mxu1 %v179_v0  ;;  %v32_v28 = vld [vmem:[%s333_s0 + $0x18] sm:$0xff] }
   0x3   :  { %v239_v4 = vld [vmem:[%s335_s4] ss:$0 sm:$0xff]  ;;  %v52_v7 = vld [vmem:[%s334_s1 + $0x8] sm:$0xff]  ;;  %v53_v33 = vld [vmem:[%s334_s1 + $0x10] sm:$0xff] }
   0x4   :  { %v244_v5 = vld [vmem:[%s336_s5] ss:$0 sm:$0xff]  ;;  %v72_v9 = vld [vmem:[%s337_s2 + $0x8] sm:$0xff]  ;;  %v36_v10 = vmul.f32 %v239_v4, %v29_v2  ;;  %v37_v11 = vmul.f32 %v239_v4, %v30_v3  ;;  %v56_v13 = vmul.f32 %v239_v4, %v52_v7  ;;  %v54_v34 = vld [vmem:[%s334_s1 + $0x18] sm:$0xff]  ;;  %v38_v43 = vmul.f32 %v239_v4, %v31_v27 }
   0x5   :  { %v51_v6 = vld [vmem:[%s334_s1] sm:$0xff]  ;;  %v92_v15 = vld [vmem:[%s338_s3 + $0x8] sm:$0xff]  ;;  %v76_v17 = vmul.f32 %v239_v4, %v72_v9  ;;  %v73_v35 = vld [vmem:[%s337_s2 + $0x10] sm:$0xff]  ;;  %v39_v44 = vmul.f32 %v239_v4, %v32_v28  ;;  %v57_v46 = vmul.f32 %v239_v4, %v53_v33  ;;  %v58_v47 = vmul.f32 %v239_v4, %v54_v34 }
   0x6   :  { %v71_v8 = vld [vmem:[%s337_s2] sm:$0xff]  ;;  %v55_v12 = vmul.f32 %v239_v4, %v51_v6  ;;  %v96_v19 = vmul.f32 %v239_v4, %v92_v15  ;;  %147 = vmatpush.bf16.msra.mxu0 %v178_v1  ;;  %181 = vmatpush.bf16.msra.mxu1 %v178_v1  ;;  %v43_v20 = vadd.f32 %v244_v5, %v36_v10  ;;  %v74_v40 = vld [vmem:[%s337_s2 + $0x18] sm:$0xff]  ;;  %v93_v57 = vld [vmem:[%s338_s3 + $0x10] sm:$0xff] }
   0x7   :  { %v91_v14 = vld [vmem:[%s338_s3] sm:$0xff]  ;;  %v75_v16 = vmul.f32 %v239_v4, %v71_v8  ;;  %v44_v21 = vadd.f32 %v244_v5, %v37_v11  ;;  %v60_v23 = vadd.f32 %v244_v5, %v56_v13  ;;  %v80_v25 = vadd.f32 %v244_v5, %v76_v17  ;;  %v94_v58 = vld [vmem:[%s338_s3 + $0x18] sm:$0xff] }
   0x8   :  { %v95_v18 = vmul.f32 %v239_v4, %v91_v14  ;;  %v59_v22 = vadd.f32 %v244_v5, %v55_v12  ;;  %v47_v29 = vmax.f32 %v43_v20, 0.0  ;;  %v100_v32 = vadd.f32 %v244_v5, %v96_v19 }
   0x9   :  { %v79_v24 = vadd.f32 %v244_v5, %v75_v16  ;;  %v48_v30 = vmax.f32 %v44_v21, 0.0  ;;  %v64_v36 = vmax.f32 %v60_v23, 0.0  ;;  %v84_v38 = vmax.f32 %v80_v25, 0.0 }
   0xa   :  { %v99_v26 = vadd.f32 %v244_v5, %v95_v18  ;;  %v63_v31 = vmax.f32 %v59_v22, 0.0  ;;  %v104_v42 = vmax.f32 %v100_v32, 0.0  ;;  %v77_v48 = vmul.f32 %v239_v4, %v73_v35 }
   0xb   :  { %v83_v37 = vmax.f32 %v79_v24, 0.0  ;;  %v68_v45 = vadd.f32 %v64_v36, %v48_v30  ;;  %v45_v50 = vadd.f32 %v244_v5, %v38_v43  ;;  %v46_v51 = vadd.f32 %v244_v5, %v39_v44 }
   0xc   :  { %v103_v39 = vmax.f32 %v99_v26, 0.0  ;;  %v67_v41 = vadd.f32 %v63_v31, %v47_v29  ;;  %v78_v52 = vmul.f32 %v239_v4, %v74_v40  ;;  %v61_v54 = vadd.f32 %v244_v5, %v57_v46 }
   0xd   :  { %v88_v53 = vadd.f32 %v84_v38, %v68_v45  ;;  %v62_v55 = vadd.f32 %v244_v5, %v58_v47  ;;  %v81_v56 = vadd.f32 %v244_v5, %v77_v48  ;;  %v49_v60 = vmax.f32 %v45_v50, 0.0 }
   0xe   :  { %v87_v49 = vadd.f32 %v83_v37, %v67_v41  ;;  %v50_v61 = vmax.f32 %v46_v51, 0.0  ;;  %v82_v62 = vadd.f32 %v244_v5, %v78_v52  ;;  %v65_v0 = vmax.f32 %v61_v54, 0.0 }
   0xf   :  { %v108_v63 = vadd.f32 %v104_v42, %v88_v53  ;;  %v66_v1 = vmax.f32 %v62_v55, 0.0  ;;  %v85_v2 = vmax.f32 %v81_v56, 0.0  ;;  %v97_v7 = vmul.f32 %v239_v4, %v93_v57 }
  0x10   :  { %v107_v59 = vadd.f32 %v103_v39, %v87_v49  ;;  %v86_v6 = vmax.f32 %v82_v62, 0.0  ;;  %v98_v8 = vmul.f32 %v239_v4, %v94_v58  ;;  %v69_v10 = vadd.f32 %v65_v0, %v49_v60 }
  0x11   :  { %v112_v9 = vmul.f32 0.25, %v108_v63  ;;  %v70_v11 = vadd.f32 %v66_v1, %v50_v61  ;;  %v101_v12 = vadd.f32 %v244_v5, %v97_v7 }
  0x12   :  { %v111_v3 = vmul.f32 0.25, %v107_v59  ;;  %v102_v13 = vadd.f32 %v244_v5, %v98_v8  ;;  %v89_v15 = vadd.f32 %v85_v2, %v69_v10 }
  0x13   :  { %v90_v16 = vadd.f32 %v86_v6, %v70_v11  ;;  %v105_v17 = vmax.f32 %v101_v12, 0.0 }
  0x14   :  { %v115_v14 = vpack.c.bf16 %v112_v9, %v111_v3  ;;  %v106_v18 = vmax.f32 %v102_v13, 0.0 }
  0x15   :  { %v109_v19 = vadd.f32 %v105_v17, %v89_v15 }
  0x16   :  { %176 = vmatmul.msk.bf16.vlgmr.msra.gmra.mxu0 %vm133_vm0, %v115_v14  ;;  %v110_v20 = vadd.f32 %v106_v18, %v90_v16 }
  0x17   :  { %v113_v21 = vmul.f32 0.25, %v109_v19 }
  0x18   :  { %v114_v22 = vmul.f32 0.25, %v110_v20 }
  0x1a   :  { %v116_v23 = vpack.c.bf16 %v114_v22, %v113_v21 }
  0x1c   :  { %177 = vmatmul.msk.bf16.vlgmr.msra.gmra.mxu1 %vm133_vm0, %v116_v23 }
  0x93   :  { %v149_v4 = vpop.f32.mrf.mxu0 }
  0x94   :  { %160 = vst.msk [vmem:[%s339_s7] sm:$0xff] %vm159_vm1, %v149_v4 }
  0x99   :  { %v154_v24 = vpop.f32.mrf.mxu1 }
  0x9a   :  { %162 = vst.msk [vmem:[%s339_s7 + $0x10] sm:$0xff] %vm159_vm1, %v154_v24 }
  0x9b   :  { %v151_v5 = vpop.f32.mrf.mxu0 }
  0x9c   :  { %161 = vst.msk [vmem:[%s339_s7 + $0x8] sm:$0xff] %vm159_vm1, %v151_v5 }
  0xa1   :  { %v156_v25 = vpop.f32.mrf.mxu1 }
  0xa2   :  { %163 = vst.msk [vmem:[%s339_s7 + $0x18] sm:$0xff] %vm159_vm1, %v156_v25 }

// kernel: deep_cnn300_forward.21
= control target key start
LH: loop header
LB: loop body
LE: loop exit
PB: predicated region body
PF: predicated region fallthrough
CT: control target
= control target key end

     0   :  { %vm69_vm0 = vcmask 1043456   ;;  %vm62_vm1 = vcmask 195584   ;;  %s216_s3 = inlined_call_operand.vmem [shape: bf16[24,24], index: 3, kind: input, shape index: {}]   ;;  %s217_s0 = inlined_call_operand.vmem [shape: f32[32,24], index: 0, kind: input, shape index: {}]   ;;  %s218_s1 = inlined_call_operand.vmem [shape: f32[1,24], index: 1, kind: input, shape index: {}]   ;;  %s219_s2 = inlined_call_operand.vmem [shape: f32[1,24], index: 2, kind: input, shape index: {}]   ;;  %s220_s4 = inlined_call_operand.vmem [shape: f32[1,24], index: 4, kind: input, shape index: {}]   ;;  %s221_s5 = inlined_call_operand.vmem [shape: f32[1,24], index: 5, kind: input, shape index: {}]   ;;  %s222_s6 = inlined_call_operand.vmem [shape: f32[32,24], index: 6, kind: output, shape index: {}]  }
   0x1   :  { %v52_v0 = vld [vmem:[%s216_s3 + $0x8] sm:$0xf]  ;;  %v24_v1 = vld [vmem:[%s217_s0] sm:$0xff]  ;;  %v26_v6 = vld [vmem:[%s217_s0 + $0x10] sm:$0xff] }
   0x2   :  { %v58_v2 = vunpack.c.l.b16 %v52_v0  ;;  %v25_v3 = vld [vmem:[%s217_s0 + $0x8] sm:$0xff]  ;;  %v129_v4 = vld [vmem:[%s218_s1] ss:$0 sm:$0xff]  ;;  %v27_v10 = vld [vmem:[%s217_s0 + $0x18] sm:$0xff] }
   0x3   :  { %v130_v5 = vld [vmem:[%s219_s2] ss:$0 sm:$0xff]  ;;  %v32_v8 = vmul.f32 %v129_v4, %v24_v1  ;;  %v33_v9 = vmul.f32 %v129_v4, %v25_v3  ;;  %v34_v11 = vmul.f32 %v129_v4, %v26_v6  ;;  %v35_v12 = vmul.f32 %v129_v4, %v27_v10 }
   0x4   :  { %v60_v7 = vpack.c.b16 %v58_v2, %v58_v2  ;;  %v126_v17 = vld [vmem:[%s216_s3] sm:$0xff] }
   0x5   :  { %v40_v14 = vadd.f32 %v130_v5, %v32_v8  ;;  %v41_v15 = vadd.f32 %v130_v5, %v33_v9  ;;  %v42_v16 = vadd.f32 %v130_v5, %v34_v11  ;;  %v43_v18 = vadd.f32 %v130_v5, %v35_v12  ;;  %v131_v25 = vld [vmem:[%s220_s4] ss:$0 sm:$0xff] }
   0x6   :  { %v71_v13 = vsel %vm69_vm0, %v60_v7, 0  ;;  %v132_v26 = vld [vmem:[%s221_s5] ss:$0 sm:$0xff] }
   0x7   :  { %79 = vmatpush.bf16.msra.mxu0 %v71_v13  ;;  %127 = vmatpush.bf16.msra.mxu1 %v71_v13  ;;  %v44_v19 = vmax.f32 %v40_v14, 0.0  ;;  %v45_v20 = vmax.f32 %v41_v15, 0.0  ;;  %v46_v21 = vmax.f32 %v42_v16, 0.0  ;;  %v47_v22 = vmax.f32 %v43_v18, 0.0 }
   0x9   :  { %v48_v23 = vpack.c.bf16 %v45_v20, %v44_v19  ;;  %v49_v24 = vpack.c.bf16 %v47_v22, %v46_v21 }
   0xb   :  { %80 = vmatpush.bf16.msra.mxu0 %v126_v17  ;;  %128 = vmatpush.bf16.msra.mxu1 %v126_v17 }
   0xe   :  { %124 = vmatmul.msk.bf16.vlgmr.msra.gmra.mxu0 %vm62_vm1, %v48_v23  ;;  %125 = vmatmul.msk.bf16.vlgmr.msra.gmra.mxu1 %vm62_vm1, %v49_v24 }
  0x8b   :  { %v82_v27 = vpop.f32.mrf.mxu0  ;;  %v87_v28 = vpop.f32.mrf.mxu1 }
  0x8c   :  { %v96_v29 = vmul.f32 %v131_v25, %v82_v27  ;;  %v98_v30 = vmul.f32 %v131_v25, %v87_v28 }
  0x8e   :  { %v104_v31 = vadd.f32 %v132_v26, %v96_v29  ;;  %v106_v32 = vadd.f32 %v132_v26, %v98_v30 }
  0x90   :  { %v108_v33 = vmax.f32 %v104_v31, 0.0  ;;  %v110_v34 = vmax.f32 %v106_v32, 0.0 }
  0x92   :  { %112 = vst.msk [vmem:[%s222_s6] sm:$0xff] %vm62_vm1, %v108_v33 }
  0x93   :  { %114 = vst.msk [vmem:[%s222_s6 + $0x10] sm:$0xff] %vm62_vm1, %v110_v34  ;;  %v84_v35 = vpop.f32.mrf.mxu0  ;;  %v89_v36 = vpop.f32.mrf.mxu1 }
  0x94   :  { %v97_v37 = vmul.f32 %v131_v25, %v84_v35  ;;  %v99_v38 = vmul.f32 %v131_v25, %v89_v36 }
  0x96   :  { %v105_v39 = vadd.f32 %v132_v26, %v97_v37  ;;  %v107_v40 = vadd.f32 %v132_v26, %v99_v38 }
  0x98   :  { %v109_v41 = vmax.f32 %v105_v39, 0.0  ;;  %v111_v42 = vmax.f32 %v107_v40, 0.0 }
  0x9a   :  { %113 = vst.msk [vmem:[%s222_s6 + $0x8] sm:$0xff] %vm62_vm1, %v109_v41 }
  0x9b   :  { %115 = vst.msk [vmem:[%s222_s6 + $0x18] sm:$0xff] %vm62_vm1, %v111_v42 }

// kernel: deep_cnn300_forward.20
= control target key start
LH: loop header
LB: loop body
LE: loop exit
PB: predicated region body
PF: predicated region fallthrough
CT: control target
= control target key end

     0   :  { %s762_s9 = smov 0   ;;  %s896_s0 = inlined_call_operand.vmem [shape: f32[2,42,24], index: 0, kind: input, shape index: {}]   ;;  %s897_s1 = inlined_call_operand.vmem [shape: bf16[9,24,8], index: 1, kind: input, shape index: {}]   ;;  %s898_s2 = inlined_call_operand.vmem [shape: f32[2,24,8], index: 2, kind: output, shape index: {}]  }
   0x1 LB: > { %s631_s10 = sadd.s32 4294967295, %s745_s9   ;;  %p635_p0 = scmp.ge.s32.totalorder %s745_s9, 1  ;;  %s745_s9 = sphi %s762_s9, %s12_s9  }
   0x2   : > { %p112_p1 = scmp.lt.s32.totalorder %s745_s9, 3 }
   0x4   : > { %p113_p2 = pnand %p635_p0, %p112_p1 }
   0x5   : > { %p134_p3 = scmp.lt.s32.totalorder (!%p113_p2), %s631_s10, 1 }
   0x6   : > { %116 = sbr.rel (%p113_p2) target bundleno = 224 (0xe0), region = 28 }
   0xb   : > { %v640_v0 = vld [vmem:[%s897_s1 + $0x14] sm:$0xf]  ;;  %v655_v1 = vld [vmem:[%s897_s1 + $0x20] sm:$0xf]  ;;  %v664_v4 = vld [vmem:[%s897_s1 + $0x2c] sm:$0xf] }
   0xc   : > { %v167_v2 = vunpack.c.l.b16 %v640_v0  ;;  %v250_v3 = vunpack.c.l.b16 %v655_v1  ;;  %v152_v5 = vld [vmem:[%s897_s1 + $0x8] sm:$0xf]  ;;  %vm178_vm0 = vcmask 1043456   ;;  %v298_v6 = vunpack.c.l.b16 %v664_v4  ;;  %v673_v8 = vld [vmem:[%s897_s1 + $0x38] sm:$0xf]  ;;  %s900_s10 = smov (!%p134_p3, %s631_s10), 1 }
   0xd   : > { %v205_v7 = vunpack.c.l.b16 %v152_v5  ;;  %v346_v11 = vunpack.c.l.b16 %v673_v8  ;;  %v691_v12 = vld [vmem:[%s897_s1 + $0x50] sm:$0xf]  ;;  %v700_v16 = vld [vmem:[%s897_s1 + $0x5c] sm:$0xf]  ;;  %v682_v17 = vld [vmem:[%s897_s1 + $0x44] sm:$0xf] }
   0xe   : > { %v169_v9 = vpack.c.b16 %v167_v2, %v167_v2  ;;  %v252_v10 = vpack.c.b16 %v250_v3, %v250_v3  ;;  %v300_v13 = vpack.c.b16 %v298_v6, %v298_v6  ;;  %v442_v15 = vunpack.c.l.b16 %v691_v12  ;;  %v709_v18 = vld [vmem:[%s897_s1 + $0x68] sm:$0xf]  ;;  %s729_s29 = smul.u32 48, %s900_s10  ;;  %v719_v24 = vld [vmem:[%s897_s1 + $0xc] sm:$0xff]  ;;  %v720_v26 = vld [vmem:[%s897_s1 + $0x18] sm:$0xff] }
   0xf   : > { %v207_v14 = vpack.c.b16 %v205_v7, %v205_v7  ;;  %v348_v21 = vpack.c.b16 %v346_v11, %v346_v11  ;;  %v490_v22 = vunpack.c.l.b16 %v700_v16  ;;  %v394_v25 = vunpack.c.l.b16 %v682_v17  ;;  %v721_v27 = vld [vmem:[%s897_s1 + $0x24] sm:$0xff]  ;;  %v722_v48 = vld [vmem:[%s897_s1 + $0x30] sm:$0xff]  ;;  %v723_v54 = vld [vmem:[%s897_s1 + $0x3c] sm:$0xff]  ;;  %s730_s25 = smul.u32 24, %s900_s10 }
  0x10   : > { %v180_v19 = vsel %vm178_vm0, %v169_v9, 0  ;;  %v261_v20 = vsel %vm178_vm0, %v252_v10, 0  ;;  %v309_v23 = vsel %vm178_vm0, %v300_v13, 0  ;;  %s809_s6 = scalar_lea.vmem %s896_s0, %s729_s29  ;;  %v538_v29 = vunpack.c.l.b16 %v709_v18  ;;  %v718_v46 = vld [vmem:[%s897_s1] sm:$0xff]  ;;  %v725_v52 = vld [vmem:[%s897_s1 + $0x54] sm:$0xff]  ;;  %v724_v53 = vld [vmem:[%s897_s1 + $0x48] sm:$0xff] }
  0x11   : > { %188 = vmatpush.bf16.msra.mxu0 %v180_v19  ;;  %727 = vmatpush.bf16.msra.mxu1 %v180_v19  ;;  %v492_v28 = vpack.c.b16 %v490_v22, %v490_v22  ;;  %v153_v30 = vld [vmem:[%s809_s6 + $0x1] sm:$0xff]  ;;  %v154_v31 = vld [vmem:[%s809_s6 + $0x9] sm:$0xff]  ;;  %v155_v32 = vld [vmem:[%s809_s6 + $0x11] sm:$0xff]  ;;  %v216_v33 = vsel %vm178_vm0, %v207_v14, 0  ;;  %v357_v36 = vsel %vm178_vm0, %v348_v21, 0  ;;  %v444_v40 = vpack.c.b16 %v442_v15, %v442_v15  ;;  %s143_s28 = scalar_lea.vmem %s898_s2, %s730_s25 }
  0x12   : > { %269 = vmatpush.bf16.msra.mxu2 %v261_v20  ;;  %317 = vmatpush.bf16.msra.mxu3 %v309_v23  ;;  %v156_v34 = vpack.c.bf16 %v154_v31, %v153_v30  ;;  %v157_v35 = vpack.c.bf16 %v155_v32, %v155_v32  ;;  %v236_v37 = vld [vmem:[%s809_s6 + $0x2] sm:$0xff]  ;;  %v237_v38 = vld [vmem:[%s809_s6 + $0xa] sm:$0xff]  ;;  %vm171_vm1 = vcmask 195584   ;;  %v396_v43 = vpack.c.b16 %v394_v25, %v394_v25  ;;  %v238_v60 = vld [vmem:[%s809_s6 + $0x12] sm:$0xff] }
  0x13   : > { %v284_v39 = vld [vmem:[%s809_s6 + $0x6] sm:$0xff]  ;;  %v239_v41 = vpack.c.bf16 %v237_v38, %v236_v37  ;;  %v826_v42 = vld [vmem:[%s809_s6 + $0xe] sm:$0xff]  ;;  %v540_v44 = vpack.c.b16 %v538_v29, %v538_v29  ;;  %v501_v47 = vsel %vm178_vm0, %v492_v28, 0  ;;  %v453_v49 = vsel %vm178_vm0, %v444_v40, 0  ;;  %v286_v61 = vld [vmem:[%s809_s6 + $0x16] sm:$0xff] }
  0x14   : > { %v287_v45 = vpack.c.bf16 %v826_v42, %v284_v39  ;;  %v405_v50 = vsel %vm178_vm0, %v396_v43, 0  ;;  %v726_v55 = vld [vmem:[%s897_s1 + $0x60] sm:$0xff]  ;;  %v146_v57 = vld [vmem:[%s809_s6 + $0x8] sm:$0xff]  ;;  %v240_v0 = vpack.c.bf16 %v238_v60, %v238_v60  ;;  %v288_v1 = vpack.c.bf16 %v286_v61, %v286_v61  ;;  %v147_v2 = vld [vmem:[%s809_s6 + $0x10] sm:$0xff] }
  0x15   : > { %189 = vmatpush.bf16.msra.mxu0 %v719_v24  ;;  %728 = vmatpush.bf16.msra.mxu1 %v719_v24  ;;  %v549_v51 = vsel %vm178_vm0, %v540_v44, 0  ;;  %v145_v56 = vld [vmem:[%s809_s6] sm:$0xff]  ;;  %v333_v59 = vld [vmem:[%s809_s6 + $0xf] sm:$0xff]  ;;  %v334_v3 = vld [vmem:[%s809_s6 + $0x17] sm:$0xff]  ;;  %v149_v8 = vpack.c.bf16 %v147_v2, %v147_v2  ;;  %v383_v14 = vpack.c.bf16 %v147_v2, %v146_v57  ;;  %v527_v15 = vpack.c.bf16 %v286_v61, %v826_v42 }
  0x16   : > { %270 = vmatpush.bf16.msra.mxu2 %v720_v26  ;;  %318 = vmatpush.bf16.msra.mxu3 %v721_v27  ;;  %v332_v58 = vld [vmem:[%s809_s6 + $0x7] sm:$0xff]  ;;  %v148_v62 = vpack.c.bf16 %v146_v57, %v145_v56  ;;  %v429_v5 = vld [vmem:[%s809_s6 + $0x14] sm:$0xff]  ;;  %v336_v9 = vpack.c.bf16 %v334_v3, %v334_v3  ;;  %v430_v12 = vld [vmem:[%s809_s6 + $0x1c] sm:$0xff]  ;;  %vm572_vm2 = vcmask 64512  }
  0x17   : > { %v335_v63 = vpack.c.bf16 %v333_v59, %v332_v58  ;;  %v428_v4 = vld [vmem:[%s809_s6 + $0xc] sm:$0xff]  ;;  %v477_v7 = vld [vmem:[%s809_s6 + $0x15] sm:$0xff]  ;;  %v478_v13 = vld [vmem:[%s809_s6 + $0x1d] sm:$0xff]  ;;  %v432_v16 = vpack.c.bf16 %v430_v12, %v430_v12 }
  0x18   : > { %645 = vmatmul.msk.bf16.vlgmr.msra.gmra.mxu0 %vm171_vm1, %v156_v34  ;;  %646 = vmatmul.msk.bf16.vlgmr.msra.gmra.mxu1 %vm171_vm1, %v157_v35  ;;  %v476_v6 = vld [vmem:[%s809_s6 + $0xd] sm:$0xff]  ;;  %v431_v10 = vpack.c.bf16 %v429_v5, %v428_v4  ;;  %v480_v17 = vpack.c.bf16 %v478_v13, %v478_v13  ;;  %v382_v18 = vld [vmem:[%s809_s6 + $0x18] sm:$0xff] }
  0x19   : > { %224 = vmatpush.bf16.msrb.mxu1 %v216_v33  ;;  %365 = vmatpush.bf16.msrb.mxu0 %v357_v36  ;;  %v479_v11 = vpack.c.bf16 %v477_v7, %v476_v6  ;;  %v526_v19 = vld [vmem:[%s809_s6 + $0x1e] sm:$0xff]  ;;  %v384_v20 = vpack.c.bf16 %v382_v18, %v382_v18 }
  0x1a   : > { %660 = vmatmul.msk.bf16.vlgmr.msra.gmra.mxu2 %vm171_vm1, %v239_v41  ;;  %509 = vmatpush.bf16.msrb.mxu3 %v501_v47  ;;  %v528_v21 = vpack.c.bf16 %v526_v19, %v526_v19 }
  0x1b   : > { %669 = vmatmul.msk.bf16.vlgmr.msra.gmra.mxu3 %vm171_vm1, %v287_v45  ;;  %461 = vmatpush.bf16.msrb.mxu2 %v453_v49 }
  0x1d   : > { %225 = vmatpush.bf16.msrb.mxu1 %v718_v46  ;;  %366 = vmatpush.bf16.msrb.mxu0 %v722_v48 }
  0x1e   : > { %510 = vmatpush.bf16.msrb.mxu3 %v725_v52 }
  0x1f   : > { %462 = vmatpush.bf16.msrb.mxu2 %v724_v53 }
  0x21   : > { %413 = vmatpush.bf16.msra.mxu1 %v405_v50  ;;  %557 = vmatpush.bf16.msra.mxu0 %v549_v51 }
  0x25   : > { %414 = vmatpush.bf16.msra.mxu1 %v723_v54  ;;  %558 = vmatpush.bf16.msra.mxu0 %v726_v55 }
  0x28   : > { %651 = vmatmul.msk.bf16.vlgmr.msrb.gmra.mxu1 %vm171_vm1, %v148_v62  ;;  %678 = vmatmul.msk.bf16.vlgmr.msrb.gmra.mxu0 %vm171_vm1, %v335_v63 }
  0x2a   : > { %661 = vmatmul.msk.bf16.gmra.mxu2 %vm171_vm1, %v240_v0 }
  0x2b   : > { %670 = vmatmul.msk.bf16.gmra.mxu3 %vm171_vm1, %v288_v1 }
  0x38   : > { %652 = vmatmul.msk.bf16.gmra.mxu1 %vm171_vm1, %v149_v8  ;;  %679 = vmatmul.msk.bf16.gmra.mxu0 %vm171_vm1, %v336_v9 }
  0x3a   : > { %696 = vmatmul.msk.bf16.vlgmr.msrb.gmra.mxu2 %vm171_vm1, %v431_v10 }
  0x3b   : > { %705 = vmatmul.msk.bf16.vlgmr.msrb.gmra.mxu3 %vm171_vm1, %v479_v11 }
  0x48   : > { %687 = vmatmul.msk.bf16.vlgmr.msra.gmra.mxu1 %vm171_vm1, %v383_v14  ;;  %714 = vmatmul.msk.bf16.vlgmr.msra.gmra.mxu0 %vm171_vm1, %v527_v15 }
  0x4a   : > { %697 = vmatmul.msk.bf16.gmra.mxu2 %vm171_vm1, %v432_v16 }
  0x4b   : > { %706 = vmatmul.msk.bf16.gmra.mxu3 %vm171_vm1, %v480_v17 }
  0x58   : > { %688 = vmatmul.msk.bf16.gmra.mxu1 %vm171_vm1, %v384_v20  ;;  %715 = vmatmul.msk.bf16.gmra.mxu0 %vm171_vm1, %v528_v21 }
  0x95   : > { %v191_v22 = vpop.f32.mrf.mxu0  ;;  %v196_v23 = vpop.f32.mrf.mxu1 }
  0x9d   : > { %v272_v24 = vpop.f32.mrf.mxu2  ;;  %v193_v25 = vpop.f32.mrf.mxu0 }
  0x9e   : > { %v198_v26 = vpop.f32.mrf.mxu1  ;;  %v320_v27 = vpop.f32.mrf.mxu3 }
  0xa5   : > { %v274_v28 = vpop.f32.mrf.mxu2  ;;  %v368_v30 = vpop.f32.mrf.mxu0 }
  0xa6   : > { %v227_v29 = vpop.f32.mrf.mxu1  ;;  %v322_v31 = vpop.f32.mrf.mxu3 }
  0xa7   : > { %v228_v40 = vadd.f32 %v227_v29, %v191_v22 }
  0xa9   : > { %v281_v41 = vadd.f32 %v272_v24, %v228_v40 }
  0xab   : > { %v329_v46 = vadd.f32 %v320_v27, %v281_v41 }
  0xad   : > { %v277_v32 = vpop.f32.mrf.mxu2  ;;  %v370_v34 = vpop.f32.mrf.mxu0  ;;  %v377_v48 = vadd.f32 %v368_v30, %v329_v46 }
  0xae   : > { %v229_v33 = vpop.f32.mrf.mxu1  ;;  %v325_v35 = vpop.f32.mrf.mxu3 }
  0xaf   : > { %v230_v47 = vadd.f32 %v229_v33, %v193_v25 }
  0xb1   : > { %v282_v49 = vadd.f32 %v274_v28, %v230_v47 }
  0xb3   : > { %v330_v55 = vadd.f32 %v322_v31, %v282_v49 }
  0xb5   : > { %v279_v36 = vpop.f32.mrf.mxu2  ;;  %v373_v38 = vpop.f32.mrf.mxu0  ;;  %v378_v59 = vadd.f32 %v370_v34, %v330_v55 }
  0xb6   : > { %v232_v37 = vpop.f32.mrf.mxu1  ;;  %v327_v39 = vpop.f32.mrf.mxu3 }
  0xb7   : > { %v233_v56 = vadd.f32 %v232_v37, %v196_v23 }
  0xb9   : > { %v283_v60 = vadd.f32 %v277_v32, %v233_v56 }
  0xbb   : > { %v331_v3 = vadd.f32 %v325_v35, %v283_v60 }
  0xbd   : > { %v464_v42 = vpop.f32.mrf.mxu2  ;;  %v375_v44 = vpop.f32.mrf.mxu0  ;;  %v379_v6 = vadd.f32 %v373_v38, %v331_v3 }
  0xbe   : > { %v234_v43 = vpop.f32.mrf.mxu1  ;;  %v512_v45 = vpop.f32.mrf.mxu3 }
  0xc5   : > { %v466_v50 = vpop.f32.mrf.mxu2  ;;  %v560_v52 = vpop.f32.mrf.mxu0 }
  0xc6   : > { %v416_v51 = vpop.f32.mrf.mxu1  ;;  %v514_v54 = vpop.f32.mrf.mxu3 }
  0xc7   : > { %v425_v53 = vadd.f32 %v416_v51, %v377_v48 }
  0xc9   : > { %v473_v57 = vadd.f32 %v464_v42, %v425_v53 }
  0xcb   : > { %v521_v58 = vadd.f32 %v512_v45, %v473_v57 }
  0xcd   : > { %v569_v61 = vadd.f32 %v560_v52, %v521_v58  ;;  %v469_v62 = vpop.f32.mrf.mxu2  ;;  %v562_v0 = vpop.f32.mrf.mxu0 }
  0xce   : > { %v418_v63 = vpop.f32.mrf.mxu1  ;;  %v517_v2 = vpop.f32.mrf.mxu3 }
  0xcf   : > { %573 = vst.msk [vmem:[%s143_s28] sm:$0xff] %vm572_vm2, %v569_v61  ;;  %v426_v1 = vadd.f32 %v418_v63, %v378_v59 }
  0xd1   : > { %v474_v4 = vadd.f32 %v466_v50, %v426_v1 }
  0xd3   : > { %v522_v5 = vadd.f32 %v514_v54, %v474_v4 }
  0xd5   : > { %v570_v7 = vadd.f32 %v562_v0, %v522_v5  ;;  %v471_v8 = vpop.f32.mrf.mxu2  ;;  %v565_v10 = vpop.f32.mrf.mxu0 }
  0xd6   : > { %v421_v9 = vpop.f32.mrf.mxu1  ;;  %v519_v12 = vpop.f32.mrf.mxu3 }
  0xd7   : > { %574 = vst.msk [vmem:[%s143_s28 + $0x8] sm:$0xff] %vm572_vm2, %v570_v7  ;;  %v427_v11 = vadd.f32 %v421_v9, %v379_v6 }
  0xd9   : > { %v475_v13 = vadd.f32 %v469_v62, %v427_v11 }
  0xdb   : > { %v523_v14 = vadd.f32 %v517_v2, %v475_v13 }
  0xdd   : > { %v571_v15 = vadd.f32 %v565_v10, %v523_v14  ;;  %v567_v17 = vpop.f32.mrf.mxu0 }
  0xde   : > { %v423_v16 = vpop.f32.mrf.mxu1 }
  0xdf   : > { %575 = vst.msk [vmem:[%s143_s28 + $0x10] sm:$0xff] %vm572_vm2, %v571_v15 }
  0xe0 PF: > { %s12_s9 = sadd.s32 1, %s745_s9  }
  0xe1   : > { %p9_p4 = scmp.ge.s32.totalorder %s12_s9, 4  }
  0xe3   :  { %11 = sbr.rel (!%p9_p4) target bundleno = 1 (0x1), region = 66 }

// kernel: deep_cnn300_forward.23
= control target key start
LH: loop header
LB: loop body
LE: loop exit
PB: predicated region body
PF: predicated region fallthrough
CT: control target
= control target key end

     0   :  { %s226_s0 = inlined_call_operand.vmem [shape: f32[32,32], index: 0, kind: input, shape index: {}]   ;;  %s227_s1 = inlined_call_operand.vmem [shape: f32[1,32], index: 1, kind: input, shape index: {}]   ;;  %s228_s2 = inlined_call_operand.vmem [shape: f32[1,32], index: 2, kind: input, shape index: {}]   ;;  %s229_s3 = inlined_call_operand.vmem [shape: bf16[32,16], index: 3, kind: input, shape index: {}]   ;;  %s230_s4 = inlined_call_operand.vmem [shape: f32[1,16], index: 4, kind: input, shape index: {}]   ;;  %s231_s5 = inlined_call_operand.vmem [shape: f32[1,16], index: 5, kind: input, shape index: {}]   ;;  %s232_s6 = inlined_call_operand.hbm [shape: f32[32,16], index: 6, kind: output, shape index: {}]  }
   0x1   :  { %v127_v0 = vld [vmem:[%s229_s3 + $0x8] sm:$0xff]  ;;  %v126_v1 = vld [vmem:[%s229_s3] sm:$0xff]  ;;  %v27_v6 = vld [vmem:[%s226_s0 + $0x10] sm:$0xff] }
   0x2   :  { %v25_v2 = vld [vmem:[%s226_s0] sm:$0xff]  ;;  %v26_v3 = vld [vmem:[%s226_s0 + $0x8] sm:$0xff]  ;;  %80 = vmatpush.bf16.msra.mxu0 %v127_v0  ;;  %128 = vmatpush.bf16.msra.mxu1 %v127_v0  ;;  %v28_v9 = vld [vmem:[%s226_s0 + $0x18] sm:$0xff] }
   0x3   :  { %v133_v4 = vld [vmem:[%s227_s1] ss:$0 sm:$0xff] }
   0x4   :  { %v134_v5 = vld [vmem:[%s228_s2] ss:$0 sm:$0xff]  ;;  %v33_v7 = vmul.f32 %v133_v4, %v25_v2  ;;  %v34_v8 = vmul.f32 %v133_v4, %v26_v3  ;;  %v35_v10 = vmul.f32 %v133_v4, %v27_v6 }
   0x5   :  { %11 = vsyncpa [#allocation3], 0  ;;  %v36_v11 = vmul.f32 %v133_v4, %v28_v9  ;;  %vm67_vm0 = vcmask 261120   ;;  %vm93_vm1 = vcmask 130048   ;;  %s161_s0 = smov [#allocation2]   ;;  %s104_s11 = sshll.u32 %s232_s6, 4  ;;  %s105_s11 = int_to_ptr.hbm [resolvable:$true] %s104_s11 }
   0x6   :  { %v41_v12 = vadd.f32 %v134_v5, %v33_v7  ;;  %v42_v13 = vadd.f32 %v134_v5, %v34_v8  ;;  %v43_v14 = vadd.f32 %v134_v5, %v35_v10  ;;  %81 = vmatpush.bf16.msra.mxu0 %v126_v1  ;;  %129 = vmatpush.bf16.msra.mxu1 %v126_v1  ;;  %s102_s1 = sshll.u32 %s161_s0, 4  ;;  %s162_s12 = smov 128   ;;  %s103_s1 = int_to_ptr.vmem [resolvable:$true] %s102_s1 }
   0x7   :  { %v44_v15 = vadd.f32 %v134_v5, %v36_v11  ;;  %s163_s13 = smov 8  }
   0x8   :  { %v45_v16 = vmax.f32 %v41_v12, 0.0  ;;  %v46_v17 = vmax.f32 %v42_v13, 0.0  ;;  %v47_v18 = vmax.f32 %v43_v14, 0.0 }
   0x9   :  { %v48_v19 = vmax.f32 %v44_v15, 0.0 }
   0xa   :  { %v49_v20 = vpack.c.bf16 %v46_v17, %v45_v16 }
   0xb   :  { %v50_v21 = vpack.c.bf16 %v48_v19, %v47_v18 }
   0xc   :  { %124 = vmatmul.msk.bf16.vlgmr.msra.gmra.mxu0 %vm67_vm0, %v49_v20 }
   0xd   :  { %125 = vmatmul.msk.bf16.vlgmr.msra.gmra.mxu1 %vm67_vm0, %v50_v21 }
  0x89   :  { %v83_v22 = vpop.f32.mrf.mxu0 }
  0x8a   :  { %94 = vst.msk [vmem:[#allocation2] sm:$0xff] %vm93_vm1, %v83_v22  ;;  %v88_v23 = vpop.f32.mrf.mxu1 }
  0x8b   :  { %96 = vst.msk [vmem:[#allocation2 + $0x10] sm:$0xff] %vm93_vm1, %v88_v23 }
  0x91   :  { %v85_v24 = vpop.f32.mrf.mxu0 }
  0x92   :  { %95 = vst.msk [vmem:[#allocation2 + $0x8] sm:$0xff] %vm93_vm1, %v85_v24  ;;  %v90_v25 = vpop.f32.mrf.mxu1 }
  0x93   :  { %97 = vst.msk [vmem:[#allocation2 + $0x18] sm:$0xff] %vm93_vm1, %v90_v25 }
  0x94   :  { %110 = dma.vmem_to_hbm [thread:$0]  %s103_s1, 512, %s105_s11, [#allocation3], %s162_s12, %s162_s12, %s163_s13  }
  0x95   :  { %159 = dma.done.wait [#allocation3], 512  }
  0x96   :  { %160 = vsyncadd [#allocation3], 4294966784 }
  0x97   :  { %115 = vsyncpa [#allocation3], 1 }

</bundles_post_ra>
